<compile_context>
chip_gen: v6e
topology: v6e:2x2x1
jax: 0.10.0
libtpu: 0.0.40
codegen_flags: <defaults>
</compile_context>

<pallas_src>
import numpy as np
import jax
import jax.numpy as jnp
from jax.experimental import pallas as pl
from jax.experimental.pallas import tpu as pltpu


# ----------------------------------------------------------------------------
# Host-side exact classical simulation of the fixed part of the 4-qubit VQC.
# Convention: wire 0 is the most-significant bit of the statevector index
# (PennyLane convention).
# ----------------------------------------------------------------------------
def _rx(theta):
    c = np.cos(theta / 2.0)
    s = np.sin(theta / 2.0)
    return np.array([[c, -1j * s], [-1j * s, c]], dtype=np.complex128)


def _op_on_wire(gate, wire, n):
    ops = [np.eye(2, dtype=np.complex128)] * n
    ops[wire] = gate
    U = ops[0]
    for o in ops[1:]:
        U = np.kron(U, o)
    return U


def _cnot(control, target, n):
    dim = 2 ** n
    U = np.zeros((dim, dim), dtype=np.complex128)
    for k in range(dim):
        cbit = (k >> (n - 1 - control)) & 1
        j = k ^ (1 << (n - 1 - target)) if cbit else k
        U[j, k] = 1.0
    return U


def basic_entangler_unitary(weights, n):
    """Unitary of qml.templates.BasicEntanglerLayers(weights) (RX rotations)."""
    dim = 2 ** n
    U = np.eye(dim, dtype=np.complex128)
    n_layers = weights.shape[0]
    for l in range(n_layers):
        layer = np.eye(dim, dtype=np.complex128)
        for i in range(n):
            layer = _op_on_wire(_rx(weights[l, i]), i, n) @ layer
        pairs = [(0, 1)] if n == 2 else [(i, (i + 1) % n) for i in range(n)]
        for (c, t) in pairs:
            layer = _cnot(c, t, n) @ layer
        U = layer @ U
    return U


def gate_quadratic_forms(weights, n):
    """A[w] such that <Z_w>(y) = r(y)^T A[w] r(y), r_k = prod_i (sin or cos)(y_i/2)."""
    dim = 2 ** n
    U = basic_entangler_unitary(weights, n)
    Z = np.array([[1.0, 0.0], [0.0, -1.0]], dtype=np.complex128)
    pop = np.array([bin(k).count("1") for k in range(dim)])
    phase_k = (1j) ** pop            # conj((-i)^pop(k))
    phase_l = (-1j) ** pop           # (-i)^pop(l)
    A = np.zeros((n, dim, dim), dtype=np.float64)
    for w in range(n):
        M = U.conj().T @ _op_on_wire(Z, w, n) @ U
        A[w] = np.real(phase_k[:, None] * phase_l[None, :] * M)
    return A


def make_bits(n):
    """(n, 2^n) matrix; bits[i, k] = bit of wire i in basis index k (wire0=MSB)."""
    dim = 2 ** n
    bits = np.zeros((n, dim), dtype=np.float64)
    for i in range(n):
        for k in range(dim):
            bits[i, k] = (k >> (n - 1 - i)) & 1
    return bits


def expvals_statevector(y, weights, n):
    """Direct statevector simulation (sanity check for the quadratic forms)."""
    psi = np.array([1.0 + 0j])
    for i in range(n):
        amp = np.array([np.cos(y[i] / 2.0), -1j * np.sin(y[i] / 2.0)])
        psi = np.kron(psi, amp)
    psi = basic_entangler_unitary(weights, n) @ psi
    Z = np.array([[1.0, 0.0], [0.0, -1.0]], dtype=np.complex128)
    return np.array([np.real(psi.conj() @ _op_on_wire(Z, w, n) @ psi) for w in range(n)])


def expvals_quadform(y, A, n, bits):
    dim = 2 ** n
    ch, sh = np.cos(y / 2.0), np.sin(y / 2.0)
    r = np.ones(dim)
    for i in range(n):
        r = r * np.where(bits[i] > 0.5, sh[i], ch[i])
    return np.array([r @ A[w] @ r for w in range(n)])


# ----------------------------------------------------------------------------
# Pallas kernel: the whole recurrent forward pass for one batch tile.
#
# Inputs (per batch tile of size BB):
#   xw    (T, BB, NQ)  : x_t @ w_x + b_in, precomputed (hoisted out of the loop)
#   w_h   (H, NQ)      : h-dependent half of clayer_in (pre-transposed)
#   A_all (16, G*H*16) : all gates' quadratic forms with clayer_out folded in
#   S     (G*H*16, G*H): segmented-sum matrix (groups of 16 lanes -> 1 column)
#   b12   (1, G*H)     : clayer_out bias replicated per gate
#   bits  (NQ, 16)     : wire-bit masks for the product-state amplitudes
#   w_fc1 (H, 1), b_fc1 (1, 1): fc1 head
# Output: (BB, 1)
# ----------------------------------------------------------------------------
def qlstm_kernel(xw_ref, w_h_ref, A_all_ref, S_ref, b12_ref, bits_ref,
                 w_fc1_ref, b_fc1_ref, out_ref):
    T, BB, NQ = xw_ref.shape
    H = w_h_ref.shape[0]
    GH = S_ref.shape[1]            # gates * hidden_size (= 12)

    # Hoist all weight loads / broadcast operands out of the unrolled loop.
    w_h = w_h_ref[...]
    A_all = A_all_ref[...]
    S = S_ref[...]
    b12 = b12_ref[...]
    bits = bits_ref[...]
    w_fc1 = w_fc1_ref[...]
    b_fc1 = b_fc1_ref[...]
    bit_rows = [bits[i:i + 1, :] for i in range(NQ)]       # (1, 16) each
    inv_rows = [1.0 - b for b in bit_rows]

    h_t = jnp.zeros((BB, H), jnp.float32)
    c_t = jnp.zeros((BB, H), jnp.float32)

    # T is small and static -> fully unroll so MXU/EUP/VPU work from adjacent
    # steps can interleave.
    for t in range(T):
        # clayer_in: only the h-dependent half is on the recurrent path.
        y_t = jnp.dot(h_t, w_h, preferred_element_type=jnp.float32) + xw_ref[t]
        half = 0.5 * y_t
        ch = jnp.cos(half)
        sh = jnp.sin(half)
        # product-state amplitudes r(y): (BB, 16)
        r = ch[:, 0:1] * inv_rows[0] + sh[:, 0:1] * bit_rows[0]
        for i in range(1, NQ):
            r = r * (ch[:, i:i + 1] * inv_rows[i] + sh[:, i:i + 1] * bit_rows[i])
        # All 4 gates x H folded quadratic forms in ONE lane-dense matmul.
        P = jnp.dot(r, A_all, preferred_element_type=jnp.float32)      # (BB, GH*16)
        r_rep = jnp.concatenate([r] * GH, axis=1)                       # (BB, GH*16)
        Q = P * r_rep
        z = jnp.dot(Q, S, preferred_element_type=jnp.float32) + b12     # (BB, GH)
        f_t = jax.nn.sigmoid(z[:, 0:H])
        i_t = jax.nn.sigmoid(z[:, H:2 * H])
        g_t = jnp.tanh(z[:, 2 * H:3 * H])
        o_t = jax.nn.sigmoid(z[:, 3 * H:4 * H])
        c_t = f_t * c_t + i_t * g_t
        h_t = o_t * jnp.tanh(c_t)

    # fc1 head (the module returns fc1(h_T) only; hidden_seq is discarded).
    out_ref[...] = jnp.dot(h_t, w_fc1, preferred_element_type=jnp.float32) + b_fc1


def qlstm_forward(x, params, batch_tile=8):
    """x: (batch, seq, features) [batch_first=True]. Returns (batch, 1)."""
    B, T, F = x.shape
    x = x.astype(jnp.float32)
    NQ = params["w_x"].shape[1]
    H = params["w_h"].shape[0]

    # Hoist the x-dependent half of clayer_in (+ bias) out of the recurrence:
    # one (B*T, F) matmul instead of T tiny in-loop matmuls + lane concats.
    xw = jnp.einsum("btf,fn->btn", x, params["w_x"],
                    preferred_element_type=jnp.float32) + params["b_in"]
    xw = jnp.transpose(xw, (1, 0, 2))                     # (T, B, NQ)

    # Pad batch to a sublane-friendly multiple of the batch tile; padded rows
    # compute garbage that is sliced off before returning.
    BB = batch_tile
    B_pad = ((B + BB - 1) // BB) * BB
    if B_pad != B:
        xw = jnp.pad(xw, ((0, 0), (0, B_pad - B), (0, 0)))

    vmem = pl.BlockSpec(memory_space=pltpu.MemorySpace.VMEM)   # whole-array weights
    out = pl.pallas_call(
        qlstm_kernel,
        out_shape=jax.ShapeDtypeStruct((B_pad, 1), jnp.float32),
        grid=(B_pad // BB,),
        in_specs=[
            pl.BlockSpec((T, BB, NQ), lambda b: (0, b, 0)),    # xw, blocked over batch
            vmem,   # w_h
            vmem,   # A_all
            vmem,   # S
            vmem,   # b12
            vmem,   # bits
            vmem,   # w_fc1
            vmem,   # b_fc1
        ],
        out_specs=pl.BlockSpec((BB, 1), lambda b: (b, 0)),
        compiler_params=pltpu.CompilerParams(dimension_semantics=("parallel",)),
    )(xw, params["w_h"], params["A_all"], params["S"], params["b12"],
      params["bits"], params["w_fc1"], params["b_fc1"])
    return out[:B]


# ----------------------------------------------------------------------------
# Deterministic parameter init (shapes follow the PyTorch module's __init__),
# plus host-side folding of clayer_out into the quadratic forms.
# ----------------------------------------------------------------------------
def make_params(key, input_size, hidden_size=3, n_qubits=4, n_qlayers=2):
    concat = input_size + hidden_size
    keys = jax.random.split(key, 8)

    def linear_init(kw, kb, fan_in, fan_out):
        bound = 1.0 / np.sqrt(fan_in)
        w = jax.random.uniform(kw, (fan_out, fan_in), jnp.float32, -bound, bound)
        b = jax.random.uniform(kb, (fan_out,), jnp.float32, -bound, bound)
        return np.asarray(w, np.float64), np.asarray(b, np.float64)

    w_in, b_in = linear_init(keys[0], keys[1], concat, n_qubits)        # clayer_in
    w_out, b_out = linear_init(keys[2], keys[3], n_qubits, hidden_size)  # clayer_out
    w_fc1, b_fc1 = linear_init(keys[4], keys[5], hidden_size, 1)         # fc1

    gate_names = ["forget", "input", "update", "output"]
    vqc_w = {}
    for name, k in zip(gate_names, jax.random.split(keys[6], 4)):
        vqc_w[name] = np.asarray(
            jax.random.uniform(k, (n_qlayers, n_qubits), jnp.float32,
                               0.0, 2.0 * np.pi), dtype=np.float64)

    dim = 2 ** n_qubits
    bits = make_bits(n_qubits)
    A_gate = {name: gate_quadratic_forms(vqc_w[name], n_qubits) for name in gate_names}

    w_in_T = w_in.T      # (concat, NQ)
    w_out_T = w_out.T    # (NQ, H)
    w_fc1_T = w_fc1.T    # (H, 1)

    # Fold clayer_out into the quadratic forms and pack all gates into one
    # lane-dense RHS:  A_all[k, (g*H + j)*dim + l] = sum_w w_out_T[w, j] * A_gate[g][w, k, l]
    blocks = []
    for name in gate_names:
        A_fold = np.einsum("wkl,wj->jkl", A_gate[name], w_out_T)          # (H, dim, dim)
        blocks.append(np.transpose(A_fold, (1, 0, 2)).reshape(dim, hidden_size * dim))
    A_all = np.concatenate(blocks, axis=1)                                # (dim, G*H*dim)
    GH = len(gate_names) * hidden_size
    S = np.zeros((GH * dim, GH), np.float64)                              # segmented sum
    for c in range(GH):
        S[c * dim:(c + 1) * dim, c] = 1.0
    b12 = np.tile(b_out.reshape(1, hidden_size), (1, len(gate_names)))    # (1, G*H)

    params = {
        # kernel-side (fused) parameters
        "w_h": jnp.asarray(w_in_T[:hidden_size], jnp.float32),   # (H, NQ)
        "w_x": jnp.asarray(w_in_T[hidden_size:], jnp.float32),   # (F, NQ)
        "b_in": jnp.asarray(b_in[None, :], jnp.float32),         # (1, NQ)
        "A_all": jnp.asarray(A_all, jnp.float32),                # (16, G*H*16)
        "S": jnp.asarray(S, jnp.float32),                        # (G*H*16, G*H)
        "b12": jnp.asarray(b12, jnp.float32),                    # (1, G*H)
        "bits": jnp.asarray(bits, jnp.float32),                  # (NQ, 16)
        "w_fc1": jnp.asarray(w_fc1_T, jnp.float32),              # (H, 1)
        "b_fc1": jnp.asarray(b_fc1[None, :], jnp.float32),       # (1, 1)
        # reference-side (unfused) parameters
        "w_in": jnp.asarray(w_in_T, jnp.float32),
        "w_out": jnp.asarray(w_out_T, jnp.float32),
        "b_out": jnp.asarray(b_out[None, :], jnp.float32),
    }
    for name in gate_names:
        params["A_" + name] = jnp.asarray(A_gate[name], jnp.float32)
    return params, vqc_w


# Pure numpy (float64) reference of the same forward pass (unfused math).
def ref_forward(x_np, params):
    g = lambda k: np.asarray(params[k], np.float64)
    w_in, b_in = g("w_in"), g("b_in")
    w_out, b_out = g("w_out"), g("b_out")
    w_fc1, b_fc1 = g("w_fc1"), g("b_fc1")
    bits = g("bits")
    A = {name: g("A_" + name) for name in ["forget", "input", "update", "output"]}
    B, T, _ = x_np.shape
    NQ, H = w_in.shape[1], w_out.shape[1]
    DIM = 1 << NQ
    sigmoid = lambda z: 1.0 / (1.0 + np.exp(-z))

    def vqc(r, Ag):
        return np.stack([np.sum((r @ Ag[w]) * r, axis=1) for w in range(NQ)], axis=1)

    h = np.zeros((B, H)); c = np.zeros((B, H))
    for t in range(T):
        v = np.concatenate([h, x_np[:, t, :]], axis=1)
        y = v @ w_in + b_in
        ch, sh = np.cos(y / 2.0), np.sin(y / 2.0)
        r = np.ones((B, DIM))
        for i in range(NQ):
            bi = bits[i:i + 1, :]
            r = r * (ch[:, i:i + 1] * (1.0 - bi) + sh[:, i:i + 1] * bi)
        f = sigmoid(vqc(r, A["forget"]) @ w_out + b_out)
        ii = sigmoid(vqc(r, A["input"]) @ w_out + b_out)
        gg = np.tanh(vqc(r, A["update"]) @ w_out + b_out)
        o = sigmoid(vqc(r, A["output"]) @ w_out + b_out)
        c = f * c + ii * gg
        h = o * np.tanh(c)
    return h @ w_fc1 + b_fc1


if __name__ == "__main__":
    B, T, F = 2, 8, 8           # batch, seq, input_size
    HIDDEN, NQ, NL = 3, 4, 2    # hidden_size, n_qubits, n_qlayers (module defaults)

    key = jax.random.PRNGKey(0)
    kx, kp = jax.random.split(key)
    x = jax.random.normal(kx, (B, T, F), jnp.float32)
    params, vqc_w = make_params(kp, F, HIDDEN, NQ, NL)

    # Sanity: quadratic-form reduction == direct statevector simulation.
    y_test = np.asarray(jax.random.normal(jax.random.PRNGKey(1), (NQ,)), np.float64)
    A64 = gate_quadratic_forms(vqc_w["forget"], NQ)
    np.testing.assert_allclose(
        expvals_quadform(y_test, A64, NQ, make_bits(NQ)),
        expvals_statevector(y_test, vqc_w["forget"], NQ), atol=1e-9)

    out = jax.block_until_ready(qlstm_forward(x, params))
    assert out.shape == (B, 1)

    ref = ref_forward(np.asarray(x, np.float64), params)
    np.testing.assert_allclose(np.asarray(out, np.float64), ref, rtol=1e-2, atol=2e-3)

    print("KERNEL_OK")
</pallas_src>

<mosaic_0001>
module attributes {stable_mosaic.version = 11 : i64} {
  func.func @qlstm_kernel(%arg0: i32, %arg1: memref<8x8x4xf32, #tpu.memory_space<vmem>>, %arg2: memref<3x4xf32, #tpu.memory_space<vmem>>, %arg3: memref<16x192xf32, #tpu.memory_space<vmem>>, %arg4: memref<192x12xf32, #tpu.memory_space<vmem>>, %arg5: memref<1x12xf32, #tpu.memory_space<vmem>>, %arg6: memref<4x16xf32, #tpu.memory_space<vmem>>, %arg7: memref<3x1xf32, #tpu.memory_space<vmem>>, %arg8: memref<1x1xf32, #tpu.memory_space<vmem>>, %arg9: memref<8x1xf32, #tpu.memory_space<vmem>>) attributes {dimension_semantics = [#tpu.dimension_semantics<parallel>], iteration_bounds = array<i64: 1>, scalar_prefetch = 0 : i64, scratch_operands = 0 : i64, tpu.core_type = #tpu.core_type<tc>, window_params = [{transform_indices = @transform_0, window_bounds = array<i64: 8, 8, 4>}, {pipeline_mode = #tpu.pipeline_mode<synchronous>, transform_indices = @transform_1, window_bounds = array<i64: 3, 4>}, {pipeline_mode = #tpu.pipeline_mode<synchronous>, transform_indices = @transform_2, window_bounds = array<i64: 16, 192>}, {pipeline_mode = #tpu.pipeline_mode<synchronous>, transform_indices = @transform_3, window_bounds = array<i64: 192, 12>}, {pipeline_mode = #tpu.pipeline_mode<synchronous>, transform_indices = @transform_4, window_bounds = array<i64: 1, 12>}, {pipeline_mode = #tpu.pipeline_mode<synchronous>, transform_indices = @transform_5, window_bounds = array<i64: 4, 16>}, {pipeline_mode = #tpu.pipeline_mode<synchronous>, transform_indices = @transform_6, window_bounds = array<i64: 3, 1>}, {pipeline_mode = #tpu.pipeline_mode<synchronous>, transform_indices = @transform_7, window_bounds = array<i64: 1, 1>}, {transform_indices = @transform_8, window_bounds = array<i64: 8, 1>}]} {
    %c0 = arith.constant 0 : index
    %c0_0 = arith.constant 0 : index
    %0 = vector.load %arg2[%c0, %c0_0] : memref<3x4xf32, #tpu.memory_space<vmem>>, vector<3x4xf32>
    %c0_1 = arith.constant 0 : index
    %c0_2 = arith.constant 0 : index
    %1 = vector.load %arg3[%c0_1, %c0_2] : memref<16x192xf32, #tpu.memory_space<vmem>>, vector<16x192xf32>
    %c0_3 = arith.constant 0 : index
    %c0_4 = arith.constant 0 : index
    %2 = vector.load %arg4[%c0_3, %c0_4] : memref<192x12xf32, #tpu.memory_space<vmem>>, vector<192x12xf32>
    %c0_5 = arith.constant 0 : index
    %c0_6 = arith.constant 0 : index
    %3 = vector.load %arg5[%c0_5, %c0_6] : memref<1x12xf32, #tpu.memory_space<vmem>>, vector<1x12xf32>
    %c0_7 = arith.constant 0 : index
    %c0_8 = arith.constant 0 : index
    %4 = vector.load %arg6[%c0_7, %c0_8] : memref<4x16xf32, #tpu.memory_space<vmem>>, vector<4x16xf32>
    %c0_9 = arith.constant 0 : index
    %c0_10 = arith.constant 0 : index
    %5 = vector.load %arg7[%c0_9, %c0_10] : memref<3x1xf32, #tpu.memory_space<vmem>>, vector<3x1xf32>
    %c0_11 = arith.constant 0 : index
    %c0_12 = arith.constant 0 : index
    %6 = vector.load %arg8[%c0_11, %c0_12] : memref<1x1xf32, #tpu.memory_space<vmem>>, vector<1x1xf32>
    %7 = vector.extract_strided_slice %4 {offsets = [0, 0], sizes = [1, 16], strides = [1, 1]} : vector<4x16xf32> to vector<1x16xf32>
    %8 = vector.extract_strided_slice %4 {offsets = [1, 0], sizes = [1, 16], strides = [1, 1]} : vector<4x16xf32> to vector<1x16xf32>
    %9 = vector.extract_strided_slice %4 {offsets = [2, 0], sizes = [1, 16], strides = [1, 1]} : vector<4x16xf32> to vector<1x16xf32>
    %10 = vector.extract_strided_slice %4 {offsets = [3, 0], sizes = [1, 16], strides = [1, 1]} : vector<4x16xf32> to vector<1x16xf32>
    %cst = arith.constant 1.000000e+00 : f32
    %11 = vector.broadcast %cst : f32 to vector<1x16xf32>
    %12 = arith.subf %11, %7 : vector<1x16xf32>
    %cst_13 = arith.constant 1.000000e+00 : f32
    %13 = vector.broadcast %cst_13 : f32 to vector<1x16xf32>
    %14 = arith.subf %13, %8 : vector<1x16xf32>
    %cst_14 = arith.constant 1.000000e+00 : f32
    %15 = vector.broadcast %cst_14 : f32 to vector<1x16xf32>
    %16 = arith.subf %15, %9 : vector<1x16xf32>
    %cst_15 = arith.constant 1.000000e+00 : f32
    %17 = vector.broadcast %cst_15 : f32 to vector<1x16xf32>
    %18 = arith.subf %17, %10 : vector<1x16xf32>
    %cst_16 = arith.constant 0.000000e+00 : f32
    %19 = vector.broadcast %cst_16 : f32 to vector<8x3xf32>
    %cst_17 = arith.constant 0.000000e+00 : f32
    %20 = vector.broadcast %cst_17 : f32 to vector<8x3xf32>
    %cst_18 = arith.constant dense<0.000000e+00> : vector<8x4xf32>
    %21 = tpu.matmul %19, %0, %cst_18 {dimension_numbers = #tpu.dot_dimension_numbers<[1], [0], [0], [1], [0, 0, 1, 1], [], []>} : vector<8x3xf32>, vector<3x4xf32>, vector<8x4xf32> -> vector<8x4xf32>
    %c0_19 = arith.constant 0 : index
    %c0_20 = arith.constant 0 : index
    %c0_21 = arith.constant 0 : index
    %22 = vector.load %arg1[%c0_19, %c0_20, %c0_21] : memref<8x8x4xf32, #tpu.memory_space<vmem>>, vector<1x8x4xf32>
    %23 = vector.shape_cast %22 : vector<1x8x4xf32> to vector<8x4xf32>
    %24 = arith.addf %21, %23 : vector<8x4xf32>
    %cst_22 = arith.constant 5.000000e-01 : f32
    %25 = vector.broadcast %cst_22 : f32 to vector<8x4xf32>
    %26 = arith.mulf %25, %24 : vector<8x4xf32>
    %27 = math.cos %26 : vector<8x4xf32>
    %28 = math.sin %26 : vector<8x4xf32>
    %29 = vector.extract_strided_slice %27 {offsets = [0, 0], sizes = [8, 1], strides = [1, 1]} : vector<8x4xf32> to vector<8x1xf32>
    %30 = vector.broadcast %29 : vector<8x1xf32> to vector<8x16xf32>
    %31 = vector.broadcast %12 : vector<1x16xf32> to vector<8x16xf32>
    %32 = arith.mulf %30, %31 : vector<8x16xf32>
    %33 = vector.extract_strided_slice %28 {offsets = [0, 0], sizes = [8, 1], strides = [1, 1]} : vector<8x4xf32> to vector<8x1xf32>
    %34 = vector.broadcast %33 : vector<8x1xf32> to vector<8x16xf32>
    %35 = vector.broadcast %7 : vector<1x16xf32> to vector<8x16xf32>
    %36 = arith.mulf %34, %35 : vector<8x16xf32>
    %37 = arith.addf %32, %36 : vector<8x16xf32>
    %38 = vector.extract_strided_slice %27 {offsets = [0, 1], sizes = [8, 1], strides = [1, 1]} : vector<8x4xf32> to vector<8x1xf32>
    %39 = vector.broadcast %38 : vector<8x1xf32> to vector<8x16xf32>
    %40 = vector.broadcast %14 : vector<1x16xf32> to vector<8x16xf32>
    %41 = arith.mulf %39, %40 : vector<8x16xf32>
    %42 = vector.extract_strided_slice %28 {offsets = [0, 1], sizes = [8, 1], strides = [1, 1]} : vector<8x4xf32> to vector<8x1xf32>
    %43 = vector.broadcast %42 : vector<8x1xf32> to vector<8x16xf32>
    %44 = vector.broadcast %8 : vector<1x16xf32> to vector<8x16xf32>
    %45 = arith.mulf %43, %44 : vector<8x16xf32>
    %46 = arith.addf %41, %45 : vector<8x16xf32>
    %47 = arith.mulf %37, %46 : vector<8x16xf32>
    %48 = vector.extract_strided_slice %27 {offsets = [0, 2], sizes = [8, 1], strides = [1, 1]} : vector<8x4xf32> to vector<8x1xf32>
    %49 = vector.broadcast %48 : vector<8x1xf32> to vector<8x16xf32>
    %50 = vector.broadcast %16 : vector<1x16xf32> to vector<8x16xf32>
    %51 = arith.mulf %49, %50 : vector<8x16xf32>
    %52 = vector.extract_strided_slice %28 {offsets = [0, 2], sizes = [8, 1], strides = [1, 1]} : vector<8x4xf32> to vector<8x1xf32>
    %53 = vector.broadcast %52 : vector<8x1xf32> to vector<8x16xf32>
    %54 = vector.broadcast %9 : vector<1x16xf32> to vector<8x16xf32>
    %55 = arith.mulf %53, %54 : vector<8x16xf32>
    %56 = arith.addf %51, %55 : vector<8x16xf32>
    %57 = arith.mulf %47, %56 : vector<8x16xf32>
    %58 = vector.extract_strided_slice %27 {offsets = [0, 3], sizes = [8, 1], strides = [1, 1]} : vector<8x4xf32> to vector<8x1xf32>
    %59 = vector.broadcast %58 : vector<8x1xf32> to vector<8x16xf32>
    %60 = vector.broadcast %18 : vector<1x16xf32> to vector<8x16xf32>
    %61 = arith.mulf %59, %60 : vector<8x16xf32>
    %62 = vector.extract_strided_slice %28 {offsets = [0, 3], sizes = [8, 1], strides = [1, 1]} : vector<8x4xf32> to vector<8x1xf32>
    %63 = vector.broadcast %62 : vector<8x1xf32> to vector<8x16xf32>
    %64 = vector.broadcast %10 : vector<1x16xf32> to vector<8x16xf32>
    %65 = arith.mulf %63, %64 : vector<8x16xf32>
    %66 = arith.addf %61, %65 : vector<8x16xf32>
    %67 = arith.mulf %57, %66 : vector<8x16xf32>
    %cst_23 = arith.constant dense<0.000000e+00> : vector<8x192xf32>
    %68 = tpu.matmul %67, %1, %cst_23 {dimension_numbers = #tpu.dot_dimension_numbers<[1], [0], [0], [1], [0, 0, 1, 1], [], []>} : vector<8x16xf32>, vector<16x192xf32>, vector<8x192xf32> -> vector<8x192xf32>
    %69 = tpu.concatenate %67, %67, %67, %67, %67, %67, %67, %67, %67, %67, %67, %67 in 1 : vector<8x16xf32>, vector<8x16xf32>, vector<8x16xf32>, vector<8x16xf32>, vector<8x16xf32>, vector<8x16xf32>, vector<8x16xf32>, vector<8x16xf32>, vector<8x16xf32>, vector<8x16xf32>, vector<8x16xf32>, vector<8x16xf32> -> vector<8x192xf32>
    %70 = arith.mulf %68, %69 : vector<8x192xf32>
    %cst_24 = arith.constant dense<0.000000e+00> : vector<8x12xf32>
    %71 = tpu.matmul %70, %2, %cst_24 {dimension_numbers = #tpu.dot_dimension_numbers<[1], [0], [0], [1], [0, 0, 1, 1], [], []>} : vector<8x192xf32>, vector<192x12xf32>, vector<8x12xf32> -> vector<8x12xf32>
    %72 = vector.broadcast %3 : vector<1x12xf32> to vector<8x12xf32>
    %73 = arith.addf %71, %72 : vector<8x12xf32>
    %74 = vector.extract_strided_slice %73 {offsets = [0, 0], sizes = [8, 3], strides = [1, 1]} : vector<8x12xf32> to vector<8x3xf32>
    %75 = arith.negf %74 : vector<8x3xf32>
    %76 = math.exp %75 : vector<8x3xf32>
    %cst_25 = arith.constant 1.000000e+00 : f32
    %77 = vector.broadcast %cst_25 : f32 to vector<8x3xf32>
    %78 = arith.addf %77, %76 : vector<8x3xf32>
    %79 = arith.divf %77, %78 : vector<8x3xf32>
    %80 = vector.extract_strided_slice %73 {offsets = [0, 3], sizes = [8, 3], strides = [1, 1]} : vector<8x12xf32> to vector<8x3xf32>
    %81 = arith.negf %80 : vector<8x3xf32>
    %82 = math.exp %81 : vector<8x3xf32>
    %cst_26 = arith.constant 1.000000e+00 : f32
    %83 = vector.broadcast %cst_26 : f32 to vector<8x3xf32>
    %84 = arith.addf %83, %82 : vector<8x3xf32>
    %85 = arith.divf %83, %84 : vector<8x3xf32>
    %86 = vector.extract_strided_slice %73 {offsets = [0, 6], sizes = [8, 3], strides = [1, 1]} : vector<8x12xf32> to vector<8x3xf32>
    %87 = math.tanh %86 : vector<8x3xf32>
    %88 = vector.extract_strided_slice %73 {offsets = [0, 9], sizes = [8, 3], strides = [1, 1]} : vector<8x12xf32> to vector<8x3xf32>
    %89 = arith.negf %88 : vector<8x3xf32>
    %90 = math.exp %89 : vector<8x3xf32>
    %cst_27 = arith.constant 1.000000e+00 : f32
    %91 = vector.broadcast %cst_27 : f32 to vector<8x3xf32>
    %92 = arith.addf %91, %90 : vector<8x3xf32>
    %93 = arith.divf %91, %92 : vector<8x3xf32>
    %94 = arith.mulf %79, %20 : vector<8x3xf32>
    %95 = arith.mulf %85, %87 : vector<8x3xf32>
    %96 = arith.addf %94, %95 : vector<8x3xf32>
    %97 = math.tanh %96 : vector<8x3xf32>
    %98 = arith.mulf %93, %97 : vector<8x3xf32>
    %cst_28 = arith.constant dense<0.000000e+00> : vector<8x4xf32>
    %99 = tpu.matmul %98, %0, %cst_28 {dimension_numbers = #tpu.dot_dimension_numbers<[1], [0], [0], [1], [0, 0, 1, 1], [], []>} : vector<8x3xf32>, vector<3x4xf32>, vector<8x4xf32> -> vector<8x4xf32>
    %c1 = arith.constant 1 : index
    %c0_29 = arith.constant 0 : index
    %c0_30 = arith.constant 0 : index
    %100 = vector.load %arg1[%c1, %c0_29, %c0_30] : memref<8x8x4xf32, #tpu.memory_space<vmem>>, vector<1x8x4xf32>
    %101 = vector.shape_cast %100 : vector<1x8x4xf32> to vector<8x4xf32>
    %102 = arith.addf %99, %101 : vector<8x4xf32>
    %cst_31 = arith.constant 5.000000e-01 : f32
    %103 = vector.broadcast %cst_31 : f32 to vector<8x4xf32>
    %104 = arith.mulf %103, %102 : vector<8x4xf32>
    %105 = math.cos %104 : vector<8x4xf32>
    %106 = math.sin %104 : vector<8x4xf32>
    %107 = vector.extract_strided_slice %105 {offsets = [0, 0], sizes = [8, 1], strides = [1, 1]} : vector<8x4xf32> to vector<8x1xf32>
    %108 = vector.broadcast %107 : vector<8x1xf32> to vector<8x16xf32>
    %109 = vector.broadcast %12 : vector<1x16xf32> to vector<8x16xf32>
    %110 = arith.mulf %108, %109 : vector<8x16xf32>
    %111 = vector.extract_strided_slice %106 {offsets = [0, 0], sizes = [8, 1], strides = [1, 1]} : vector<8x4xf32> to vector<8x1xf32>
    %112 = vector.broadcast %111 : vector<8x1xf32> to vector<8x16xf32>
    %113 = vector.broadcast %7 : vector<1x16xf32> to vector<8x16xf32>
    %114 = arith.mulf %112, %113 : vector<8x16xf32>
    %115 = arith.addf %110, %114 : vector<8x16xf32>
    %116 = vector.extract_strided_slice %105 {offsets = [0, 1], sizes = [8, 1], strides = [1, 1]} : vector<8x4xf32> to vector<8x1xf32>
    %117 = vector.broadcast %116 : vector<8x1xf32> to vector<8x16xf32>
    %118 = vector.broadcast %14 : vector<1x16xf32> to vector<8x16xf32>
    %119 = arith.mulf %117, %118 : vector<8x16xf32>
    %120 = vector.extract_strided_slice %106 {offsets = [0, 1], sizes = [8, 1], strides = [1, 1]} : vector<8x4xf32> to vector<8x1xf32>
    %121 = vector.broadcast %120 : vector<8x1xf32> to vector<8x16xf32>
    %122 = vector.broadcast %8 : vector<1x16xf32> to vector<8x16xf32>
    %123 = arith.mulf %121, %122 : vector<8x16xf32>
    %124 = arith.addf %119, %123 : vector<8x16xf32>
    %125 = arith.mulf %115, %124 : vector<8x16xf32>
    %126 = vector.extract_strided_slice %105 {offsets = [0, 2], sizes = [8, 1], strides = [1, 1]} : vector<8x4xf32> to vector<8x1xf32>
    %127 = vector.broadcast %126 : vector<8x1xf32> to vector<8x16xf32>
    %128 = vector.broadcast %16 : vector<1x16xf32> to vector<8x16xf32>
    %129 = arith.mulf %127, %128 : vector<8x16xf32>
    %130 = vector.extract_strided_slice %106 {offsets = [0, 2], sizes = [8, 1], strides = [1, 1]} : vector<8x4xf32> to vector<8x1xf32>
    %131 = vector.broadcast %130 : vector<8x1xf32> to vector<8x16xf32>
    %132 = vector.broadcast %9 : vector<1x16xf32> to vector<8x16xf32>
    %133 = arith.mulf %131, %132 : vector<8x16xf32>
    %134 = arith.addf %129, %133 : vector<8x16xf32>
    %135 = arith.mulf %125, %134 : vector<8x16xf32>
    %136 = vector.extract_strided_slice %105 {offsets = [0, 3], sizes = [8, 1], strides = [1, 1]} : vector<8x4xf32> to vector<8x1xf32>
    %137 = vector.broadcast %136 : vector<8x1xf32> to vector<8x16xf32>
    %138 = vector.broadcast %18 : vector<1x16xf32> to vector<8x16xf32>
    %139 = arith.mulf %137, %138 : vector<8x16xf32>
    %140 = vector.extract_strided_slice %106 {offsets = [0, 3], sizes = [8, 1], strides = [1, 1]} : vector<8x4xf32> to vector<8x1xf32>
    %141 = vector.broadcast %140 : vector<8x1xf32> to vector<8x16xf32>
    %142 = vector.broadcast %10 : vector<1x16xf32> to vector<8x16xf32>
    %143 = arith.mulf %141, %142 : vector<8x16xf32>
    %144 = arith.addf %139, %143 : vector<8x16xf32>
    %145 = arith.mulf %135, %144 : vector<8x16xf32>
    %cst_32 = arith.constant dense<0.000000e+00> : vector<8x192xf32>
    %146 = tpu.matmul %145, %1, %cst_32 {dimension_numbers = #tpu.dot_dimension_numbers<[1], [0], [0], [1], [0, 0, 1, 1], [], []>} : vector<8x16xf32>, vector<16x192xf32>, vector<8x192xf32> -> vector<8x192xf32>
    %147 = tpu.concatenate %145, %145, %145, %145, %145, %145, %145, %145, %145, %145, %145, %145 in 1 : vector<8x16xf32>, vector<8x16xf32>, vector<8x16xf32>, vector<8x16xf32>, vector<8x16xf32>, vector<8x16xf32>, vector<8x16xf32>, vector<8x16xf32>, vector<8x16xf32>, vector<8x16xf32>, vector<8x16xf32>, vector<8x16xf32> -> vector<8x192xf32>
    %148 = arith.mulf %146, %147 : vector<8x192xf32>
    %cst_33 = arith.constant dense<0.000000e+00> : vector<8x12xf32>
    %149 = tpu.matmul %148, %2, %cst_33 {dimension_numbers = #tpu.dot_dimension_numbers<[1], [0], [0], [1], [0, 0, 1, 1], [], []>} : vector<8x192xf32>, vector<192x12xf32>, vector<8x12xf32> -> vector<8x12xf32>
    %150 = vector.broadcast %3 : vector<1x12xf32> to vector<8x12xf32>
    %151 = arith.addf %149, %150 : vector<8x12xf32>
    %152 = vector.extract_strided_slice %151 {offsets = [0, 0], sizes = [8, 3], strides = [1, 1]} : vector<8x12xf32> to vector<8x3xf32>
    %153 = arith.negf %152 : vector<8x3xf32>
    %154 = math.exp %153 : vector<8x3xf32>
    %cst_34 = arith.constant 1.000000e+00 : f32
    %155 = vector.broadcast %cst_34 : f32 to vector<8x3xf32>
    %156 = arith.addf %155, %154 : vector<8x3xf32>
    %157 = arith.divf %155, %156 : vector<8x3xf32>
    %158 = vector.extract_strided_slice %151 {offsets = [0, 3], sizes = [8, 3], strides = [1, 1]} : vector<8x12xf32> to vector<8x3xf32>
    %159 = arith.negf %158 : vector<8x3xf32>
    %160 = math.exp %159 : vector<8x3xf32>
    %cst_35 = arith.constant 1.000000e+00 : f32
    %161 = vector.broadcast %cst_35 : f32 to vector<8x3xf32>
    %162 = arith.addf %161, %160 : vector<8x3xf32>
    %163 = arith.divf %161, %162 : vector<8x3xf32>
    %164 = vector.extract_strided_slice %151 {offsets = [0, 6], sizes = [8, 3], strides = [1, 1]} : vector<8x12xf32> to vector<8x3xf32>
    %165 = math.tanh %164 : vector<8x3xf32>
    %166 = vector.extract_strided_slice %151 {offsets = [0, 9], sizes = [8, 3], strides = [1, 1]} : vector<8x12xf32> to vector<8x3xf32>
    %167 = arith.negf %166 : vector<8x3xf32>
    %168 = math.exp %167 : vector<8x3xf32>
    %cst_36 = arith.constant 1.000000e+00 : f32
    %169 = vector.broadcast %cst_36 : f32 to vector<8x3xf32>
    %170 = arith.addf %169, %168 : vector<8x3xf32>
    %171 = arith.divf %169, %170 : vector<8x3xf32>
    %172 = arith.mulf %157, %96 : vector<8x3xf32>
    %173 = arith.mulf %163, %165 : vector<8x3xf32>
    %174 = arith.addf %172, %173 : vector<8x3xf32>
    %175 = math.tanh %174 : vector<8x3xf32>
    %176 = arith.mulf %171, %175 : vector<8x3xf32>
    %cst_37 = arith.constant dense<0.000000e+00> : vector<8x4xf32>
    %177 = tpu.matmul %176, %0, %cst_37 {dimension_numbers = #tpu.dot_dimension_numbers<[1], [0], [0], [1], [0, 0, 1, 1], [], []>} : vector<8x3xf32>, vector<3x4xf32>, vector<8x4xf32> -> vector<8x4xf32>
    %c2 = arith.constant 2 : index
    %c0_38 = arith.constant 0 : index
    %c0_39 = arith.constant 0 : index
    %178 = vector.load %arg1[%c2, %c0_38, %c0_39] : memref<8x8x4xf32, #tpu.memory_space<vmem>>, vector<1x8x4xf32>
    %179 = vector.shape_cast %178 : vector<1x8x4xf32> to vector<8x4xf32>
    %180 = arith.addf %177, %179 : vector<8x4xf32>
    %cst_40 = arith.constant 5.000000e-01 : f32
    %181 = vector.broadcast %cst_40 : f32 to vector<8x4xf32>
    %182 = arith.mulf %181, %180 : vector<8x4xf32>
    %183 = math.cos %182 : vector<8x4xf32>
    %184 = math.sin %182 : vector<8x4xf32>
    %185 = vector.extract_strided_slice %183 {offsets = [0, 0], sizes = [8, 1], strides = [1, 1]} : vector<8x4xf32> to vector<8x1xf32>
    %186 = vector.broadcast %185 : vector<8x1xf32> to vector<8x16xf32>
    %187 = vector.broadcast %12 : vector<1x16xf32> to vector<8x16xf32>
    %188 = arith.mulf %186, %187 : vector<8x16xf32>
    %189 = vector.extract_strided_slice %184 {offsets = [0, 0], sizes = [8, 1], strides = [1, 1]} : vector<8x4xf32> to vector<8x1xf32>
    %190 = vector.broadcast %189 : vector<8x1xf32> to vector<8x16xf32>
    %191 = vector.broadcast %7 : vector<1x16xf32> to vector<8x16xf32>
    %192 = arith.mulf %190, %191 : vector<8x16xf32>
    %193 = arith.addf %188, %192 : vector<8x16xf32>
    %194 = vector.extract_strided_slice %183 {offsets = [0, 1], sizes = [8, 1], strides = [1, 1]} : vector<8x4xf32> to vector<8x1xf32>
    %195 = vector.broadcast %194 : vector<8x1xf32> to vector<8x16xf32>
    %196 = vector.broadcast %14 : vector<1x16xf32> to vector<8x16xf32>
    %197 = arith.mulf %195, %196 : vector<8x16xf32>
    %198 = vector.extract_strided_slice %184 {offsets = [0, 1], sizes = [8, 1], strides = [1, 1]} : vector<8x4xf32> to vector<8x1xf32>
    %199 = vector.broadcast %198 : vector<8x1xf32> to vector<8x16xf32>
    %200 = vector.broadcast %8 : vector<1x16xf32> to vector<8x16xf32>
    %201 = arith.mulf %199, %200 : vector<8x16xf32>
    %202 = arith.addf %197, %201 : vector<8x16xf32>
    %203 = arith.mulf %193, %202 : vector<8x16xf32>
    %204 = vector.extract_strided_slice %183 {offsets = [0, 2], sizes = [8, 1], strides = [1, 1]} : vector<8x4xf32> to vector<8x1xf32>
    %205 = vector.broadcast %204 : vector<8x1xf32> to vector<8x16xf32>
    %206 = vector.broadcast %16 : vector<1x16xf32> to vector<8x16xf32>
    %207 = arith.mulf %205, %206 : vector<8x16xf32>
    %208 = vector.extract_strided_slice %184 {offsets = [0, 2], sizes = [8, 1], strides = [1, 1]} : vector<8x4xf32> to vector<8x1xf32>
    %209 = vector.broadcast %208 : vector<8x1xf32> to vector<8x16xf32>
    %210 = vector.broadcast %9 : vector<1x16xf32> to vector<8x16xf32>
    %211 = arith.mulf %209, %210 : vector<8x16xf32>
    %212 = arith.addf %207, %211 : vector<8x16xf32>
    %213 = arith.mulf %203, %212 : vector<8x16xf32>
    %214 = vector.extract_strided_slice %183 {offsets = [0, 3], sizes = [8, 1], strides = [1, 1]} : vector<8x4xf32> to vector<8x1xf32>
    %215 = vector.broadcast %214 : vector<8x1xf32> to vector<8x16xf32>
    %216 = vector.broadcast %18 : vector<1x16xf32> to vector<8x16xf32>
    %217 = arith.mulf %215, %216 : vector<8x16xf32>
    %218 = vector.extract_strided_slice %184 {offsets = [0, 3], sizes = [8, 1], strides = [1, 1]} : vector<8x4xf32> to vector<8x1xf32>
    %219 = vector.broadcast %218 : vector<8x1xf32> to vector<8x16xf32>
    %220 = vector.broadcast %10 : vector<1x16xf32> to vector<8x16xf32>
    %221 = arith.mulf %219, %220 : vector<8x16xf32>
    %222 = arith.addf %217, %221 : vector<8x16xf32>
    %223 = arith.mulf %213, %222 : vector<8x16xf32>
    %cst_41 = arith.constant dense<0.000000e+00> : vector<8x192xf32>
    %224 = tpu.matmul %223, %1, %cst_41 {dimension_numbers = #tpu.dot_dimension_numbers<[1], [0], [0], [1], [0, 0, 1, 1], [], []>} : vector<8x16xf32>, vector<16x192xf32>, vector<8x192xf32> -> vector<8x192xf32>
    %225 = tpu.concatenate %223, %223, %223, %223, %223, %223, %223, %223, %223, %223, %223, %223 in 1 : vector<8x16xf32>, vector<8x16xf32>, vector<8x16xf32>, vector<8x16xf32>, vector<8x16xf32>, vector<8x16xf32>, vector<8x16xf32>, vector<8x16xf32>, vector<8x16xf32>, vector<8x16xf32>, vector<8x16xf32>, vector<8x16xf32> -> vector<8x192xf32>
    %226 = arith.mulf %224, %225 : vector<8x192xf32>
    %cst_42 = arith.constant dense<0.000000e+00> : vector<8x12xf32>
    %227 = tpu.matmul %226, %2, %cst_42 {dimension_numbers = #tpu.dot_dimension_numbers<[1], [0], [0], [1], [0, 0, 1, 1], [], []>} : vector<8x192xf32>, vector<192x12xf32>, vector<8x12xf32> -> vector<8x12xf32>
    %228 = vector.broadcast %3 : vector<1x12xf32> to vector<8x12xf32>
    %229 = arith.addf %227, %228 : vector<8x12xf32>
    %230 = vector.extract_strided_slice %229 {offsets = [0, 0], sizes = [8, 3], strides = [1, 1]} : vector<8x12xf32> to vector<8x3xf32>
    %231 = arith.negf %230 : vector<8x3xf32>
    %232 = math.exp %231 : vector<8x3xf32>
    %cst_43 = arith.constant 1.000000e+00 : f32
    %233 = vector.broadcast %cst_43 : f32 to vector<8x3xf32>
    %234 = arith.addf %233, %232 : vector<8x3xf32>
    %235 = arith.divf %233, %234 : vector<8x3xf32>
    %236 = vector.extract_strided_slice %229 {offsets = [0, 3], sizes = [8, 3], strides = [1, 1]} : vector<8x12xf32> to vector<8x3xf32>
    %237 = arith.negf %236 : vector<8x3xf32>
    %238 = math.exp %237 : vector<8x3xf32>
    %cst_44 = arith.constant 1.000000e+00 : f32
    %239 = vector.broadcast %cst_44 : f32 to vector<8x3xf32>
    %240 = arith.addf %239, %238 : vector<8x3xf32>
    %241 = arith.divf %239, %240 : vector<8x3xf32>
    %242 = vector.extract_strided_slice %229 {offsets = [0, 6], sizes = [8, 3], strides = [1, 1]} : vector<8x12xf32> to vector<8x3xf32>
    %243 = math.tanh %242 : vector<8x3xf32>
    %244 = vector.extract_strided_slice %229 {offsets = [0, 9], sizes = [8, 3], strides = [1, 1]} : vector<8x12xf32> to vector<8x3xf32>
    %245 = arith.negf %244 : vector<8x3xf32>
    %246 = math.exp %245 : vector<8x3xf32>
    %cst_45 = arith.constant 1.000000e+00 : f32
    %247 = vector.broadcast %cst_45 : f32 to vector<8x3xf32>
    %248 = arith.addf %247, %246 : vector<8x3xf32>
    %249 = arith.divf %247, %248 : vector<8x3xf32>
    %250 = arith.mulf %235, %174 : vector<8x3xf32>
    %251 = arith.mulf %241, %243 : vector<8x3xf32>
    %252 = arith.addf %250, %251 : vector<8x3xf32>
    %253 = math.tanh %252 : vector<8x3xf32>
    %254 = arith.mulf %249, %253 : vector<8x3xf32>
    %cst_46 = arith.constant dense<0.000000e+00> : vector<8x4xf32>
    %255 = tpu.matmul %254, %0, %cst_46 {dimension_numbers = #tpu.dot_dimension_numbers<[1], [0], [0], [1], [0, 0, 1, 1], [], []>} : vector<8x3xf32>, vector<3x4xf32>, vector<8x4xf32> -> vector<8x4xf32>
    %c3 = arith.constant 3 : index
    %c0_47 = arith.constant 0 : index
    %c0_48 = arith.constant 0 : index
    %256 = vector.load %arg1[%c3, %c0_47, %c0_48] : memref<8x8x4xf32, #tpu.memory_space<vmem>>, vector<1x8x4xf32>
    %257 = vector.shape_cast %256 : vector<1x8x4xf32> to vector<8x4xf32>
    %258 = arith.addf %255, %257 : vector<8x4xf32>
    %cst_49 = arith.constant 5.000000e-01 : f32
    %259 = vector.broadcast %cst_49 : f32 to vector<8x4xf32>
    %260 = arith.mulf %259, %258 : vector<8x4xf32>
    %261 = math.cos %260 : vector<8x4xf32>
    %262 = math.sin %260 : vector<8x4xf32>
    %263 = vector.extract_strided_slice %261 {offsets = [0, 0], sizes = [8, 1], strides = [1, 1]} : vector<8x4xf32> to vector<8x1xf32>
    %264 = vector.broadcast %263 : vector<8x1xf32> to vector<8x16xf32>
    %265 = vector.broadcast %12 : vector<1x16xf32> to vector<8x16xf32>
    %266 = arith.mulf %264, %265 : vector<8x16xf32>
    %267 = vector.extract_strided_slice %262 {offsets = [0, 0], sizes = [8, 1], strides = [1, 1]} : vector<8x4xf32> to vector<8x1xf32>
    %268 = vector.broadcast %267 : vector<8x1xf32> to vector<8x16xf32>
    %269 = vector.broadcast %7 : vector<1x16xf32> to vector<8x16xf32>
    %270 = arith.mulf %268, %269 : vector<8x16xf32>
    %271 = arith.addf %266, %270 : vector<8x16xf32>
    %272 = vector.extract_strided_slice %261 {offsets = [0, 1], sizes = [8, 1], strides = [1, 1]} : vector<8x4xf32> to vector<8x1xf32>
    %273 = vector.broadcast %272 : vector<8x1xf32> to vector<8x16xf32>
    %274 = vector.broadcast %14 : vector<1x16xf32> to vector<8x16xf32>
    %275 = arith.mulf %273, %274 : vector<8x16xf32>
    %276 = vector.extract_strided_slice %262 {offsets = [0, 1], sizes = [8, 1], strides = [1, 1]} : vector<8x4xf32> to vector<8x1xf32>
    %277 = vector.broadcast %276 : vector<8x1xf32> to vector<8x16xf32>
    %278 = vector.broadcast %8 : vector<1x16xf32> to vector<8x16xf32>
    %279 = arith.mulf %277, %278 : vector<8x16xf32>
    %280 = arith.addf %275, %279 : vector<8x16xf32>
    %281 = arith.mulf %271, %280 : vector<8x16xf32>
    %282 = vector.extract_strided_slice %261 {offsets = [0, 2], sizes = [8, 1], strides = [1, 1]} : vector<8x4xf32> to vector<8x1xf32>
    %283 = vector.broadcast %282 : vector<8x1xf32> to vector<8x16xf32>
    %284 = vector.broadcast %16 : vector<1x16xf32> to vector<8x16xf32>
    %285 = arith.mulf %283, %284 : vector<8x16xf32>
    %286 = vector.extract_strided_slice %262 {offsets = [0, 2], sizes = [8, 1], strides = [1, 1]} : vector<8x4xf32> to vector<8x1xf32>
    %287 = vector.broadcast %286 : vector<8x1xf32> to vector<8x16xf32>
    %288 = vector.broadcast %9 : vector<1x16xf32> to vector<8x16xf32>
    %289 = arith.mulf %287, %288 : vector<8x16xf32>
    %290 = arith.addf %285, %289 : vector<8x16xf32>
    %291 = arith.mulf %281, %290 : vector<8x16xf32>
    %292 = vector.extract_strided_slice %261 {offsets = [0, 3], sizes = [8, 1], strides = [1, 1]} : vector<8x4xf32> to vector<8x1xf32>
    %293 = vector.broadcast %292 : vector<8x1xf32> to vector<8x16xf32>
    %294 = vector.broadcast %18 : vector<1x16xf32> to vector<8x16xf32>
    %295 = arith.mulf %293, %294 : vector<8x16xf32>
    %296 = vector.extract_strided_slice %262 {offsets = [0, 3], sizes = [8, 1], strides = [1, 1]} : vector<8x4xf32> to vector<8x1xf32>
    %297 = vector.broadcast %296 : vector<8x1xf32> to vector<8x16xf32>
    %298 = vector.broadcast %10 : vector<1x16xf32> to vector<8x16xf32>
    %299 = arith.mulf %297, %298 : vector<8x16xf32>
    %300 = arith.addf %295, %299 : vector<8x16xf32>
    %301 = arith.mulf %291, %300 : vector<8x16xf32>
    %cst_50 = arith.constant dense<0.000000e+00> : vector<8x192xf32>
    %302 = tpu.matmul %301, %1, %cst_50 {dimension_numbers = #tpu.dot_dimension_numbers<[1], [0], [0], [1], [0, 0, 1, 1], [], []>} : vector<8x16xf32>, vector<16x192xf32>, vector<8x192xf32> -> vector<8x192xf32>
    %303 = tpu.concatenate %301, %301, %301, %301, %301, %301, %301, %301, %301, %301, %301, %301 in 1 : vector<8x16xf32>, vector<8x16xf32>, vector<8x16xf32>, vector<8x16xf32>, vector<8x16xf32>, vector<8x16xf32>, vector<8x16xf32>, vector<8x16xf32>, vector<8x16xf32>, vector<8x16xf32>, vector<8x16xf32>, vector<8x16xf32> -> vector<8x192xf32>
    %304 = arith.mulf %302, %303 : vector<8x192xf32>
    %cst_51 = arith.constant dense<0.000000e+00> : vector<8x12xf32>
    %305 = tpu.matmul %304, %2, %cst_51 {dimension_numbers = #tpu.dot_dimension_numbers<[1], [0], [0], [1], [0, 0, 1, 1], [], []>} : vector<8x192xf32>, vector<192x12xf32>, vector<8x12xf32> -> vector<8x12xf32>
    %306 = vector.broadcast %3 : vector<1x12xf32> to vector<8x12xf32>
    %307 = arith.addf %305, %306 : vector<8x12xf32>
    %308 = vector.extract_strided_slice %307 {offsets = [0, 0], sizes = [8, 3], strides = [1, 1]} : vector<8x12xf32> to vector<8x3xf32>
    %309 = arith.negf %308 : vector<8x3xf32>
    %310 = math.exp %309 : vector<8x3xf32>
    %cst_52 = arith.constant 1.000000e+00 : f32
    %311 = vector.broadcast %cst_52 : f32 to vector<8x3xf32>
    %312 = arith.addf %311, %310 : vector<8x3xf32>
    %313 = arith.divf %311, %312 : vector<8x3xf32>
    %314 = vector.extract_strided_slice %307 {offsets = [0, 3], sizes = [8, 3], strides = [1, 1]} : vector<8x12xf32> to vector<8x3xf32>
    %315 = arith.negf %314 : vector<8x3xf32>
    %316 = math.exp %315 : vector<8x3xf32>
    %cst_53 = arith.constant 1.000000e+00 : f32
    %317 = vector.broadcast %cst_53 : f32 to vector<8x3xf32>
    %318 = arith.addf %317, %316 : vector<8x3xf32>
    %319 = arith.divf %317, %318 : vector<8x3xf32>
    %320 = vector.extract_strided_slice %307 {offsets = [0, 6], sizes = [8, 3], strides = [1, 1]} : vector<8x12xf32> to vector<8x3xf32>
    %321 = math.tanh %320 : vector<8x3xf32>
    %322 = vector.extract_strided_slice %307 {offsets = [0, 9], sizes = [8, 3], strides = [1, 1]} : vector<8x12xf32> to vector<8x3xf32>
    %323 = arith.negf %322 : vector<8x3xf32>
    %324 = math.exp %323 : vector<8x3xf32>
    %cst_54 = arith.constant 1.000000e+00 : f32
    %325 = vector.broadcast %cst_54 : f32 to vector<8x3xf32>
    %326 = arith.addf %325, %324 : vector<8x3xf32>
    %327 = arith.divf %325, %326 : vector<8x3xf32>
    %328 = arith.mulf %313, %252 : vector<8x3xf32>
    %329 = arith.mulf %319, %321 : vector<8x3xf32>
    %330 = arith.addf %328, %329 : vector<8x3xf32>
    %331 = math.tanh %330 : vector<8x3xf32>
    %332 = arith.mulf %327, %331 : vector<8x3xf32>
    %cst_55 = arith.constant dense<0.000000e+00> : vector<8x4xf32>
    %333 = tpu.matmul %332, %0, %cst_55 {dimension_numbers = #tpu.dot_dimension_numbers<[1], [0], [0], [1], [0, 0, 1, 1], [], []>} : vector<8x3xf32>, vector<3x4xf32>, vector<8x4xf32> -> vector<8x4xf32>
    %c4 = arith.constant 4 : index
    %c0_56 = arith.constant 0 : index
    %c0_57 = arith.constant 0 : index
    %334 = vector.load %arg1[%c4, %c0_56, %c0_57] : memref<8x8x4xf32, #tpu.memory_space<vmem>>, vector<1x8x4xf32>
    %335 = vector.shape_cast %334 : vector<1x8x4xf32> to vector<8x4xf32>
    %336 = arith.addf %333, %335 : vector<8x4xf32>
    %cst_58 = arith.constant 5.000000e-01 : f32
    %337 = vector.broadcast %cst_58 : f32 to vector<8x4xf32>
    %338 = arith.mulf %337, %336 : vector<8x4xf32>
    %339 = math.cos %338 : vector<8x4xf32>
    %340 = math.sin %338 : vector<8x4xf32>
    %341 = vector.extract_strided_slice %339 {offsets = [0, 0], sizes = [8, 1], strides = [1, 1]} : vector<8x4xf32> to vector<8x1xf32>
    %342 = vector.broadcast %341 : vector<8x1xf32> to vector<8x16xf32>
    %343 = vector.broadcast %12 : vector<1x16xf32> to vector<8x16xf32>
    %344 = arith.mulf %342, %343 : vector<8x16xf32>
    %345 = vector.extract_strided_slice %340 {offsets = [0, 0], sizes = [8, 1], strides = [1, 1]} : vector<8x4xf32> to vector<8x1xf32>
    %346 = vector.broadcast %345 : vector<8x1xf32> to vector<8x16xf32>
    %347 = vector.broadcast %7 : vector<1x16xf32> to vector<8x16xf32>
    %348 = arith.mulf %346, %347 : vector<8x16xf32>
    %349 = arith.addf %344, %348 : vector<8x16xf32>
    %350 = vector.extract_strided_slice %339 {offsets = [0, 1], sizes = [8, 1], strides = [1, 1]} : vector<8x4xf32> to vector<8x1xf32>
    %351 = vector.broadcast %350 : vector<8x1xf32> to vector<8x16xf32>
    %352 = vector.broadcast %14 : vector<1x16xf32> to vector<8x16xf32>
    %353 = arith.mulf %351, %352 : vector<8x16xf32>
    %354 = vector.extract_strided_slice %340 {offsets = [0, 1], sizes = [8, 1], strides = [1, 1]} : vector<8x4xf32> to vector<8x1xf32>
    %355 = vector.broadcast %354 : vector<8x1xf32> to vector<8x16xf32>
    %356 = vector.broadcast %8 : vector<1x16xf32> to vector<8x16xf32>
    %357 = arith.mulf %355, %356 : vector<8x16xf32>
    %358 = arith.addf %353, %357 : vector<8x16xf32>
    %359 = arith.mulf %349, %358 : vector<8x16xf32>
    %360 = vector.extract_strided_slice %339 {offsets = [0, 2], sizes = [8, 1], strides = [1, 1]} : vector<8x4xf32> to vector<8x1xf32>
    %361 = vector.broadcast %360 : vector<8x1xf32> to vector<8x16xf32>
    %362 = vector.broadcast %16 : vector<1x16xf32> to vector<8x16xf32>
    %363 = arith.mulf %361, %362 : vector<8x16xf32>
    %364 = vector.extract_strided_slice %340 {offsets = [0, 2], sizes = [8, 1], strides = [1, 1]} : vector<8x4xf32> to vector<8x1xf32>
    %365 = vector.broadcast %364 : vector<8x1xf32> to vector<8x16xf32>
    %366 = vector.broadcast %9 : vector<1x16xf32> to vector<8x16xf32>
    %367 = arith.mulf %365, %366 : vector<8x16xf32>
    %368 = arith.addf %363, %367 : vector<8x16xf32>
    %369 = arith.mulf %359, %368 : vector<8x16xf32>
    %370 = vector.extract_strided_slice %339 {offsets = [0, 3], sizes = [8, 1], strides = [1, 1]} : vector<8x4xf32> to vector<8x1xf32>
    %371 = vector.broadcast %370 : vector<8x1xf32> to vector<8x16xf32>
    %372 = vector.broadcast %18 : vector<1x16xf32> to vector<8x16xf32>
    %373 = arith.mulf %371, %372 : vector<8x16xf32>
    %374 = vector.extract_strided_slice %340 {offsets = [0, 3], sizes = [8, 1], strides = [1, 1]} : vector<8x4xf32> to vector<8x1xf32>
    %375 = vector.broadcast %374 : vector<8x1xf32> to vector<8x16xf32>
    %376 = vector.broadcast %10 : vector<1x16xf32> to vector<8x16xf32>
    %377 = arith.mulf %375, %376 : vector<8x16xf32>
    %378 = arith.addf %373, %377 : vector<8x16xf32>
    %379 = arith.mulf %369, %378 : vector<8x16xf32>
    %cst_59 = arith.constant dense<0.000000e+00> : vector<8x192xf32>
    %380 = tpu.matmul %379, %1, %cst_59 {dimension_numbers = #tpu.dot_dimension_numbers<[1], [0], [0], [1], [0, 0, 1, 1], [], []>} : vector<8x16xf32>, vector<16x192xf32>, vector<8x192xf32> -> vector<8x192xf32>
    %381 = tpu.concatenate %379, %379, %379, %379, %379, %379, %379, %379, %379, %379, %379, %379 in 1 : vector<8x16xf32>, vector<8x16xf32>, vector<8x16xf32>, vector<8x16xf32>, vector<8x16xf32>, vector<8x16xf32>, vector<8x16xf32>, vector<8x16xf32>, vector<8x16xf32>, vector<8x16xf32>, vector<8x16xf32>, vector<8x16xf32> -> vector<8x192xf32>
    %382 = arith.mulf %380, %381 : vector<8x192xf32>
    %cst_60 = arith.constant dense<0.000000e+00> : vector<8x12xf32>
    %383 = tpu.matmul %382, %2, %cst_60 {dimension_numbers = #tpu.dot_dimension_numbers<[1], [0], [0], [1], [0, 0, 1, 1], [], []>} : vector<8x192xf32>, vector<192x12xf32>, vector<8x12xf32> -> vector<8x12xf32>
    %384 = vector.broadcast %3 : vector<1x12xf32> to vector<8x12xf32>
    %385 = arith.addf %383, %384 : vector<8x12xf32>
    %386 = vector.extract_strided_slice %385 {offsets = [0, 0], sizes = [8, 3], strides = [1, 1]} : vector<8x12xf32> to vector<8x3xf32>
    %387 = arith.negf %386 : vector<8x3xf32>
    %388 = math.exp %387 : vector<8x3xf32>
    %cst_61 = arith.constant 1.000000e+00 : f32
    %389 = vector.broadcast %cst_61 : f32 to vector<8x3xf32>
    %390 = arith.addf %389, %388 : vector<8x3xf32>
    %391 = arith.divf %389, %390 : vector<8x3xf32>
    %392 = vector.extract_strided_slice %385 {offsets = [0, 3], sizes = [8, 3], strides = [1, 1]} : vector<8x12xf32> to vector<8x3xf32>
    %393 = arith.negf %392 : vector<8x3xf32>
    %394 = math.exp %393 : vector<8x3xf32>
    %cst_62 = arith.constant 1.000000e+00 : f32
    %395 = vector.broadcast %cst_62 : f32 to vector<8x3xf32>
    %396 = arith.addf %395, %394 : vector<8x3xf32>
    %397 = arith.divf %395, %396 : vector<8x3xf32>
    %398 = vector.extract_strided_slice %385 {offsets = [0, 6], sizes = [8, 3], strides = [1, 1]} : vector<8x12xf32> to vector<8x3xf32>
    %399 = math.tanh %398 : vector<8x3xf32>
    %400 = vector.extract_strided_slice %385 {offsets = [0, 9], sizes = [8, 3], strides = [1, 1]} : vector<8x12xf32> to vector<8x3xf32>
    %401 = arith.negf %400 : vector<8x3xf32>
    %402 = math.exp %401 : vector<8x3xf32>
    %cst_63 = arith.constant 1.000000e+00 : f32
    %403 = vector.broadcast %cst_63 : f32 to vector<8x3xf32>
    %404 = arith.addf %403, %402 : vector<8x3xf32>
    %405 = arith.divf %403, %404 : vector<8x3xf32>
    %406 = arith.mulf %391, %330 : vector<8x3xf32>
    %407 = arith.mulf %397, %399 : vector<8x3xf32>
    %408 = arith.addf %406, %407 : vector<8x3xf32>
    %409 = math.tanh %408 : vector<8x3xf32>
    %410 = arith.mulf %405, %409 : vector<8x3xf32>
    %cst_64 = arith.constant dense<0.000000e+00> : vector<8x4xf32>
    %411 = tpu.matmul %410, %0, %cst_64 {dimension_numbers = #tpu.dot_dimension_numbers<[1], [0], [0], [1], [0, 0, 1, 1], [], []>} : vector<8x3xf32>, vector<3x4xf32>, vector<8x4xf32> -> vector<8x4xf32>
    %c5 = arith.constant 5 : index
    %c0_65 = arith.constant 0 : index
    %c0_66 = arith.constant 0 : index
    %412 = vector.load %arg1[%c5, %c0_65, %c0_66] : memref<8x8x4xf32, #tpu.memory_space<vmem>>, vector<1x8x4xf32>
    %413 = vector.shape_cast %412 : vector<1x8x4xf32> to vector<8x4xf32>
    %414 = arith.addf %411, %413 : vector<8x4xf32>
    %cst_67 = arith.constant 5.000000e-01 : f32
    %415 = vector.broadcast %cst_67 : f32 to vector<8x4xf32>
    %416 = arith.mulf %415, %414 : vector<8x4xf32>
    %417 = math.cos %416 : vector<8x4xf32>
    %418 = math.sin %416 : vector<8x4xf32>
    %419 = vector.extract_strided_slice %417 {offsets = [0, 0], sizes = [8, 1], strides = [1, 1]} : vector<8x4xf32> to vector<8x1xf32>
    %420 = vector.broadcast %419 : vector<8x1xf32> to vector<8x16xf32>
    %421 = vector.broadcast %12 : vector<1x16xf32> to vector<8x16xf32>
    %422 = arith.mulf %420, %421 : vector<8x16xf32>
    %423 = vector.extract_strided_slice %418 {offsets = [0, 0], sizes = [8, 1], strides = [1, 1]} : vector<8x4xf32> to vector<8x1xf32>
    %424 = vector.broadcast %423 : vector<8x1xf32> to vector<8x16xf32>
    %425 = vector.broadcast %7 : vector<1x16xf32> to vector<8x16xf32>
    %426 = arith.mulf %424, %425 : vector<8x16xf32>
    %427 = arith.addf %422, %426 : vector<8x16xf32>
    %428 = vector.extract_strided_slice %417 {offsets = [0, 1], sizes = [8, 1], strides = [1, 1]} : vector<8x4xf32> to vector<8x1xf32>
    %429 = vector.broadcast %428 : vector<8x1xf32> to vector<8x16xf32>
    %430 = vector.broadcast %14 : vector<1x16xf32> to vector<8x16xf32>
    %431 = arith.mulf %429, %430 : vector<8x16xf32>
    %432 = vector.extract_strided_slice %418 {offsets = [0, 1], sizes = [8, 1], strides = [1, 1]} : vector<8x4xf32> to vector<8x1xf32>
    %433 = vector.broadcast %432 : vector<8x1xf32> to vector<8x16xf32>
    %434 = vector.broadcast %8 : vector<1x16xf32> to vector<8x16xf32>
    %435 = arith.mulf %433, %434 : vector<8x16xf32>
    %436 = arith.addf %431, %435 : vector<8x16xf32>
    %437 = arith.mulf %427, %436 : vector<8x16xf32>
    %438 = vector.extract_strided_slice %417 {offsets = [0, 2], sizes = [8, 1], strides = [1, 1]} : vector<8x4xf32> to vector<8x1xf32>
    %439 = vector.broadcast %438 : vector<8x1xf32> to vector<8x16xf32>
    %440 = vector.broadcast %16 : vector<1x16xf32> to vector<8x16xf32>
    %441 = arith.mulf %439, %440 : vector<8x16xf32>
    %442 = vector.extract_strided_slice %418 {offsets = [0, 2], sizes = [8, 1], strides = [1, 1]} : vector<8x4xf32> to vector<8x1xf32>
    %443 = vector.broadcast %442 : vector<8x1xf32> to vector<8x16xf32>
    %444 = vector.broadcast %9 : vector<1x16xf32> to vector<8x16xf32>
    %445 = arith.mulf %443, %444 : vector<8x16xf32>
    %446 = arith.addf %441, %445 : vector<8x16xf32>
    %447 = arith.mulf %437, %446 : vector<8x16xf32>
    %448 = vector.extract_strided_slice %417 {offsets = [0, 3], sizes = [8, 1], strides = [1, 1]} : vector<8x4xf32> to vector<8x1xf32>
    %449 = vector.broadcast %448 : vector<8x1xf32> to vector<8x16xf32>
    %450 = vector.broadcast %18 : vector<1x16xf32> to vector<8x16xf32>
    %451 = arith.mulf %449, %450 : vector<8x16xf32>
    %452 = vector.extract_strided_slice %418 {offsets = [0, 3], sizes = [8, 1], strides = [1, 1]} : vector<8x4xf32> to vector<8x1xf32>
    %453 = vector.broadcast %452 : vector<8x1xf32> to vector<8x16xf32>
    %454 = vector.broadcast %10 : vector<1x16xf32> to vector<8x16xf32>
    %455 = arith.mulf %453, %454 : vector<8x16xf32>
    %456 = arith.addf %451, %455 : vector<8x16xf32>
    %457 = arith.mulf %447, %456 : vector<8x16xf32>
    %cst_68 = arith.constant dense<0.000000e+00> : vector<8x192xf32>
    %458 = tpu.matmul %457, %1, %cst_68 {dimension_numbers = #tpu.dot_dimension_numbers<[1], [0], [0], [1], [0, 0, 1, 1], [], []>} : vector<8x16xf32>, vector<16x192xf32>, vector<8x192xf32> -> vector<8x192xf32>
    %459 = tpu.concatenate %457, %457, %457, %457, %457, %457, %457, %457, %457, %457, %457, %457 in 1 : vector<8x16xf32>, vector<8x16xf32>, vector<8x16xf32>, vector<8x16xf32>, vector<8x16xf32>, vector<8x16xf32>, vector<8x16xf32>, vector<8x16xf32>, vector<8x16xf32>, vector<8x16xf32>, vector<8x16xf32>, vector<8x16xf32> -> vector<8x192xf32>
    %460 = arith.mulf %458, %459 : vector<8x192xf32>
    %cst_69 = arith.constant dense<0.000000e+00> : vector<8x12xf32>
    %461 = tpu.matmul %460, %2, %cst_69 {dimension_numbers = #tpu.dot_dimension_numbers<[1], [0], [0], [1], [0, 0, 1, 1], [], []>} : vector<8x192xf32>, vector<192x12xf32>, vector<8x12xf32> -> vector<8x12xf32>
    %462 = vector.broadcast %3 : vector<1x12xf32> to vector<8x12xf32>
    %463 = arith.addf %461, %462 : vector<8x12xf32>
    %464 = vector.extract_strided_slice %463 {offsets = [0, 0], sizes = [8, 3], strides = [1, 1]} : vector<8x12xf32> to vector<8x3xf32>
    %465 = arith.negf %464 : vector<8x3xf32>
    %466 = math.exp %465 : vector<8x3xf32>
    %cst_70 = arith.constant 1.000000e+00 : f32
    %467 = vector.broadcast %cst_70 : f32 to vector<8x3xf32>
    %468 = arith.addf %467, %466 : vector<8x3xf32>
    %469 = arith.divf %467, %468 : vector<8x3xf32>
    %470 = vector.extract_strided_slice %463 {offsets = [0, 3], sizes = [8, 3], strides = [1, 1]} : vector<8x12xf32> to vector<8x3xf32>
    %471 = arith.negf %470 : vector<8x3xf32>
    %472 = math.exp %471 : vector<8x3xf32>
    %cst_71 = arith.constant 1.000000e+00 : f32
    %473 = vector.broadcast %cst_71 : f32 to vector<8x3xf32>
    %474 = arith.addf %473, %472 : vector<8x3xf32>
    %475 = arith.divf %473, %474 : vector<8x3xf32>
    %476 = vector.extract_strided_slice %463 {offsets = [0, 6], sizes = [8, 3], strides = [1, 1]} : vector<8x12xf32> to vector<8x3xf32>
    %477 = math.tanh %476 : vector<8x3xf32>
    %478 = vector.extract_strided_slice %463 {offsets = [0, 9], sizes = [8, 3], strides = [1, 1]} : vector<8x12xf32> to vector<8x3xf32>
    %479 = arith.negf %478 : vector<8x3xf32>
    %480 = math.exp %479 : vector<8x3xf32>
    %cst_72 = arith.constant 1.000000e+00 : f32
    %481 = vector.broadcast %cst_72 : f32 to vector<8x3xf32>
    %482 = arith.addf %481, %480 : vector<8x3xf32>
    %483 = arith.divf %481, %482 : vector<8x3xf32>
    %484 = arith.mulf %469, %408 : vector<8x3xf32>
    %485 = arith.mulf %475, %477 : vector<8x3xf32>
    %486 = arith.addf %484, %485 : vector<8x3xf32>
    %487 = math.tanh %486 : vector<8x3xf32>
    %488 = arith.mulf %483, %487 : vector<8x3xf32>
    %cst_73 = arith.constant dense<0.000000e+00> : vector<8x4xf32>
    %489 = tpu.matmul %488, %0, %cst_73 {dimension_numbers = #tpu.dot_dimension_numbers<[1], [0], [0], [1], [0, 0, 1, 1], [], []>} : vector<8x3xf32>, vector<3x4xf32>, vector<8x4xf32> -> vector<8x4xf32>
    %c6 = arith.constant 6 : index
    %c0_74 = arith.constant 0 : index
    %c0_75 = arith.constant 0 : index
    %490 = vector.load %arg1[%c6, %c0_74, %c0_75] : memref<8x8x4xf32, #tpu.memory_space<vmem>>, vector<1x8x4xf32>
    %491 = vector.shape_cast %490 : vector<1x8x4xf32> to vector<8x4xf32>
    %492 = arith.addf %489, %491 : vector<8x4xf32>
    %cst_76 = arith.constant 5.000000e-01 : f32
    %493 = vector.broadcast %cst_76 : f32 to vector<8x4xf32>
    %494 = arith.mulf %493, %492 : vector<8x4xf32>
    %495 = math.cos %494 : vector<8x4xf32>
    %496 = math.sin %494 : vector<8x4xf32>
    %497 = vector.extract_strided_slice %495 {offsets = [0, 0], sizes = [8, 1], strides = [1, 1]} : vector<8x4xf32> to vector<8x1xf32>
    %498 = vector.broadcast %497 : vector<8x1xf32> to vector<8x16xf32>
    %499 = vector.broadcast %12 : vector<1x16xf32> to vector<8x16xf32>
    %500 = arith.mulf %498, %499 : vector<8x16xf32>
    %501 = vector.extract_strided_slice %496 {offsets = [0, 0], sizes = [8, 1], strides = [1, 1]} : vector<8x4xf32> to vector<8x1xf32>
    %502 = vector.broadcast %501 : vector<8x1xf32> to vector<8x16xf32>
    %503 = vector.broadcast %7 : vector<1x16xf32> to vector<8x16xf32>
    %504 = arith.mulf %502, %503 : vector<8x16xf32>
    %505 = arith.addf %500, %504 : vector<8x16xf32>
    %506 = vector.extract_strided_slice %495 {offsets = [0, 1], sizes = [8, 1], strides = [1, 1]} : vector<8x4xf32> to vector<8x1xf32>
    %507 = vector.broadcast %506 : vector<8x1xf32> to vector<8x16xf32>
    %508 = vector.broadcast %14 : vector<1x16xf32> to vector<8x16xf32>
    %509 = arith.mulf %507, %508 : vector<8x16xf32>
    %510 = vector.extract_strided_slice %496 {offsets = [0, 1], sizes = [8, 1], strides = [1, 1]} : vector<8x4xf32> to vector<8x1xf32>
    %511 = vector.broadcast %510 : vector<8x1xf32> to vector<8x16xf32>
    %512 = vector.broadcast %8 : vector<1x16xf32> to vector<8x16xf32>
    %513 = arith.mulf %511, %512 : vector<8x16xf32>
    %514 = arith.addf %509, %513 : vector<8x16xf32>
    %515 = arith.mulf %505, %514 : vector<8x16xf32>
    %516 = vector.extract_strided_slice %495 {offsets = [0, 2], sizes = [8, 1], strides = [1, 1]} : vector<8x4xf32> to vector<8x1xf32>
    %517 = vector.broadcast %516 : vector<8x1xf32> to vector<8x16xf32>
    %518 = vector.broadcast %16 : vector<1x16xf32> to vector<8x16xf32>
    %519 = arith.mulf %517, %518 : vector<8x16xf32>
    %520 = vector.extract_strided_slice %496 {offsets = [0, 2], sizes = [8, 1], strides = [1, 1]} : vector<8x4xf32> to vector<8x1xf32>
    %521 = vector.broadcast %520 : vector<8x1xf32> to vector<8x16xf32>
    %522 = vector.broadcast %9 : vector<1x16xf32> to vector<8x16xf32>
    %523 = arith.mulf %521, %522 : vector<8x16xf32>
    %524 = arith.addf %519, %523 : vector<8x16xf32>
    %525 = arith.mulf %515, %524 : vector<8x16xf32>
    %526 = vector.extract_strided_slice %495 {offsets = [0, 3], sizes = [8, 1], strides = [1, 1]} : vector<8x4xf32> to vector<8x1xf32>
    %527 = vector.broadcast %526 : vector<8x1xf32> to vector<8x16xf32>
    %528 = vector.broadcast %18 : vector<1x16xf32> to vector<8x16xf32>
    %529 = arith.mulf %527, %528 : vector<8x16xf32>
    %530 = vector.extract_strided_slice %496 {offsets = [0, 3], sizes = [8, 1], strides = [1, 1]} : vector<8x4xf32> to vector<8x1xf32>
    %531 = vector.broadcast %530 : vector<8x1xf32> to vector<8x16xf32>
    %532 = vector.broadcast %10 : vector<1x16xf32> to vector<8x16xf32>
    %533 = arith.mulf %531, %532 : vector<8x16xf32>
    %534 = arith.addf %529, %533 : vector<8x16xf32>
    %535 = arith.mulf %525, %534 : vector<8x16xf32>
    %cst_77 = arith.constant dense<0.000000e+00> : vector<8x192xf32>
    %536 = tpu.matmul %535, %1, %cst_77 {dimension_numbers = #tpu.dot_dimension_numbers<[1], [0], [0], [1], [0, 0, 1, 1], [], []>} : vector<8x16xf32>, vector<16x192xf32>, vector<8x192xf32> -> vector<8x192xf32>
    %537 = tpu.concatenate %535, %535, %535, %535, %535, %535, %535, %535, %535, %535, %535, %535 in 1 : vector<8x16xf32>, vector<8x16xf32>, vector<8x16xf32>, vector<8x16xf32>, vector<8x16xf32>, vector<8x16xf32>, vector<8x16xf32>, vector<8x16xf32>, vector<8x16xf32>, vector<8x16xf32>, vector<8x16xf32>, vector<8x16xf32> -> vector<8x192xf32>
    %538 = arith.mulf %536, %537 : vector<8x192xf32>
    %cst_78 = arith.constant dense<0.000000e+00> : vector<8x12xf32>
    %539 = tpu.matmul %538, %2, %cst_78 {dimension_numbers = #tpu.dot_dimension_numbers<[1], [0], [0], [1], [0, 0, 1, 1], [], []>} : vector<8x192xf32>, vector<192x12xf32>, vector<8x12xf32> -> vector<8x12xf32>
    %540 = vector.broadcast %3 : vector<1x12xf32> to vector<8x12xf32>
    %541 = arith.addf %539, %540 : vector<8x12xf32>
    %542 = vector.extract_strided_slice %541 {offsets = [0, 0], sizes = [8, 3], strides = [1, 1]} : vector<8x12xf32> to vector<8x3xf32>
    %543 = arith.negf %542 : vector<8x3xf32>
    %544 = math.exp %543 : vector<8x3xf32>
    %cst_79 = arith.constant 1.000000e+00 : f32
    %545 = vector.broadcast %cst_79 : f32 to vector<8x3xf32>
    %546 = arith.addf %545, %544 : vector<8x3xf32>
    %547 = arith.divf %545, %546 : vector<8x3xf32>
    %548 = vector.extract_strided_slice %541 {offsets = [0, 3], sizes = [8, 3], strides = [1, 1]} : vector<8x12xf32> to vector<8x3xf32>
    %549 = arith.negf %548 : vector<8x3xf32>
    %550 = math.exp %549 : vector<8x3xf32>
    %cst_80 = arith.constant 1.000000e+00 : f32
    %551 = vector.broadcast %cst_80 : f32 to vector<8x3xf32>
    %552 = arith.addf %551, %550 : vector<8x3xf32>
    %553 = arith.divf %551, %552 : vector<8x3xf32>
    %554 = vector.extract_strided_slice %541 {offsets = [0, 6], sizes = [8, 3], strides = [1, 1]} : vector<8x12xf32> to vector<8x3xf32>
    %555 = math.tanh %554 : vector<8x3xf32>
    %556 = vector.extract_strided_slice %541 {offsets = [0, 9], sizes = [8, 3], strides = [1, 1]} : vector<8x12xf32> to vector<8x3xf32>
    %557 = arith.negf %556 : vector<8x3xf32>
    %558 = math.exp %557 : vector<8x3xf32>
    %cst_81 = arith.constant 1.000000e+00 : f32
    %559 = vector.broadcast %cst_81 : f32 to vector<8x3xf32>
    %560 = arith.addf %559, %558 : vector<8x3xf32>
    %561 = arith.divf %559, %560 : vector<8x3xf32>
    %562 = arith.mulf %547, %486 : vector<8x3xf32>
    %563 = arith.mulf %553, %555 : vector<8x3xf32>
    %564 = arith.addf %562, %563 : vector<8x3xf32>
    %565 = math.tanh %564 : vector<8x3xf32>
    %566 = arith.mulf %561, %565 : vector<8x3xf32>
    %cst_82 = arith.constant dense<0.000000e+00> : vector<8x4xf32>
    %567 = tpu.matmul %566, %0, %cst_82 {dimension_numbers = #tpu.dot_dimension_numbers<[1], [0], [0], [1], [0, 0, 1, 1], [], []>} : vector<8x3xf32>, vector<3x4xf32>, vector<8x4xf32> -> vector<8x4xf32>
    %c7 = arith.constant 7 : index
    %c0_83 = arith.constant 0 : index
    %c0_84 = arith.constant 0 : index
    %568 = vector.load %arg1[%c7, %c0_83, %c0_84] : memref<8x8x4xf32, #tpu.memory_space<vmem>>, vector<1x8x4xf32>
    %569 = vector.shape_cast %568 : vector<1x8x4xf32> to vector<8x4xf32>
    %570 = arith.addf %567, %569 : vector<8x4xf32>
    %cst_85 = arith.constant 5.000000e-01 : f32
    %571 = vector.broadcast %cst_85 : f32 to vector<8x4xf32>
    %572 = arith.mulf %571, %570 : vector<8x4xf32>
    %573 = math.cos %572 : vector<8x4xf32>
    %574 = math.sin %572 : vector<8x4xf32>
    %575 = vector.extract_strided_slice %573 {offsets = [0, 0], sizes = [8, 1], strides = [1, 1]} : vector<8x4xf32> to vector<8x1xf32>
    %576 = vector.broadcast %575 : vector<8x1xf32> to vector<8x16xf32>
    %577 = vector.broadcast %12 : vector<1x16xf32> to vector<8x16xf32>
    %578 = arith.mulf %576, %577 : vector<8x16xf32>
    %579 = vector.extract_strided_slice %574 {offsets = [0, 0], sizes = [8, 1], strides = [1, 1]} : vector<8x4xf32> to vector<8x1xf32>
    %580 = vector.broadcast %579 : vector<8x1xf32> to vector<8x16xf32>
    %581 = vector.broadcast %7 : vector<1x16xf32> to vector<8x16xf32>
    %582 = arith.mulf %580, %581 : vector<8x16xf32>
    %583 = arith.addf %578, %582 : vector<8x16xf32>
    %584 = vector.extract_strided_slice %573 {offsets = [0, 1], sizes = [8, 1], strides = [1, 1]} : vector<8x4xf32> to vector<8x1xf32>
    %585 = vector.broadcast %584 : vector<8x1xf32> to vector<8x16xf32>
    %586 = vector.broadcast %14 : vector<1x16xf32> to vector<8x16xf32>
    %587 = arith.mulf %585, %586 : vector<8x16xf32>
    %588 = vector.extract_strided_slice %574 {offsets = [0, 1], sizes = [8, 1], strides = [1, 1]} : vector<8x4xf32> to vector<8x1xf32>
    %589 = vector.broadcast %588 : vector<8x1xf32> to vector<8x16xf32>
    %590 = vector.broadcast %8 : vector<1x16xf32> to vector<8x16xf32>
    %591 = arith.mulf %589, %590 : vector<8x16xf32>
    %592 = arith.addf %587, %591 : vector<8x16xf32>
    %593 = arith.mulf %583, %592 : vector<8x16xf32>
    %594 = vector.extract_strided_slice %573 {offsets = [0, 2], sizes = [8, 1], strides = [1, 1]} : vector<8x4xf32> to vector<8x1xf32>
    %595 = vector.broadcast %594 : vector<8x1xf32> to vector<8x16xf32>
    %596 = vector.broadcast %16 : vector<1x16xf32> to vector<8x16xf32>
    %597 = arith.mulf %595, %596 : vector<8x16xf32>
    %598 = vector.extract_strided_slice %574 {offsets = [0, 2], sizes = [8, 1], strides = [1, 1]} : vector<8x4xf32> to vector<8x1xf32>
    %599 = vector.broadcast %598 : vector<8x1xf32> to vector<8x16xf32>
    %600 = vector.broadcast %9 : vector<1x16xf32> to vector<8x16xf32>
    %601 = arith.mulf %599, %600 : vector<8x16xf32>
    %602 = arith.addf %597, %601 : vector<8x16xf32>
    %603 = arith.mulf %593, %602 : vector<8x16xf32>
    %604 = vector.extract_strided_slice %573 {offsets = [0, 3], sizes = [8, 1], strides = [1, 1]} : vector<8x4xf32> to vector<8x1xf32>
    %605 = vector.broadcast %604 : vector<8x1xf32> to vector<8x16xf32>
    %606 = vector.broadcast %18 : vector<1x16xf32> to vector<8x16xf32>
    %607 = arith.mulf %605, %606 : vector<8x16xf32>
    %608 = vector.extract_strided_slice %574 {offsets = [0, 3], sizes = [8, 1], strides = [1, 1]} : vector<8x4xf32> to vector<8x1xf32>
    %609 = vector.broadcast %608 : vector<8x1xf32> to vector<8x16xf32>
    %610 = vector.broadcast %10 : vector<1x16xf32> to vector<8x16xf32>
    %611 = arith.mulf %609, %610 : vector<8x16xf32>
    %612 = arith.addf %607, %611 : vector<8x16xf32>
    %613 = arith.mulf %603, %612 : vector<8x16xf32>
    %cst_86 = arith.constant dense<0.000000e+00> : vector<8x192xf32>
    %614 = tpu.matmul %613, %1, %cst_86 {dimension_numbers = #tpu.dot_dimension_numbers<[1], [0], [0], [1], [0, 0, 1, 1], [], []>} : vector<8x16xf32>, vector<16x192xf32>, vector<8x192xf32> -> vector<8x192xf32>
    %615 = tpu.concatenate %613, %613, %613, %613, %613, %613, %613, %613, %613, %613, %613, %613 in 1 : vector<8x16xf32>, vector<8x16xf32>, vector<8x16xf32>, vector<8x16xf32>, vector<8x16xf32>, vector<8x16xf32>, vector<8x16xf32>, vector<8x16xf32>, vector<8x16xf32>, vector<8x16xf32>, vector<8x16xf32>, vector<8x16xf32> -> vector<8x192xf32>
    %616 = arith.mulf %614, %615 : vector<8x192xf32>
    %cst_87 = arith.constant dense<0.000000e+00> : vector<8x12xf32>
    %617 = tpu.matmul %616, %2, %cst_87 {dimension_numbers = #tpu.dot_dimension_numbers<[1], [0], [0], [1], [0, 0, 1, 1], [], []>} : vector<8x192xf32>, vector<192x12xf32>, vector<8x12xf32> -> vector<8x12xf32>
    %618 = vector.broadcast %3 : vector<1x12xf32> to vector<8x12xf32>
    %619 = arith.addf %617, %618 : vector<8x12xf32>
    %620 = vector.extract_strided_slice %619 {offsets = [0, 0], sizes = [8, 3], strides = [1, 1]} : vector<8x12xf32> to vector<8x3xf32>
    %621 = arith.negf %620 : vector<8x3xf32>
    %622 = math.exp %621 : vector<8x3xf32>
    %cst_88 = arith.constant 1.000000e+00 : f32
    %623 = vector.broadcast %cst_88 : f32 to vector<8x3xf32>
    %624 = arith.addf %623, %622 : vector<8x3xf32>
    %625 = arith.divf %623, %624 : vector<8x3xf32>
    %626 = vector.extract_strided_slice %619 {offsets = [0, 3], sizes = [8, 3], strides = [1, 1]} : vector<8x12xf32> to vector<8x3xf32>
    %627 = arith.negf %626 : vector<8x3xf32>
    %628 = math.exp %627 : vector<8x3xf32>
    %cst_89 = arith.constant 1.000000e+00 : f32
    %629 = vector.broadcast %cst_89 : f32 to vector<8x3xf32>
    %630 = arith.addf %629, %628 : vector<8x3xf32>
    %631 = arith.divf %629, %630 : vector<8x3xf32>
    %632 = vector.extract_strided_slice %619 {offsets = [0, 6], sizes = [8, 3], strides = [1, 1]} : vector<8x12xf32> to vector<8x3xf32>
    %633 = math.tanh %632 : vector<8x3xf32>
    %634 = vector.extract_strided_slice %619 {offsets = [0, 9], sizes = [8, 3], strides = [1, 1]} : vector<8x12xf32> to vector<8x3xf32>
    %635 = arith.negf %634 : vector<8x3xf32>
    %636 = math.exp %635 : vector<8x3xf32>
    %cst_90 = arith.constant 1.000000e+00 : f32
    %637 = vector.broadcast %cst_90 : f32 to vector<8x3xf32>
    %638 = arith.addf %637, %636 : vector<8x3xf32>
    %639 = arith.divf %637, %638 : vector<8x3xf32>
    %640 = arith.mulf %625, %564 : vector<8x3xf32>
    %641 = arith.mulf %631, %633 : vector<8x3xf32>
    %642 = arith.addf %640, %641 : vector<8x3xf32>
    %643 = math.tanh %642 : vector<8x3xf32>
    %644 = arith.mulf %639, %643 : vector<8x3xf32>
    %cst_91 = arith.constant dense<0.000000e+00> : vector<8x1xf32>
    %645 = tpu.matmul %644, %5, %cst_91 {dimension_numbers = #tpu.dot_dimension_numbers<[1], [0], [0], [1], [0, 0, 1, 1], [], []>} : vector<8x3xf32>, vector<3x1xf32>, vector<8x1xf32> -> vector<8x1xf32>
    %646 = vector.broadcast %6 : vector<1x1xf32> to vector<8x1xf32>
    %647 = arith.addf %645, %646 : vector<8x1xf32>
    %c0_92 = arith.constant 0 : index
    %c0_93 = arith.constant 0 : index
    %648 = vector.load %arg9[%c0_92, %c0_93] : memref<8x1xf32, #tpu.memory_space<vmem>>, vector<8x1xf32>
    tpu.vector_store %arg9[%c0_92, %c0_93], %647 {strides = array<i32>} : memref<8x1xf32, #tpu.memory_space<vmem>>, vector<8x1xf32>,
    return
  }
  func.func @transform_0(%arg0: i32) -> (i32, i32, i32) {
    %c0_i32 = arith.constant 0 : i32
    %c0_i32_0 = arith.constant 0 : i32
    %c0_i32_1 = arith.constant 0 : i32
    return %c0_i32, %arg0, %c0_i32_0 : i32, i32, i32
  }
  func.func @transform_1(%arg0: i32) -> (i32, i32) {
    %c0_i32 = arith.constant 0 : i32
    %c0_i32_0 = arith.constant 0 : i32
    %c0_i32_1 = arith.constant 0 : i32
    return %c0_i32, %c0_i32_0 : i32, i32
  }
  func.func @transform_2(%arg0: i32) -> (i32, i32) {
    %c0_i32 = arith.constant 0 : i32
    %c0_i32_0 = arith.constant 0 : i32
    %c0_i32_1 = arith.constant 0 : i32
    return %c0_i32, %c0_i32_0 : i32, i32
  }
  func.func @transform_3(%arg0: i32) -> (i32, i32) {
    %c0_i32 = arith.constant 0 : i32
    %c0_i32_0 = arith.constant 0 : i32
    %c0_i32_1 = arith.constant 0 : i32
    return %c0_i32, %c0_i32_0 : i32, i32
  }
  func.func @transform_4(%arg0: i32) -> (i32, i32) {
    %c0_i32 = arith.constant 0 : i32
    %c0_i32_0 = arith.constant 0 : i32
    %c0_i32_1 = arith.constant 0 : i32
    return %c0_i32, %c0_i32_0 : i32, i32
  }
  func.func @transform_5(%arg0: i32) -> (i32, i32) {
    %c0_i32 = arith.constant 0 : i32
    %c0_i32_0 = arith.constant 0 : i32
    %c0_i32_1 = arith.constant 0 : i32
    return %c0_i32, %c0_i32_0 : i32, i32
  }
  func.func @transform_6(%arg0: i32) -> (i32, i32) {
    %c0_i32 = arith.constant 0 : i32
    %c0_i32_0 = arith.constant 0 : i32
    %c0_i32_1 = arith.constant 0 : i32
    return %c0_i32, %c0_i32_0 : i32, i32
  }
  func.func @transform_7(%arg0: i32) -> (i32, i32) {
    %c0_i32 = arith.constant 0 : i32
    %c0_i32_0 = arith.constant 0 : i32
    %c0_i32_1 = arith.constant 0 : i32
    return %c0_i32, %c0_i32_0 : i32, i32
  }
  func.func @transform_8(%arg0: i32) -> (i32, i32) {
    %c0_i32 = arith.constant 0 : i32
    %c0_i32_0 = arith.constant 0 : i32
    return %arg0, %c0_i32 : i32, i32
  }
}

</mosaic_0001>

<bundles_post_ra>
// kernel: tpu_custom_call.1
= control target key start
LH: loop header
LB: loop body
LE: loop exit
PB: predicated region body
PF: predicated region fallthrough
CT: control target
= control target key end

     0   :  { %vm6786_vm0 = vcmask 1042432   ;;  %v6756_v0 = vmov 0.0   ;;  %vm6784_vm1 = vmmov 0   ;;  %v6762_v2 = vmov 1   ;;  %s4966_s19 = smov 16   ;;  %s4967_s24 = smov 80   ;;  %s6747_s1 = inlined_call_operand.vmem [shape: f32[3,4], index: 1, kind: input, shape index: {}]   ;;  %s6748_s0 = inlined_call_operand.vmem [shape: f32[8,8,4], index: 0, kind: input, shape index: {}]   ;;  %s6749_s2 = inlined_call_operand.vmem [shape: f32[16,192], index: 2, kind: input, shape index: {}]   ;;  %s6750_s5 = inlined_call_operand.vmem [shape: f32[4,16], index: 5, kind: input, shape index: {}]   ;;  %s6751_s3 = inlined_call_operand.vmem [shape: f32[192,12], index: 3, kind: input, shape index: {}]   ;;  %s6752_s4 = inlined_call_operand.vmem [shape: f32[1,12], index: 4, kind: input, shape index: {}]   ;;  %s6753_s6 = inlined_call_operand.vmem [shape: f32[3,1], index: 6, kind: input, shape index: {}]   ;;  %s6754_s7 = inlined_call_operand.<no memory space> [shape: f32[1,1], index: 7, kind: input, shape index: {}]   ;;  %s6755_s8 = inlined_call_operand.vmem [shape: f32[8,1], index: 8, kind: output, shape index: {}]  }
   0x1   :  { %4614 = vmatprep.subr.mxu0 %v6756_v0  ;;  %v5024_v1 = vld [vmem:[%s6747_s1] sm:$0x7]  ;;  %4616 = vmatprep.mubr.msk.f32.mxu0 %vm6784_vm1, %v6756_v0  ;;  %v6758_v3 = vmov 0   ;;  %v6769_v19 = vmov 683565275   ;;  %s4968_s25 = smov 32  }
   0x2   :  { %4615 = vmatpush3.msk.msra.mxu0 %vm6786_vm0, %v5024_v1  ;;  %4619 = vmatprep.subr.mxu1 %v6756_v0  ;;  %v65_v4 = vld [vmem:[%s6748_s0] sm:$0xff]  ;;  %v6767_v21 = vmov 2475754826   ;;  %v6771_v24 = vmov 2131351028   ;;  %s4969_s30 = smov 112  }
   0x3   :  { %4617 = vmatmul.mubr.f32.vlgmr.msra.gmra.mxu0 %v6756_v0  ;;  %4620 = vmatpush3.msk.msra.mxu1 %vm6786_vm0, %v5024_v1  ;;  %v6776_v27 = vmov 2102212464   ;;  %v6779_v30 = vmov 920167782   ;;  %v6781_v33 = vmov 1326507024  }
   0x4   :  { %501 = vmatprep.mubr.f32.mxu0 %v6756_v0  ;;  %4621 = vmatprep.mubr.msk.f32.mxu1 %vm6784_vm1, %v6756_v0  ;;  %s4970_s9 = smov 64   ;;  %s4971_s14 = smov 96  }
   0x5   :  { %4714 = vset.pattern.permute.xlu1 %v6762_v2  ;;  %4713 = vset.pattern.permute.xlu0 %v6758_v3  ;;  %s4972_s22 = smov 125   ;;  %s4973_s23 = smov 9  }
   0x6   :  { %s4974_s26 = smov 119  }
  0xc3   :  { %v140_v5 = vpop.f32.mrf.mxu0 }
  0xc4   :  { %v141_v6 = vadd.f32 %v140_v5, %v65_v4 }
  0xc5   :  { %v4618_v7 = vpop.f32.mrf.mxu0 }
  0xc6   :  { %v5042_v8 = vmul.f32 0.5, %v141_v6 }
  0xc8   :  { %v148_v9 = vand.u32 2139095040, %v5042_v8  ;;  %v145_v13 = vand.u32 2147483647, %v5042_v8  ;;  %vm147_vm9 = vcmp.lt.s32.totalorder %v5042_v8, 0 }
  0xca   :  { %v149_v10 = vshrl.u32 %v148_v9, 23  ;;  %v152_v16 = vand.u32 8388607, %v145_v13  ;;  %vm146_vm10 = vcmp.le.f32.partialorder %v145_v13, 0.7853982 }
  0xcc   :  { %v4483_v11 = vadd.s32 4294967169, %v149_v10  ;;  %v153_v35 = vor.u32 8388608, %v152_v16 }
  0xce   :  { %v155_v12 = vadd.s32 1, %v4483_v11  ;;  %v193_v49 = vshll.u32 %v153_v35, 8 }
  0xd0   :  { %vm156_vm2 = vcmp.gt.s32.totalorder %v155_v12, 0 }
  0xd1   :  { %v157_v14 = vsel %vm156_vm2, %v155_v12, 0  ;;  %vm237_vm2 = vweird.f32 %v5042_v8 }
  0xd2   :  { %v159_v15 = vand.u32 31, %v157_v14  ;;  %v158_v18 = vshrl.u32 %v157_v14, 5 }
  0xd4   :  { %v160_v17 = vsub.s32 32, %v159_v15  ;;  %v162_v20 = vshll.u32 %v6769_v19, %v159_v15  ;;  %v165_v22 = vshll.u32 %v6767_v21, %v159_v15  ;;  %v168_v26 = vshll.u32 %v6771_v24, %v159_v15 }
  0xd5   :  { %v171_v29 = vshll.u32 %v6776_v27, %v159_v15  ;;  %v174_v32 = vshll.u32 %v6779_v30, %v159_v15  ;;  %vm177_vm3 = vcmp.lt.s32.totalorder %v158_v18, 1  ;;  %vm180_vm4 = vcmp.lt.s32.totalorder %v158_v18, 4 }
  0xd6   :  { %v163_v23 = vshrl.u32 %v6767_v21, %v160_v17  ;;  %v166_v25 = vshrl.u32 %v6771_v24, %v160_v17  ;;  %v169_v28 = vshrl.u32 %v6776_v27, %v160_v17  ;;  %v172_v31 = vshrl.u32 %v6779_v30, %v160_v17 }
  0xd7   :  { %v175_v34 = vshrl.u32 %v6781_v33, %v160_v17  ;;  %v161_v44 = vshrl.u32 %v6769_v19, %v160_v17  ;;  %vm179_vm5 = vcmp.lt.s32.totalorder %v158_v18, 3  ;;  %vm178_vm6 = vcmp.lt.s32.totalorder %v158_v18, 2 }
  0xd8   :  { %v164_v36 = vor.u32 %v163_v23, %v162_v20  ;;  %v167_v37 = vor.u32 %v166_v25, %v165_v22  ;;  %v170_v38 = vor.u32 %v169_v28, %v168_v26  ;;  %v173_v39 = vor.u32 %v172_v31, %v171_v29 }
  0xd9   :  { %v176_v40 = vor.u32 %v175_v34, %v174_v32 }
  0xda   :  { %v182_v41 = vsel %vm180_vm4, %v170_v38, 2102212464  ;;  %v185_v42 = vsel %vm177_vm3, %v164_v36, %v167_v37  ;;  %v189_v43 = vsel %vm177_vm3, %v167_v37, %v170_v38  ;;  %v186_v45 = vsel %vm180_vm4, %v173_v39, 920167782 }
  0xdb   :  { %v190_v46 = vsel %vm180_vm4, %v176_v40, 1326507024  ;;  %v187_v47 = vsel %vm179_vm5, %v170_v38, %v186_v45  ;;  %v181_v50 = vsel %vm177_vm3, %v161_v44, %v164_v36  ;;  %v183_v51 = vsel %vm179_vm5, %v167_v37, %v182_v41 }
  0xdc   :  { %v191_v48 = vsel %vm179_vm5, %v173_v39, %v190_v46  ;;  %v188_v52 = vsel %vm178_vm6, %v185_v42, %v187_v47  ;;  %v184_v58 = vsel %vm178_vm6, %v181_v50, %v183_v51  ;;  %vm433_vm4 = vcmask 130048  }
  0xdd   :  { %v192_v53 = vsel %vm178_vm6, %v189_v43, %v191_v48  ;;  %v5062_v56 = vmul.u32.u64.low %v193_v49, %v188_v52  ;;  %v5063_v57 = vmul.u32.u64.high %v193_v49, %v188_v52, %v5062_v56  ;;  %v200_v60 = vmul.u32 %v193_v49, %v184_v58 }
  0xde   :  { %v5059_v54 = vmul.u32.u64.low %v193_v49, %v192_v53  ;;  %v5060_v55 = vmul.u32.u64.high %v193_v49, %v192_v53, %v5059_v54  ;;  %v6764_v52 = vmov 2   ;;  %v6760_v53 = vmov 3  }
  0xdf   :  { %v203_v59 = vadd.s32 1, %v5063_v57  ;;  %v5086_v54 = vld [vmem:[%s6749_s2 + $0x10] sm:$0xff]  ;;  %vm530_vm5 = vcmask 261120   ;;  %vm532_vm6 = vcmask 392192  }
  0xe0   :  { %vm202_vm7 = vc.u32 %v5060_v55, %v5062_v56  ;;  %v201_v14 = vadd.s32 %v5062_v56, %v5060_v55  ;;  %6822 = vst [vmem:[#allocation3_spill] sm:$0xff] %v5086_v54  ;;  %v5091_v55 = vld [vmem:[%s6749_s2 + $0x8] sm:$0xff]  ;;  %v5097_v56 = vld [vmem:[%s6749_s2] sm:$0xff] }
  0xe1   :  { %v204_v61 = vsel %vm202_vm7, %v203_v59, %v5063_v57  ;;  %6823 = vst [vmem:[#allocation4_spill] sm:$0xff] %v5091_v55  ;;  %6824 = vst [vmem:[#allocation5_spill] sm:$0xff] %v5097_v56  ;;  %v357_v57 = vlaneseq  ;;  %v61_v59 = vld [vmem:[%s6750_s5] sm:$0xf]  ;;  %s4965_s5 = smov 48   ;;  %vm534_vm7 = vcmask 523264  }
  0xe2   :  { %v205_v62 = vadd.s32 %v204_v61, %v200_v60 }
  0xe3   :  { %v358_v58 = vshrl.u32 %v357_v57, 7  ;;  %v5215_v57 = vld [vmem:[%s6751_s3 + $0x30] sm:$0xff] }
  0xe4   :  { %v206_v63 = vadd.s32 536870912, %v205_v62 }
  0xe6   :  { %v207_v4 = vshrl.u32 %v206_v63, 30  ;;  %v379_v63 = vsub.s32 1, %v358_v58 }
  0xe8   :  { %v208_v5 = vshll.u32 %v207_v4, 30  ;;  %v231_v34 = vsub.s32 4, %v207_v4 }
  0xea   :  { %v209_v6 = vsub.s32 %v205_v62, %v208_v5  ;;  %v232_v36 = vsel %vm147_vm9, %v231_v34, %v207_v4  ;;  %v64_v62 = vsub.f32 1.0, %v61_v59  ;;  %v359_v4 = vsub.s32 0, %v358_v58 }
  0xeb   :  { %v234_v37 = vsel %vm146_vm10, 0, %v232_v36  ;;  %v399_v5 = vsub.s32 2, %v358_v58 }
  0xec   :  { %v211_v7 = vsub.s32 0, %v209_v6  ;;  %v341_v38 = vadd.s32 3, %v234_v37  ;;  %v238_v39 = vand.u32 3, %v234_v37 }
  0xee   :  { %v4484_v9 = vmin.u32 %v211_v7, %v209_v6  ;;  %v342_v40 = vand.u32 3, %v341_v38  ;;  %vm243_vm11 = vcmp.eq.s32.totalorder %v238_v39, 2  ;;  %vm240_vm12 = vcmp.eq.s32.totalorder %v238_v39, 0 }
  0xef   :  { %vm239_vm15 = vcmp.lt.s32.totalorder %v238_v39, 2  ;;  %v5111_v7 = vrot.slane %v61_v59, %v359_v4 }
  0xf0   :  { %v213_v10 = vclz %v4484_v9  ;;  %vm344_vm13 = vcmp.eq.s32.totalorder %v342_v40, 0  ;;  %vm347_vm14 = vcmp.eq.s32.totalorder %v342_v40, 2  ;;  %vm343_vm3 = vcmp.lt.s32.totalorder %v342_v40, 2 }
  0xf2   :  { %v4485_v11 = vadd.s32 4294967294, %v213_v10 }
  0xf4   :  { %vm4486_vm8 = vcmp.lt.s32.totalorder %v4485_v11, 0 }
  0xf5   :  { %v216_v12 = vsel %vm4486_vm8, 0, %v4485_v11  ;;  %v5113_v11 = vrot.slane %v64_v62, %v379_v63  ;;  %vm536_vm8 = vcmask 654336  }
  0xf6   :  { %v217_v15 = vsub.s32 32, %v216_v12  ;;  %v221_v16 = vsub.s32 4294967266, %v216_v12  ;;  %v218_v17 = vshll.u32 %v209_v6, %v216_v12  ;;  %v5109_v6 = vrot.slane %v61_v59, %v379_v63  ;;  %v5257_v63 = vld [vmem:[%s6751_s3] sm:$0xff] }
  0xf7   :  { %v5115_v12 = vrot.slane %v64_v62, %v359_v4  ;;  %v5264_v4 = vld [vmem:[%s6751_s3 + $0xb8] sm:$0xff] }
  0xf8   :  { %v219_v18 = vshrl.u32 %v201_v14, %v217_v15  ;;  %v222_v20 = vadd.s32 127, %v221_v16  ;;  %v5117_v14 = vrot.slane %v61_v59, %v399_v5  ;;  %v5119_v15 = vrot.slane %v64_v62, %v399_v5  ;;  %v5271_v5 = vld [vmem:[%s6751_s3 + $0xb0] sm:$0xff] }
  0xfa   :  { %v220_v22 = vor.u32 %v219_v18, %v218_v17  ;;  %v223_v23 = vshll.u32 %v222_v20, 23  ;;  %v419_v18 = vsub.s32 3, %v358_v58  ;;  %v5222_v58 = vld [vmem:[%s6751_s3 + $0x28] sm:$0xff] }
  0xfc   :  { %v224_v25 = vor.u32 4788187, %v223_v23  ;;  %v227_v28 = vcvt.s32.f32 %v220_v22  ;;  %v5129_v34 = vrot.slane %v61_v59, %v419_v18  ;;  %v5229_v59 = vld [vmem:[%s6751_s3 + $0x20] sm:$0xff] }
  0xfe   :  { %v225_v26 = vand.u32 2147483647, %v224_v25 }
 0x100   :  { %v228_v29 = vmul.f32 %v227_v28, %v225_v26 }
 0x102   :  { %v229_v31 = vxor.u32 2147483648, %v228_v29 }
 0x104   :  { %v230_v32 = vsel %vm147_vm9, %v229_v31, %v228_v29  ;;  %vm538_vm9 = vcmask 785408  }
 0x105   :  { %v233_v35 = vsel %vm146_vm10, %v5042_v8, %v230_v32  ;;  %v5079_v8 = vld [vmem:[%s6749_s2 + $0x18] sm:$0xff]  ;;  %v5127_v32 = vrot.slane %v64_v62, %v419_v18  ;;  %v5250_v62 = vld [vmem:[%s6751_s3 + $0x8] sm:$0xff]  ;;  %vm540_vm10 = vcmask 916480  }
 0x106   :  { %4768 = vcosq.f32 %v233_v35  ;;  %465 = vmatprep.subr.mxu0 %v5079_v8  ;;  %1012 = vmatprep.subr.mxu1 %v5079_v8  ;;  %v5308_v18 = vld [vmem:[%s6751_s3 + $0x88] sm:$0xff] }
 0x107   :  { %4770 = vsinq.f32 %v233_v35  ;;  %466 = vmatpush1.msra.mxu0 %v5086_v54 }
 0x108   :  { %467 = vmatprep.subr.mxu0 %v5091_v55 }
 0x109   :  { %468 = vmatpush1.msra.mxu0 %v5097_v56 }
 0x10a   :  { %553 = vmatprep.subr.mxu0 %v6756_v0 }
 0x113   :  { %v4769_v41 = vpop.eup %4768 }
 0x114   :  { %v4771_v42 = vpop.eup %4770  ;;  %v244_v43 = vxor.u32 2147483648, %v4769_v41 }
 0x115   :  { %v241_v44 = vxor.u32 2147483648, %v4771_v42 }
 0x116   :  { %v245_v45 = vsel %vm243_vm11, %v244_v43, %v4771_v42  ;;  %v349_v47 = vsel %vm347_vm14, %v244_v43, %v4771_v42  ;;  %vm6783_vm11 = vcmask 23552  }
 0x117   :  { %v242_v13 = vsel %vm240_vm12, %v4769_v41, %v241_v44  ;;  %v346_v46 = vsel %vm344_vm13, %v4769_v41, %v241_v44  ;;  %v5142_v44 = vld [vmem:[%s6751_s3 + $0x78] sm:$0xff] }
 0x118   :  { %v246_v48 = vsel %vm239_vm15, %v242_v13, %v245_v45  ;;  %v350_v50 = vsel %vm343_vm3, %v346_v46, %v349_v47  ;;  %v5150_v45 = vld [vmem:[%s6751_s3 + $0x70] sm:$0xff]  ;;  %v5160_v13 = vld [vmem:[%s6751_s3 + $0x68] sm:$0xff]  ;;  %v5168_v46 = vld [vmem:[%s6751_s3 + $0x60] sm:$0xff] }
 0x119   :  { %v247_v49 = vsel %vm237_vm2, nan, %v246_v48  ;;  %v351_v51 = vsel %vm237_vm2, nan, %v350_v50  ;;  %v5178_v47 = vld [vmem:[%s6751_s3 + $0x58] sm:$0xff]  ;;  %v5185_v48 = vld [vmem:[%s6751_s3 + $0x50] sm:$0xff]  ;;  %v5201_v50 = vld [vmem:[%s6751_s3 + $0x40] sm:$0xff] }
 0x11a   :  { %374 = vperm.xlu1 %4714, %v247_v49   ;;  %354 = vperm.xlu0 %4713, %v247_v49  }
 0x11e   :  { %383 = vperm.xlu1 %4714, %v351_v51   ;;  %364 = vperm.xlu0 %4713, %v351_v51  }
 0x122   :  { %4716 = vset.pattern.permute.xlu1 %v6764_v52  ;;  %4715 = vset.pattern.permute.xlu0 %v6764_v52 }
 0x123   :  { %403 = vperm.xlu1 %4716, %v351_v51   ;;  %394 = vperm.xlu0 %4715, %v247_v49  }
 0x127   :  { %4717 = vset.pattern.permute.xlu1 %v6760_v53  ;;  %4718 = vset.pattern.permute.xlu0 %v6760_v53 }
 0x128   :  { %414 = vperm.xlu1 %4717, %v247_v49   ;;  %423 = vperm.xlu0 %4718, %v351_v51   ;;  %v5194_v49 = vld [vmem:[%s6751_s3 + $0x48] sm:$0xff]  ;;  %v5208_v51 = vld [vmem:[%s6751_s3 + $0x38] sm:$0xff] }
 0x12c   :  { %4719 = vset.pattern.permute.xlu1 %v6758_v3  ;;  %4720 = vset.pattern.permute.xlu0 %v6758_v3 }
 0x195   :  { %v375_v60 = vpop.permute.xlu1 %374  ;;  %v355_v61 = vpop.permute.xlu0 %354 }
 0x196   :  { %v381_v20 = vmul.f32 %v5113_v11, %v375_v60  ;;  %v361_v22 = vmul.f32 %v5115_v12, %v355_v61  ;;  %v5236_v60 = vld [vmem:[%s6751_s3 + $0x18] sm:$0xff]  ;;  %v5243_v61 = vld [vmem:[%s6751_s3 + $0x10] sm:$0xff] }
 0x199   :  { %v384_v9 = vpop.permute.xlu1 %383  ;;  %v365_v10 = vpop.permute.xlu0 %364 }
 0x19a   :  { %v390_v16 = vmul.f32 %v5109_v6, %v384_v9  ;;  %v371_v17 = vmul.f32 %v5111_v7, %v365_v10  ;;  %v5278_v9 = vld [vmem:[%s6751_s3 + $0xa8] sm:$0xff]  ;;  %v5285_v10 = vld [vmem:[%s6751_s3 + $0xa0] sm:$0xff] }
 0x19c   :  { %v391_v29 = vadd.f32 %v390_v16, %v381_v20  ;;  %v372_v31 = vadd.f32 %v371_v17, %v361_v22  ;;  %v5292_v16 = vld [vmem:[%s6751_s3 + $0x98] sm:$0xff]  ;;  %v5301_v17 = vld [vmem:[%s6751_s3 + $0x90] sm:$0xff]  ;;  %v5314_v20 = vld [vmem:[%s6751_s3 + $0x80] sm:$0xff] }
 0x19e   :  { %v404_v23 = vpop.permute.xlu1 %403  ;;  %v395_v25 = vpop.permute.xlu0 %394  ;;  %v392_v38 = vmul.f32 %v391_v29, %v372_v31 }
 0x19f   :  { %v410_v26 = vmul.f32 %v5117_v14, %v404_v23  ;;  %v401_v28 = vmul.f32 %v5119_v15, %v395_v25 }
 0x1a1   :  { %v411_v35 = vadd.f32 %v410_v26, %v401_v28 }
 0x1a3   :  { %v415_v36 = vpop.permute.xlu1 %414  ;;  %v424_v37 = vpop.permute.xlu0 %423  ;;  %v412_v41 = vmul.f32 %v411_v35, %v392_v38 }
 0x1a4   :  { %v421_v39 = vmul.f32 %v5127_v32, %v415_v36  ;;  %v430_v40 = vmul.f32 %v5129_v34, %v424_v37 }
 0x1a6   :  { %v431_v42 = vadd.f32 %v430_v40, %v421_v39 }
 0x1a8   :  { %v5133_v43 = vmul.f32 %v431_v42, %v412_v41 }
 0x1aa   :  { %514 = vrot.lane.b32.xlu0 %v5133_v43, %s4965_s5  ;;  %508 = vrot.lane.b32.xlu1 %v5133_v43, %s4966_s19 }
 0x1ab   :  { %4491 = vmatmul.mubr.msk.f32.vlgmr.msra.gmra.mxu0 %vm433_vm4, %v5133_v43 }
 0x1ac   :  { %554 = vmatpush1.msra.mxu0 %v5142_v44 }
 0x1ad   :  { %555 = vmatprep.subr.mxu0 %v6756_v0 }
 0x1ae   :  { %520 = vrot.lane.b32.xlu0 %v5133_v43, %s4967_s24  ;;  %511 = vrot.lane.b32.xlu1 %v5133_v43, %s4968_s25 }
 0x1af   :  { %556 = vmatpush1.msra.mxu0 %v5150_v45 }
 0x1b0   :  { %557 = vmatprep.subr.mxu0 %v6756_v0 }
 0x1b1   :  { %558 = vmatpush1.msra.mxu0 %v5160_v13 }
 0x1b2   :  { %526 = vrot.lane.b32.xlu0 %v5133_v43, %s4969_s30  ;;  %517 = vrot.lane.b32.xlu1 %v5133_v43, %s4970_s9 }
 0x1b3   :  { %559 = vmatprep.subr.mxu0 %v6756_v0 }
 0x1b4   :  { %560 = vmatpush1.msra.mxu0 %v5168_v46 }
 0x1b5   :  { %561 = vmatprep.subr.mxu0 %v6756_v0 }
 0x1b6   :  { %523 = vrot.lane.b32.xlu1 %v5133_v43, %s4971_s14  ;;  %562 = vmatpush1.msra.mxu0 %v5178_v47 }
 0x1b7   :  { %563 = vmatprep.subr.mxu0 %v6756_v0 }
 0x1b8   :  { %564 = vmatpush1.msra.mxu0 %v5185_v48 }
 0x1b9   :  { %565 = vmatprep.subr.mxu0 %v6756_v0 }
 0x1ba   :  { %566 = vmatpush1.msra.mxu0 %v5194_v49 }
 0x1bb   :  { %567 = vmatprep.subr.mxu0 %v6756_v0 }
 0x1bc   :  { %568 = vmatpush1.msra.mxu0 %v5201_v50 }
 0x1bd   :  { %569 = vmatprep.subr.mxu0 %v6756_v0 }
 0x1be   :  { %570 = vmatpush1.msra.mxu0 %v5208_v51 }
 0x1bf   :  { %571 = vmatprep.subr.mxu0 %v6756_v0 }
 0x1c0   :  { %572 = vmatpush1.msra.mxu0 %v5215_v57 }
 0x1c1   :  { %573 = vmatprep.subr.mxu0 %v6756_v0 }
 0x1c2   :  { %574 = vmatpush1.msra.mxu0 %v5222_v58 }
 0x1c3   :  { %575 = vmatprep.subr.mxu0 %v6756_v0 }
 0x1c4   :  { %576 = vmatpush1.msra.mxu0 %v5229_v59 }
 0x1c5   :  { %577 = vmatprep.subr.mxu0 %v6756_v0 }
 0x1c6   :  { %578 = vmatpush1.msra.mxu0 %v5236_v60 }
 0x1c7   :  { %579 = vmatprep.subr.mxu0 %v6756_v0 }
 0x1c8   :  { %580 = vmatpush1.msra.mxu0 %v5243_v61 }
 0x1c9   :  { %581 = vmatprep.subr.mxu0 %v6756_v0 }
 0x1ca   :  { %582 = vmatpush1.msra.mxu0 %v5250_v62 }
 0x1cb   :  { %583 = vmatprep.subr.mxu0 %v6756_v0 }
 0x1cc   :  { %584 = vmatpush1.msra.mxu0 %v5257_v63 }
 0x1cd   :  { %601 = vmatprep.subr.mxu0 %v6756_v0 }
 0x1ce   :  { %602 = vmatpush2.msra.mxu0 %v5264_v4 }
 0x1cf   :  { %603 = vmatprep.subr.mxu0 %v6756_v0 }
 0x1d0   :  { %604 = vmatpush2.msra.mxu0 %v5271_v5 }
 0x1d1   :  { %605 = vmatprep.subr.mxu0 %v6756_v0 }
 0x1d2   :  { %606 = vmatpush2.msra.mxu0 %v5278_v9 }
 0x1d3   :  { %607 = vmatprep.subr.mxu0 %v6756_v0 }
 0x1d4   :  { %608 = vmatpush2.msra.mxu0 %v5285_v10 }
 0x1d5   :  { %609 = vmatprep.subr.mxu0 %v6756_v0 }
 0x1d6   :  { %610 = vmatpush2.msra.mxu0 %v5292_v16 }
 0x1d7   :  { %611 = vmatprep.subr.mxu0 %v6756_v0 }
 0x1d8   :  { %612 = vmatpush2.msra.mxu0 %v5301_v17 }
 0x1d9   :  { %613 = vmatprep.subr.mxu0 %v6756_v0 }
 0x1da   :  { %614 = vmatpush2.msra.mxu0 %v5308_v18 }
 0x1db   :  { %615 = vmatprep.subr.mxu0 %v6756_v0 }
 0x1dc   :  { %616 = vmatpush2.msra.mxu0 %v5314_v20 }
 0x1dd   :  { %4624 = vmatprep.subr.mxu0 %v6756_v0 }
 0x21c   :  { %v509_v22 = vpop.permute.xlu1 %508  ;;  %v515_v25 = vpop.permute.xlu0 %514 }
 0x21d   :  { %v529_v26 = vsel %vm433_vm4, %v5133_v43, %v509_v22 }
 0x220   :  { %v512_v23 = vpop.permute.xlu1 %511  ;;  %v521_v35 = vpop.permute.xlu0 %520 }
 0x221   :  { %v531_v29 = vsel %vm530_vm5, %v529_v26, %v512_v23 }
 0x222   :  { %v533_v31 = vsel %vm532_vm6, %v531_v29, %v515_v25  ;;  %v5336_v25 = vld [vmem:[%s6752_s4] ss:$0 sm:$0xff] }
 0x224   :  { %v518_v28 = vpop.permute.xlu1 %517  ;;  %v527_v41 = vpop.permute.xlu0 %526 }
 0x225   :  { %v535_v36 = vsel %vm534_vm7, %v533_v31, %v518_v28 }
 0x226   :  { %v537_v38 = vsel %vm536_vm8, %v535_v36, %v521_v35 }
 0x228   :  { %v524_v37 = vpop.permute.xlu1 %523 }
 0x229   :  { %v539_v39 = vsel %vm538_vm9, %v537_v38, %v524_v37 }
 0x22a   :  { %v541_v43 = vsel %vm540_vm10, %v539_v39, %v527_v41 }
 0x26b   :  { %v503_v40 = vpop.f32.mrf.mxu0 }
 0x26c   :  { %v542_v23 = vmul.f32 %v541_v43, %v503_v40 }
 0x26d   :  { %v505_v42 = vpop.f32.mrf.mxu0 }
 0x26e   :  { %v543_v22 = vmul.f32 %v533_v31, %v505_v42 }
 0x270   :  { %4493 = vmatprep.mubr.msk.f32.mxu0 %vm534_vm7, %v543_v22 }
 0x271   :  { %618 = vmatmul.mubr.f32.vlgmr.msra.gmra.mxu0 %v542_v23 }
 0x272   :  { %4625 = vmatpush3.msk.msra.mxu0 %vm6786_vm0, %v5024_v1  ;;  %4626 = vmatprep.mubr.msk.f32.mxu0 %vm6784_vm1, %v6756_v0 }
 0x273   :  { %1547 = vmatprep.subr.mxu0 %v5079_v8 }
 0x331   :  { %v619_v26 = vpop.f32.mrf.mxu0 }
 0x332   :  { %v620_v28 = vadd.f32 %v5336_v25, %v619_v26 }
 0x333   :  { %v621_v29 = vpop.f32.mrf.mxu0 }
 0x334   :  { %4772 = vtanh.f32 %v620_v28  ;;  %v4494_v1 = vmul.f32 -1.442695, %v620_v28  ;;  %v4495_v28 = vld [vmem:[%s6748_s0 + $0x8] sm:$0xff] }
 0x336   :  { %4774 = vpow2.f32 %v4494_v1 }
 0x341   :  { %v4773_v31 = vpop.eup %4772 }
 0x342   :  { %632 = vrot.lane.b32.xlu1 %v4773_v31, %s4972_s22 }
 0x343   :  { %v4775_v35 = vpop.eup %4774 }
 0x344   :  { %v626_v36 = vadd.f32 1.0, %v4775_v35 }
 0x346   :  { %4776 = vrcp.f32 %v626_v36 }
 0x353   :  { %v4777_v37 = vpop.eup %4776 }
 0x354   :  { %v630_v40 = vmul.f32 0.0, %v4777_v37 }
 0x3b4   :  { %v633_v38 = vpop.permute.xlu1 %632 }
 0x3b5   :  { %v635_v39 = vmul.f32 %v4777_v37, %v633_v38 }
 0x3b7   :  { %637 = vrot.lane.b32.xlu0 %v635_v39, %s4972_s22 }
 0x429   :  { %v638_v41 = vpop.permute.xlu0 %637 }
 0x42a   :  { %v5341_v42 = vadd.f32 %v638_v41, %v630_v40 }
 0x42c   :  { %6825 = vst [vmem:[#allocation6_spill] sm:$0xff] %v5341_v42  ;;  %4778 = vtanh.f32 %v5341_v42 }
 0x439   :  { %v4779_v43 = vpop.eup %4778 }
 0x43a   :  { %643 = vrot.lane.b32.xlu1 %v4779_v43, %s4973_s23 }
 0x4ac   :  { %v644_v22 = vpop.permute.xlu1 %643 }
 0x4ad   :  { %v646_v23 = vmul.f32 %v4777_v37, %v644_v22 }
 0x4af   :  { %650 = vrot.lane.b32.xlu0 %v646_v23, %s4974_s26 }
 0x521   :  { %v651_v26 = vpop.permute.xlu0 %650 }
 0x522   :  { %4622 = vmatmul.mubr.msk.f32.vlgmr.msra.gmra.mxu1 %vm6783_vm11, %v651_v26 }
 0x523   :  { %1013 = vmatpush1.msra.mxu1 %v5086_v54  ;;  %1048 = vmatprep.mubr.f32.mxu1 %v6756_v0 }
 0x524   :  { %1014 = vmatprep.subr.mxu1 %v5091_v55  ;;  %v6826_v55 = vmov 683565275  }
 0x525   :  { %1015 = vmatpush1.msra.mxu1 %v5097_v56 }
 0x526   :  { %1088 = vmatprep.subr.mxu1 %v6756_v0 }
 0x5e2   :  { %v720_v29 = vpop.f32.mrf.mxu1 }
 0x5e3   :  { %v721_v31 = vadd.f32 %v4495_v28, %v720_v29 }
 0x5e4   :  { %v4623_v1 = vpop.f32.mrf.mxu1 }
 0x5e5   :  { %v5355_v35 = vmul.f32 0.5, %v721_v31 }
 0x5e7   :  { %v728_v36 = vand.u32 2139095040, %v5355_v35  ;;  %v6766_v40 = vand.u32 2147483647, %v5355_v35 }
 0x5e9   :  { %v729_v37 = vshrl.u32 %v728_v36, 23  ;;  %v732_v22 = vand.u32 8388607, %v6766_v40 }
 0x5eb   :  { %v4498_v38 = vadd.s32 4294967169, %v729_v37  ;;  %v733_v3 = vor.u32 8388608, %v732_v22 }
 0x5ed   :  { %v735_v39 = vadd.s32 1, %v4498_v38 }
 0x5ef   :  { %vm736_vm12 = vcmp.gt.s32.totalorder %v735_v39, 0 }
 0x5f0   :  { %v737_v41 = vsel %vm736_vm12, %v735_v39, 0 }
 0x5f1   :  { %v739_v43 = vand.u32 31, %v737_v41  ;;  %v738_v26 = vshrl.u32 %v737_v41, 5 }
 0x5f3   :  { %v740_v23 = vsub.s32 32, %v739_v43  ;;  %v742_v28 = vshll.u32 %v6769_v19, %v739_v43  ;;  %v745_v29 = vshll.u32 %v6767_v21, %v739_v43  ;;  %v748_v36 = vshll.u32 %v6771_v24, %v739_v43 }
 0x5f4   :  { %v751_v38 = vshll.u32 %v6776_v27, %v739_v43  ;;  %v754_v0 = vshll.u32 %v6779_v30, %v739_v43  ;;  %vm757_vm13 = vcmp.lt.s32.totalorder %v738_v26, 1  ;;  %vm760_vm14 = vcmp.lt.s32.totalorder %v738_v26, 4 }
 0x5f5   :  { %v743_v31 = vshrl.u32 %v6767_v21, %v740_v23  ;;  %v746_v1 = vshrl.u32 %v6771_v24, %v740_v23  ;;  %v749_v37 = vshrl.u32 %v6776_v27, %v740_v23  ;;  %v752_v39 = vshrl.u32 %v6779_v30, %v740_v23 }
 0x5f6   :  { %v755_v41 = vshrl.u32 %v6781_v33, %v740_v23  ;;  %v741_v54 = vshrl.u32 %v6826_v55, %v740_v23  ;;  %vm759_vm15 = vcmp.lt.s32.totalorder %v738_v26, 3  ;;  %vm758_vm2 = vcmp.lt.s32.totalorder %v738_v26, 2 }
 0x5f7   :  { %v744_v53 = vor.u32 %v743_v31, %v742_v28  ;;  %v747_v2 = vor.u32 %v746_v1, %v745_v29  ;;  %v750_v52 = vor.u32 %v749_v37, %v748_v36  ;;  %v753_v40 = vor.u32 %v752_v39, %v751_v38 }
 0x5f8   :  { %v756_v21 = vor.u32 %v755_v41, %v754_v0  ;;  %v773_v33 = vshll.u32 %v733_v3, 8 }
 0x5f9   :  { %v762_v19 = vsel %vm760_vm14, %v750_v52, 2102212464  ;;  %v765_v24 = vsel %vm757_vm13, %v744_v53, %v747_v2  ;;  %v769_v56 = vsel %vm757_vm13, %v747_v2, %v750_v52  ;;  %v766_v27 = vsel %vm760_vm14, %v753_v40, 920167782 }
 0x5fa   :  { %v770_v42 = vsel %vm760_vm14, %v756_v21, 1326507024  ;;  %v767_v43 = vsel %vm759_vm15, %v750_v52, %v766_v27  ;;  %v761_v22 = vsel %vm757_vm13, %v741_v54, %v744_v53  ;;  %v763_v28 = vsel %vm759_vm15, %v747_v2, %v762_v19 }
 0x5fb   :  { %v771_v30 = vsel %vm759_vm15, %v753_v40, %v770_v42  ;;  %v768_v29 = vsel %vm758_vm2, %v765_v24, %v767_v43  ;;  %v764_v38 = vsel %vm758_vm2, %v761_v22, %v763_v28  ;;  %vm727_vm13 = vcmp.lt.s32.totalorder %v5355_v35, 0 }
 0x5fc   :  { %v772_v31 = vsel %vm758_vm2, %v769_v56, %v771_v30  ;;  %v5375_v36 = vmul.u32.u64.low %v773_v33, %v768_v29  ;;  %v5376_v37 = vmul.u32.u64.high %v773_v33, %v768_v29, %v5375_v36  ;;  %v780_v21 = vmul.u32 %v773_v33, %v764_v38 }
 0x5fd   :  { %v5372_v1 = vmul.u32.u64.low %v773_v33, %v772_v31  ;;  %v5373_v0 = vmul.u32.u64.high %v773_v33, %v772_v31, %v5372_v1 }
 0x5fe   :  { %v783_v23 = vadd.s32 1, %v5376_v37 }
 0x5ff   :  { %vm782_vm3 = vc.u32 %v5373_v0, %v5375_v36  ;;  %v781_v40 = vadd.s32 %v5375_v36, %v5373_v0 }
 0x600   :  { %v784_v27 = vsel %vm782_vm3, %v783_v23, %v5376_v37 }
 0x601   :  { %v785_v52 = vadd.s32 %v784_v27, %v780_v21  ;;  %v6827_v21 = vand.u32 2147483647, %v5355_v35 }
 0x603   :  { %v786_v3 = vadd.s32 536870912, %v785_v52  ;;  %vm726_vm14 = vcmp.le.f32.partialorder %v6827_v21, 0.7853982 }
 0x605   :  { %v787_v53 = vshrl.u32 %v786_v3, 30 }
 0x607   :  { %v788_v2 = vshll.u32 %v787_v53, 30  ;;  %v811_v23 = vsub.s32 4, %v787_v53 }
 0x609   :  { %v789_v19 = vsub.s32 %v785_v52, %v788_v2  ;;  %v812_v36 = vsel %vm727_vm13, %v811_v23, %v787_v53 }
 0x60a   :  { %v814_v52 = vsel %vm726_vm14, 0, %v812_v36 }
 0x60b   :  { %v791_v24 = vsub.s32 0, %v789_v19  ;;  %v921_v3 = vadd.s32 3, %v814_v52 }
 0x60d   :  { %v4499_v30 = vmin.u32 %v791_v24, %v789_v19  ;;  %v922_v2 = vand.u32 3, %v921_v3 }
 0x60f   :  { %v793_v54 = vclz %v4499_v30  ;;  %vm927_vm15 = vcmp.eq.s32.totalorder %v922_v2, 2  ;;  %vm924_vm3 = vcmp.eq.s32.totalorder %v922_v2, 0  ;;  %vm923_vm11 = vcmp.lt.s32.totalorder %v922_v2, 2 }
 0x611   :  { %v4500_v56 = vadd.s32 4294967294, %v793_v54 }
 0x613   :  { %vm4501_vm12 = vcmp.lt.s32.totalorder %v4500_v56, 0 }
 0x614   :  { %v796_v42 = vsel %vm4501_vm12, 0, %v4500_v56 }
 0x615   :  { %v797_v26 = vsub.s32 32, %v796_v42  ;;  %v801_v39 = vsub.s32 4294967266, %v796_v42  ;;  %v798_v41 = vshll.u32 %v789_v19, %v796_v42  ;;  %v818_v19 = vand.u32 3, %v814_v52 }
 0x617   :  { %v799_v43 = vshrl.u32 %v781_v40, %v797_v26  ;;  %v802_v33 = vadd.s32 127, %v801_v39  ;;  %vm823_vm2 = vcmp.eq.s32.totalorder %v818_v19, 2  ;;  %vm820_vm12 = vcmp.eq.s32.totalorder %v818_v19, 0 }
 0x618   :  { %vm819_vm1 = vcmp.lt.s32.totalorder %v818_v19, 2 }
 0x619   :  { %v800_v22 = vor.u32 %v799_v43, %v798_v41  ;;  %v803_v28 = vshll.u32 %v802_v33, 23 }
 0x61b   :  { %v804_v29 = vor.u32 4788187, %v803_v28  ;;  %v807_v1 = vcvt.s32.f32 %v800_v22  ;;  %v6828_v22 = vmov 2   ;;  %v6829_v28 = vmov 1  }
 0x61d   :  { %v805_v31 = vand.u32 2147483647, %v804_v29  ;;  %v6830_v29 = vmov 3  }
 0x61f   :  { %v808_v37 = vmul.f32 %v807_v1, %v805_v31 }
 0x621   :  { %v809_v38 = vxor.u32 2147483648, %v808_v37 }
 0x623   :  { %v810_v27 = vsel %vm727_vm13, %v809_v38, %v808_v37  ;;  %vm817_vm13 = vweird.f32 %v5355_v35 }
 0x624   :  { %v813_v0 = vsel %vm726_vm14, %v5355_v35, %v810_v27  ;;  %v6831_v35 = vmov 0  }
 0x625   :  { %4780 = vcosq.f32 %v813_v0 }
 0x626   :  { %4782 = vsinq.f32 %v813_v0 }
 0x632   :  { %v4781_v24 = vpop.eup %4780 }
 0x633   :  { %v4783_v30 = vpop.eup %4782  ;;  %v824_v54 = vxor.u32 2147483648, %v4781_v24 }
 0x634   :  { %v821_v56 = vxor.u32 2147483648, %v4783_v30 }
 0x635   :  { %v929_v42 = vsel %vm927_vm15, %v824_v54, %v4783_v30  ;;  %v825_v40 = vsel %vm823_vm2, %v824_v54, %v4783_v30 }
 0x636   :  { %v926_v26 = vsel %vm924_vm3, %v4781_v24, %v821_v56  ;;  %v822_v39 = vsel %vm820_vm12, %v4781_v24, %v821_v56 }
 0x637   :  { %v930_v53 = vsel %vm923_vm11, %v926_v26, %v929_v42  ;;  %v826_v41 = vsel %vm819_vm1, %v822_v39, %v825_v40  ;;  %vm6833_vm1 = vmmov 0   ;;  %vm6835_vm11 = vcmask 23552  }
 0x638   :  { %v931_v43 = vsel %vm817_vm13, nan, %v930_v53  ;;  %v827_v33 = vsel %vm817_vm13, nan, %v826_v41 }
 0x639   :  { %940 = vperm.xlu0 %4720, %v931_v43   ;;  %934 = vperm.xlu1 %4719, %v827_v33  }
 0x63d   :  { %4722 = vset.pattern.permute.xlu0 %v6828_v22  ;;  %4721 = vset.pattern.permute.xlu1 %v6829_v28 }
 0x63e   :  { %958 = vperm.xlu0 %4722, %v827_v33   ;;  %946 = vperm.xlu1 %4721, %v827_v33  }
 0x642   :  { %4725 = vset.pattern.permute.xlu0 %v6830_v29  ;;  %951 = vperm.xlu1 %4721, %v931_v43  }
 0x643   :  { %975 = vperm.xlu0 %4725, %v931_v43  }
 0x646   :  { %4723 = vset.pattern.permute.xlu1 %v6828_v22 }
 0x647   :  { %963 = vperm.xlu1 %4723, %v931_v43   ;;  %4727 = vset.pattern.permute.xlu0 %v6831_v35  ;;  %v6832_v43 = vmov 0.0  }
 0x64b   :  { %4724 = vset.pattern.permute.xlu1 %v6830_v29 }
 0x64c   :  { %970 = vperm.xlu1 %4724, %v827_v33  }
 0x650   :  { %4726 = vset.pattern.permute.xlu1 %v6831_v35 }
 0x6b4   :  { %v935_v31 = vpop.permute.xlu1 %934  ;;  %v941_v1 = vpop.permute.xlu0 %940 }
 0x6b5   :  { %v943_v27 = vmul.f32 %v941_v1, %v5111_v7  ;;  %v937_v0 = vmul.f32 %v935_v31, %v5115_v12 }
 0x6b7   :  { %v944_v30 = vadd.f32 %v943_v27, %v937_v0 }
 0x6b9   :  { %v947_v37 = vpop.permute.xlu1 %946  ;;  %v959_v23 = vpop.permute.xlu0 %958 }
 0x6ba   :  { %v949_v36 = vmul.f32 %v947_v37, %v5113_v11  ;;  %v961_v2 = vmul.f32 %v959_v23, %v5119_v15  ;;  %v6834_v23 = vld [vmem:[#allocation6_spill] sm:$0xff] }
 0x6bd   :  { %v952_v38 = vpop.permute.xlu1 %951 }
 0x6be   :  { %v954_v21 = vmul.f32 %v952_v38, %v5109_v6  ;;  %v976_v24 = vpop.permute.xlu0 %975 }
 0x6bf   :  { %v978_v40 = vmul.f32 %v976_v24, %v5129_v34  ;;  %v4509_v24 = vld [vmem:[%s6748_s0 + $0x10] sm:$0xff] }
 0x6c0   :  { %v955_v19 = vadd.f32 %v954_v21, %v949_v36 }
 0x6c2   :  { %v964_v52 = vpop.permute.xlu1 %963  ;;  %v956_v42 = vmul.f32 %v955_v19, %v944_v30  ;;  %v6838_v19 = vld [vmem:[#allocation5_spill] sm:$0xff] }
 0x6c3   :  { %v966_v3 = vmul.f32 %v964_v52, %v5117_v14 }
 0x6c5   :  { %v967_v54 = vadd.f32 %v966_v3, %v961_v2  ;;  %v6836_v3 = vld [vmem:[#allocation3_spill] sm:$0xff]  ;;  %v6837_v2 = vld [vmem:[#allocation4_spill] sm:$0xff] }
 0x6c7   :  { %v971_v56 = vpop.permute.xlu1 %970  ;;  %v968_v39 = vmul.f32 %v967_v54, %v956_v42 }
 0x6c8   :  { %v973_v26 = vmul.f32 %v971_v56, %v5127_v32 }
 0x6ca   :  { %v979_v53 = vadd.f32 %v978_v40, %v973_v26 }
 0x6cc   :  { %v980_v41 = vmul.f32 %v979_v53, %v968_v39 }
 0x6ce   :  { %1061 = vrot.lane.b32.xlu0 %v980_v41, %s4965_s5  ;;  %1055 = vrot.lane.b32.xlu1 %v980_v41, %s4966_s19 }
 0x6cf   :  { %4506 = vmatmul.mubr.msk.f32.vlgmr.msra.gmra.mxu1 %vm433_vm4, %v980_v41 }
 0x6d0   :  { %1089 = vmatpush1.msra.mxu1 %v5142_v44 }
 0x6d1   :  { %1090 = vmatprep.subr.mxu1 %v6832_v43 }
 0x6d2   :  { %1067 = vrot.lane.b32.xlu0 %v980_v41, %s4967_s24  ;;  %1058 = vrot.lane.b32.xlu1 %v980_v41, %s4968_s25 }
 0x6d3   :  { %1091 = vmatpush1.msra.mxu1 %v5150_v45 }
 0x6d4   :  { %1092 = vmatprep.subr.mxu1 %v6832_v43 }
 0x6d5   :  { %1093 = vmatpush1.msra.mxu1 %v5160_v13 }
 0x6d6   :  { %1073 = vrot.lane.b32.xlu0 %v980_v41, %s4969_s30  ;;  %1064 = vrot.lane.b32.xlu1 %v980_v41, %s4970_s9 }
 0x6d7   :  { %1094 = vmatprep.subr.mxu1 %v6832_v43 }
 0x6d8   :  { %1095 = vmatpush1.msra.mxu1 %v5168_v46 }
 0x6d9   :  { %1096 = vmatprep.subr.mxu1 %v6832_v43 }
 0x6da   :  { %1070 = vrot.lane.b32.xlu1 %v980_v41, %s4971_s14  ;;  %1097 = vmatpush1.msra.mxu1 %v5178_v47 }
 0x6db   :  { %1098 = vmatprep.subr.mxu1 %v6832_v43 }
 0x6dc   :  { %1099 = vmatpush1.msra.mxu1 %v5185_v48 }
 0x6dd   :  { %1100 = vmatprep.subr.mxu1 %v6832_v43 }
 0x6de   :  { %1101 = vmatpush1.msra.mxu1 %v5194_v49 }
 0x6df   :  { %1102 = vmatprep.subr.mxu1 %v6832_v43 }
 0x6e0   :  { %1103 = vmatpush1.msra.mxu1 %v5201_v50 }
 0x6e1   :  { %1104 = vmatprep.subr.mxu1 %v6832_v43 }
 0x6e2   :  { %1105 = vmatpush1.msra.mxu1 %v5208_v51 }
 0x6e3   :  { %1106 = vmatprep.subr.mxu1 %v6832_v43 }
 0x6e4   :  { %1107 = vmatpush1.msra.mxu1 %v5215_v57 }
 0x6e5   :  { %1108 = vmatprep.subr.mxu1 %v6832_v43 }
 0x6e6   :  { %1109 = vmatpush1.msra.mxu1 %v5222_v58 }
 0x6e7   :  { %1110 = vmatprep.subr.mxu1 %v6832_v43 }
 0x6e8   :  { %1111 = vmatpush1.msra.mxu1 %v5229_v59 }
 0x6e9   :  { %1112 = vmatprep.subr.mxu1 %v6832_v43 }
 0x6ea   :  { %1113 = vmatpush1.msra.mxu1 %v5236_v60 }
 0x6eb   :  { %1114 = vmatprep.subr.mxu1 %v6832_v43 }
 0x6ec   :  { %1115 = vmatpush1.msra.mxu1 %v5243_v61 }
 0x6ed   :  { %1116 = vmatprep.subr.mxu1 %v6832_v43 }
 0x6ee   :  { %1117 = vmatpush1.msra.mxu1 %v5250_v62 }
 0x6ef   :  { %1118 = vmatprep.subr.mxu1 %v6832_v43 }
 0x6f0   :  { %1119 = vmatpush1.msra.mxu1 %v5257_v63 }
 0x6f1   :  { %1136 = vmatprep.subr.mxu1 %v6832_v43 }
 0x6f2   :  { %1137 = vmatpush2.msra.mxu1 %v5264_v4 }
 0x6f3   :  { %1138 = vmatprep.subr.mxu1 %v6832_v43 }
 0x6f4   :  { %1139 = vmatpush2.msra.mxu1 %v5271_v5 }
 0x6f5   :  { %1140 = vmatprep.subr.mxu1 %v6832_v43 }
 0x6f6   :  { %1141 = vmatpush2.msra.mxu1 %v5278_v9  ;;  %v5469_v9 = vld [vmem:[%s6747_s1] sm:$0x7] }
 0x6f7   :  { %1142 = vmatprep.subr.mxu1 %v6832_v43 }
 0x6f8   :  { %1143 = vmatpush2.msra.mxu1 %v5285_v10 }
 0x6f9   :  { %1144 = vmatprep.subr.mxu1 %v6832_v43 }
 0x6fa   :  { %1145 = vmatpush2.msra.mxu1 %v5292_v16 }
 0x6fb   :  { %1146 = vmatprep.subr.mxu1 %v6832_v43 }
 0x6fc   :  { %1147 = vmatpush2.msra.mxu1 %v5301_v17 }
 0x6fd   :  { %1148 = vmatprep.subr.mxu1 %v6832_v43 }
 0x6fe   :  { %1149 = vmatpush2.msra.mxu1 %v5308_v18 }
 0x6ff   :  { %1150 = vmatprep.subr.mxu1 %v6832_v43 }
 0x700   :  { %1151 = vmatpush2.msra.mxu1 %v5314_v20 }
 0x701   :  { %4629 = vmatprep.subr.mxu1 %v6832_v43 }
 0x740   :  { %v1056_v44 = vpop.permute.xlu1 %1055  ;;  %v1062_v13 = vpop.permute.xlu0 %1061 }
 0x741   :  { %v1076_v46 = vsel %vm433_vm4, %v980_v41, %v1056_v44 }
 0x744   :  { %v1059_v45 = vpop.permute.xlu1 %1058  ;;  %v1068_v50 = vpop.permute.xlu0 %1067 }
 0x745   :  { %v1077_v48 = vsel %vm530_vm5, %v1076_v46, %v1059_v45 }
 0x746   :  { %v1078_v49 = vsel %vm532_vm6, %v1077_v48, %v1062_v13 }
 0x748   :  { %v1065_v47 = vpop.permute.xlu1 %1064  ;;  %v1074_v61 = vpop.permute.xlu0 %1073 }
 0x749   :  { %v1079_v51 = vsel %vm534_vm7, %v1078_v49, %v1065_v47 }
 0x74a   :  { %v1080_v58 = vsel %vm536_vm8, %v1079_v51, %v1068_v50 }
 0x74c   :  { %v1071_v57 = vpop.permute.xlu1 %1070 }
 0x74d   :  { %v1081_v59 = vsel %vm538_vm9, %v1080_v58, %v1071_v57  ;;  %v6840_v57 = vmov 2131351028  }
 0x74e   :  { %v1082_v63 = vsel %vm540_vm10, %v1081_v59, %v1074_v61 }
 0x78f   :  { %v1050_v60 = vpop.f32.mrf.mxu1 }
 0x790   :  { %v1083_v5 = vmul.f32 %v1082_v63, %v1050_v60  ;;  %v6841_v60 = vmov 2102212464   ;;  %v6842_v63 = vmov 920167782  }
 0x791   :  { %v1052_v62 = vpop.f32.mrf.mxu1 }
 0x792   :  { %v1084_v4 = vmul.f32 %v1078_v49, %v1052_v62  ;;  %v6839_v49 = vmov 2475754826  }
 0x794   :  { %4507 = vmatprep.mubr.msk.f32.mxu1 %vm534_vm7, %v1084_v4 }
 0x795   :  { %1153 = vmatmul.mubr.f32.vlgmr.msra.gmra.mxu1 %v1083_v5 }
 0x796   :  { %4630 = vmatpush3.msk.msra.mxu1 %vm6786_vm0, %v5469_v9  ;;  %4631 = vmatprep.mubr.msk.f32.mxu1 %vm6833_vm1, %v6832_v43 }
 0x797   :  { %2082 = vmatprep.subr.mxu1 %v5079_v8 }
 0x855   :  { %v1154_v10 = vpop.f32.mrf.mxu1 }
 0x856   :  { %v1155_v16 = vadd.f32 %v5336_v25, %v1154_v10  ;;  %v6843_v10 = vmov 1326507024  }
 0x857   :  { %v1156_v17 = vpop.f32.mrf.mxu1 }
 0x858   :  { %4784 = vtanh.f32 %v1155_v16  ;;  %v4508_v20 = vmul.f32 -1.442695, %v1155_v16 }
 0x85a   :  { %4786 = vpow2.f32 %v4508_v20 }
 0x865   :  { %v4785_v18 = vpop.eup %4784 }
 0x866   :  { %1167 = vrot.lane.b32.xlu1 %v4785_v18, %s4972_s22 }
 0x867   :  { %v4787_v33 = vpop.eup %4786 }
 0x868   :  { %v1161_v31 = vadd.f32 1.0, %v4787_v33 }
 0x86a   :  { %4788 = vrcp.f32 %v1161_v31 }
 0x877   :  { %v4789_v1 = vpop.eup %4788 }
 0x878   :  { %v1165_v8 = vmul.f32 %v4789_v1, %v6834_v23 }
 0x8d8   :  { %v1168_v37 = vpop.permute.xlu1 %1167 }
 0x8d9   :  { %v1170_v38 = vmul.f32 %v4789_v1, %v1168_v37 }
 0x8db   :  { %1172 = vrot.lane.b32.xlu0 %v1170_v38, %s4972_s22 }
 0x94d   :  { %v1173_v21 = vpop.permute.xlu0 %1172 }
 0x94e   :  { %v5480_v27 = vadd.f32 %v1173_v21, %v1165_v8 }
 0x950   :  { %4790 = vtanh.f32 %v5480_v27 }
 0x95d   :  { %v4791_v25 = vpop.eup %4790 }
 0x95e   :  { %1178 = vrot.lane.b32.xlu1 %v4791_v25, %s4973_s23 }
 0x9d0   :  { %v1179_v0 = vpop.permute.xlu1 %1178 }
 0x9d1   :  { %v1181_v36 = vmul.f32 %v4789_v1, %v1179_v0 }
 0x9d3   :  { %1185 = vrot.lane.b32.xlu0 %v1181_v36, %s4974_s26 }
 0xa45   :  { %v1186_v52 = vpop.permute.xlu0 %1185 }
 0xa46   :  { %4627 = vmatmul.mubr.msk.f32.vlgmr.msra.gmra.mxu0 %vm6835_vm11, %v1186_v52 }
 0xa47   :  { %1548 = vmatpush1.msra.mxu0 %v6836_v3  ;;  %1583 = vmatprep.mubr.f32.mxu0 %v6832_v43 }
 0xa48   :  { %1549 = vmatprep.subr.mxu0 %v6837_v2 }
 0xa49   :  { %1550 = vmatpush1.msra.mxu0 %v6838_v19 }
 0xa4a   :  { %1623 = vmatprep.subr.mxu0 %v6832_v43 }
 0xb06   :  { %v1255_v30 = vpop.f32.mrf.mxu0 }
 0xb07   :  { %v1256_v54 = vadd.f32 %v4509_v24, %v1255_v30 }
 0xb08   :  { %v4628_v56 = vpop.f32.mrf.mxu0 }
 0xb09   :  { %v5494_v42 = vmul.f32 0.5, %v1256_v54 }
 0xb0b   :  { %v1263_v40 = vand.u32 2139095040, %v5494_v42  ;;  %v1260_v41 = vand.u32 2147483647, %v5494_v42 }
 0xb0d   :  { %v1264_v26 = vshrl.u32 %v1263_v40, 23  ;;  %v1267_v13 = vand.u32 8388607, %v1260_v41 }
 0xb0f   :  { %v4512_v39 = vadd.s32 4294967169, %v1264_v26  ;;  %v1268_v17 = vor.u32 8388608, %v1267_v13 }
 0xb11   :  { %v1270_v53 = vadd.s32 1, %v4512_v39  ;;  %v1308_v52 = vshll.u32 %v1268_v17, 8 }
 0xb13   :  { %vm1271_vm14 = vcmp.gt.s32.totalorder %v1270_v53, 0 }
 0xb14   :  { %v1272_v44 = vsel %vm1271_vm14, %v1270_v53, 0  ;;  %vm1262_vm14 = vcmp.lt.s32.totalorder %v5494_v42, 0 }
 0xb15   :  { %v1274_v45 = vand.u32 31, %v1272_v44  ;;  %v1273_v47 = vshrl.u32 %v1272_v44, 5 }
 0xb17   :  { %v1275_v46 = vsub.s32 32, %v1274_v45  ;;  %v1277_v48 = vshll.u32 %v6826_v55, %v1274_v45  ;;  %v1280_v50 = vshll.u32 %v6839_v49, %v1274_v45  ;;  %v1283_v59 = vshll.u32 %v6840_v57, %v1274_v45 }
 0xb18   :  { %v1286_v62 = vshll.u32 %v6841_v60, %v1274_v45  ;;  %v1289_v5 = vshll.u32 %v6842_v63, %v1274_v45  ;;  %vm1292_vm15 = vcmp.lt.s32.totalorder %v1273_v47, 1  ;;  %vm1295_vm2 = vcmp.lt.s32.totalorder %v1273_v47, 4 }
 0xb19   :  { %v1278_v51 = vshrl.u32 %v6839_v49, %v1275_v46  ;;  %v1281_v58 = vshrl.u32 %v6840_v57, %v1275_v46  ;;  %v1284_v61 = vshrl.u32 %v6841_v60, %v1275_v46  ;;  %v1287_v4 = vshrl.u32 %v6842_v63, %v1275_v46 }
 0xb1a   :  { %v1290_v16 = vshrl.u32 %v6843_v10, %v1275_v46  ;;  %v1276_v8 = vshrl.u32 %v6826_v55, %v1275_v46  ;;  %vm1294_vm3 = vcmp.lt.s32.totalorder %v1273_v47, 3  ;;  %vm1293_vm12 = vcmp.lt.s32.totalorder %v1273_v47, 2 }
 0xb1b   :  { %v1279_v18 = vor.u32 %v1278_v51, %v1277_v48  ;;  %v1282_v20 = vor.u32 %v1281_v58, %v1280_v50  ;;  %v1285_v33 = vor.u32 %v1284_v61, %v1283_v59  ;;  %v1288_v31 = vor.u32 %v1287_v4, %v1286_v62 }
 0xb1c   :  { %v1291_v1 = vor.u32 %v1290_v16, %v1289_v5 }
 0xb1d   :  { %v1297_v37 = vsel %vm1295_vm2, %v1285_v33, 2102212464  ;;  %v1300_v38 = vsel %vm1292_vm15, %v1279_v18, %v1282_v20  ;;  %v1304_v23 = vsel %vm1292_vm15, %v1282_v20, %v1285_v33  ;;  %v1301_v21 = vsel %vm1295_vm2, %v1288_v31, 920167782 }
 0xb1e   :  { %v1305_v25 = vsel %vm1295_vm2, %v1291_v1, 1326507024  ;;  %v1302_v0 = vsel %vm1294_vm3, %v1285_v33, %v1301_v21  ;;  %v1296_v3 = vsel %vm1292_vm15, %v1276_v8, %v1279_v18  ;;  %v1298_v2 = vsel %vm1294_vm3, %v1282_v20, %v1297_v37 }
 0xb1f   :  { %v1306_v36 = vsel %vm1294_vm3, %v1288_v31, %v1305_v25  ;;  %v1303_v19 = vsel %vm1293_vm12, %v1300_v38, %v1302_v0  ;;  %v1299_v26 = vsel %vm1293_vm12, %v1296_v3, %v1298_v2  ;;  %vm1261_vm15 = vcmp.le.f32.partialorder %v1260_v41, 0.7853982 }
 0xb20   :  { %v1307_v24 = vsel %vm1293_vm12, %v1304_v23, %v1306_v36  ;;  %v5514_v56 = vmul.u32.u64.low %v1308_v52, %v1303_v19  ;;  %v5515_v40 = vmul.u32.u64.high %v1308_v52, %v1303_v19, %v5514_v56  ;;  %v1315_v53 = vmul.u32 %v1308_v52, %v1299_v26 }
 0xb21   :  { %v5511_v30 = vmul.u32.u64.low %v1308_v52, %v1307_v24  ;;  %v5512_v54 = vmul.u32.u64.high %v1308_v52, %v1307_v24, %v5511_v30 }
 0xb22   :  { %v1318_v39 = vadd.s32 1, %v5515_v40 }
 0xb23   :  { %vm1317_vm13 = vc.u32 %v5512_v54, %v5514_v56  ;;  %v1316_v62 = vadd.s32 %v5514_v56, %v5512_v54 }
 0xb24   :  { %v1319_v44 = vsel %vm1317_vm13, %v1318_v39, %v5515_v40 }
 0xb25   :  { %v1320_v45 = vadd.s32 %v1319_v44, %v1315_v53 }
 0xb27   :  { %v1321_v13 = vadd.s32 536870912, %v1320_v45 }
 0xb29   :  { %v1322_v46 = vshrl.u32 %v1321_v13, 30 }
 0xb2b   :  { %v1323_v47 = vshll.u32 %v1322_v46, 30  ;;  %v1346_v8 = vsub.s32 4, %v1322_v46 }
 0xb2d   :  { %v1324_v48 = vsub.s32 %v1320_v45, %v1323_v47  ;;  %v1347_v0 = vsel %vm1262_vm14, %v1346_v8, %v1322_v46  ;;  %v5552_v8 = vld [vmem:[%s6751_s3 + $0x78] sm:$0xff] }
 0xb2e   :  { %v1349_v36 = vsel %vm1261_vm15, 0, %v1347_v0  ;;  %v5581_v0 = vld [vmem:[%s6751_s3 + $0x60] sm:$0xff] }
 0xb2f   :  { %v1326_v50 = vsub.s32 0, %v1324_v48  ;;  %v1456_v52 = vadd.s32 3, %v1349_v36  ;;  %v1353_v2 = vand.u32 3, %v1349_v36  ;;  %v5590_v36 = vld [vmem:[%s6751_s3 + $0x58] sm:$0xff] }
 0xb31   :  { %v4513_v51 = vmin.u32 %v1326_v50, %v1324_v48  ;;  %v1457_v3 = vand.u32 3, %v1456_v52  ;;  %vm1358_vm3 = vcmp.eq.s32.totalorder %v1353_v2, 2  ;;  %vm1355_vm13 = vcmp.eq.s32.totalorder %v1353_v2, 0  ;;  %v5597_v52 = vld [vmem:[%s6751_s3 + $0x50] sm:$0xff] }
 0xb32   :  { %vm1354_vm0 = vcmp.lt.s32.totalorder %v1353_v2, 2  ;;  %v5611_v2 = vld [vmem:[%s6751_s3 + $0x40] sm:$0xff] }
 0xb33   :  { %v1328_v58 = vclz %v4513_v51  ;;  %vm1462_vm2 = vcmp.eq.s32.totalorder %v1457_v3, 2  ;;  %vm1459_vm12 = vcmp.eq.s32.totalorder %v1457_v3, 0 }
 0xb35   :  { %v4514_v59 = vadd.s32 4294967294, %v1328_v58 }
 0xb37   :  { %vm4515_vm11 = vcmp.lt.s32.totalorder %v4514_v59, 0 }
 0xb38   :  { %v1331_v61 = vsel %vm4515_vm11, 0, %v4514_v59  ;;  %vm1458_vm11 = vcmp.lt.s32.totalorder %v1457_v3, 2  ;;  %v5604_v3 = vld [vmem:[%s6751_s3 + $0x48] sm:$0xff] }
 0xb39   :  { %v1332_v4 = vsub.s32 32, %v1331_v61  ;;  %v1336_v5 = vsub.s32 4294967266, %v1331_v61  ;;  %v1333_v16 = vshll.u32 %v1324_v48, %v1331_v61 }
 0xb3b   :  { %v1334_v17 = vshrl.u32 %v1316_v62, %v1332_v4  ;;  %v1337_v18 = vadd.s32 127, %v1336_v5 }
 0xb3d   :  { %v1335_v20 = vor.u32 %v1334_v17, %v1333_v16  ;;  %v1338_v33 = vshll.u32 %v1337_v18, 23 }
 0xb3f   :  { %v1339_v31 = vor.u32 4788187, %v1338_v33  ;;  %v1342_v37 = vcvt.s32.f32 %v1335_v20 }
 0xb41   :  { %v1340_v1 = vand.u32 2147483647, %v1339_v31 }
 0xb43   :  { %v1343_v38 = vmul.f32 %v1342_v37, %v1340_v1 }
 0xb45   :  { %v1344_v23 = vxor.u32 2147483648, %v1343_v38 }
 0xb47   :  { %v1345_v21 = vsel %vm1262_vm14, %v1344_v23, %v1343_v38  ;;  %vm1352_vm14 = vweird.f32 %v5494_v42 }
 0xb48   :  { %v1348_v25 = vsel %vm1261_vm15, %v5494_v42, %v1345_v21  ;;  %v5563_v21 = vld [vmem:[%s6751_s3 + $0x70] sm:$0xff]  ;;  %vm6851_vm15 = vcmask 23552  }
 0xb49   :  { %4792 = vcosq.f32 %v1348_v25 }
 0xb4a   :  { %4794 = vsinq.f32 %v1348_v25  ;;  %v5570_v25 = vld [vmem:[%s6751_s3 + $0x68] sm:$0xff] }
 0xb56   :  { %v4793_v19 = vpop.eup %4792 }
 0xb57   :  { %v4795_v24 = vpop.eup %4794  ;;  %v1359_v30 = vxor.u32 2147483648, %v4793_v19 }
 0xb58   :  { %v1356_v54 = vxor.u32 2147483648, %v4795_v24 }
 0xb59   :  { %v1464_v56 = vsel %vm1462_vm2, %v1359_v30, %v4795_v24  ;;  %v1360_v41 = vsel %vm1358_vm3, %v1359_v30, %v4795_v24  ;;  %v5625_v24 = vld [vmem:[%s6751_s3 + $0x30] sm:$0xff]  ;;  %v5632_v30 = vld [vmem:[%s6751_s3 + $0x28] sm:$0xff] }
 0xb5a   :  { %v1461_v40 = vsel %vm1459_vm12, %v4793_v19, %v1356_v54  ;;  %v1357_v26 = vsel %vm1355_vm13, %v4793_v19, %v1356_v54  ;;  %v5618_v19 = vld [vmem:[%s6751_s3 + $0x38] sm:$0xff]  ;;  %v5639_v54 = vld [vmem:[%s6751_s3 + $0x20] sm:$0xff] }
 0xb5b   :  { %v1465_v39 = vsel %vm1458_vm11, %v1461_v40, %v1464_v56  ;;  %v1361_v53 = vsel %vm1354_vm0, %v1357_v26, %v1360_v41  ;;  %v5646_v56 = vld [vmem:[%s6751_s3 + $0x18] sm:$0xff]  ;;  %v5653_v41 = vld [vmem:[%s6751_s3 + $0x10] sm:$0xff]  ;;  %v5660_v40 = vld [vmem:[%s6751_s3 + $0x8] sm:$0xff]  ;;  %vm6847_vm0 = vcmask 1042432  }
 0xb5c   :  { %v1466_v44 = vsel %vm1352_vm14, nan, %v1465_v39  ;;  %v1362_v45 = vsel %vm1352_vm14, nan, %v1361_v53  ;;  %v5667_v26 = vld [vmem:[%s6751_s3] sm:$0xff]  ;;  %v5674_v39 = vld [vmem:[%s6751_s3 + $0xb8] sm:$0xff]  ;;  %v5681_v53 = vld [vmem:[%s6751_s3 + $0xb0] sm:$0xff] }
 0xb5d   :  { %1475 = vperm.xlu0 %4727, %v1466_v44   ;;  %1469 = vperm.xlu1 %4726, %v1362_v45  }
 0xb61   :  { %4729 = vset.pattern.permute.xlu0 %v6828_v22  ;;  %4728 = vset.pattern.permute.xlu1 %v6829_v28 }
 0xb62   :  { %1493 = vperm.xlu0 %4729, %v1362_v45   ;;  %1481 = vperm.xlu1 %4728, %v1362_v45  }
 0xb66   :  { %4732 = vset.pattern.permute.xlu0 %v6830_v29  ;;  %1486 = vperm.xlu1 %4728, %v1466_v44  }
 0xb67   :  { %1510 = vperm.xlu0 %4732, %v1466_v44  }
 0xb6a   :  { %4730 = vset.pattern.permute.xlu1 %v6828_v22 }
 0xb6b   :  { %1498 = vperm.xlu1 %4730, %v1466_v44   ;;  %4734 = vset.pattern.permute.xlu0 %v6831_v35  ;;  %v5688_v44 = vld [vmem:[%s6751_s3 + $0xa8] sm:$0xff] }
 0xb6f   :  { %4731 = vset.pattern.permute.xlu1 %v6830_v29 }
 0xb70   :  { %1505 = vperm.xlu1 %4731, %v1362_v45   ;;  %v5695_v45 = vld [vmem:[%s6751_s3 + $0xa0] sm:$0xff] }
 0xb74   :  { %4733 = vset.pattern.permute.xlu1 %v6831_v35 }
 0xbd8   :  { %v1470_v42 = vpop.permute.xlu1 %1469  ;;  %v1476_v13 = vpop.permute.xlu0 %1475 }
 0xbd9   :  { %v1478_v51 = vmul.f32 %v1476_v13, %v5111_v7  ;;  %v1472_v58 = vmul.f32 %v1470_v42, %v5115_v12  ;;  %v5702_v42 = vld [vmem:[%s6751_s3 + $0x98] sm:$0xff]  ;;  %v5709_v13 = vld [vmem:[%s6751_s3 + $0x90] sm:$0xff] }
 0xbda   :  { %6844 = vst [vmem:[#allocation6_spill] sm:$0xff] %v5709_v13 }
 0xbdb   :  { %v1479_v17 = vadd.f32 %v1478_v51, %v1472_v58 }
 0xbdd   :  { %v1482_v46 = vpop.permute.xlu1 %1481  ;;  %v1494_v48 = vpop.permute.xlu0 %1493 }
 0xbde   :  { %v1484_v59 = vmul.f32 %v1482_v46, %v5113_v11  ;;  %v1496_v4 = vmul.f32 %v1494_v48, %v5119_v15  ;;  %v5716_v46 = vld [vmem:[%s6751_s3 + $0x88] sm:$0xff] }
 0xbdf   :  { %6845 = vst [vmem:[#allocation3_spill] sm:$0xff] %v5716_v46 }
 0xbe1   :  { %v1487_v47 = vpop.permute.xlu1 %1486 }
 0xbe2   :  { %v1489_v50 = vmul.f32 %v1487_v47, %v5109_v6  ;;  %v1511_v16 = vpop.permute.xlu0 %1510  ;;  %v5723_v47 = vld [vmem:[%s6751_s3 + $0x80] sm:$0xff] }
 0xbe3   :  { %v1513_v31 = vmul.f32 %v1511_v16, %v5129_v34  ;;  %6846 = vst [vmem:[#allocation4_spill] sm:$0xff] %v5723_v47 }
 0xbe4   :  { %v1490_v5 = vadd.f32 %v1489_v50, %v1484_v59 }
 0xbe6   :  { %v1499_v61 = vpop.permute.xlu1 %1498  ;;  %v1491_v33 = vmul.f32 %v1490_v5, %v1479_v17 }
 0xbe7   :  { %v1501_v62 = vmul.f32 %v1499_v61, %v5117_v14 }
 0xbe9   :  { %v1502_v18 = vadd.f32 %v1501_v62, %v1496_v4 }
 0xbeb   :  { %v1506_v20 = vpop.permute.xlu1 %1505  ;;  %v1503_v37 = vmul.f32 %v1502_v18, %v1491_v33 }
 0xbec   :  { %v1508_v1 = vmul.f32 %v1506_v20, %v5127_v32 }
 0xbee   :  { %v1514_v38 = vadd.f32 %v1513_v31, %v1508_v1 }
 0xbf0   :  { %v5541_v23 = vmul.f32 %v1514_v38, %v1503_v37 }
 0xbf2   :  { %1596 = vrot.lane.b32.xlu0 %v5541_v23, %s4965_s5  ;;  %1590 = vrot.lane.b32.xlu1 %v5541_v23, %s4966_s19 }
 0xbf3   :  { %4520 = vmatmul.mubr.msk.f32.vlgmr.msra.gmra.mxu0 %vm433_vm4, %v5541_v23 }
 0xbf4   :  { %1624 = vmatpush1.msra.mxu0 %v5552_v8 }
 0xbf5   :  { %1625 = vmatprep.subr.mxu0 %v6832_v43 }
 0xbf6   :  { %1602 = vrot.lane.b32.xlu0 %v5541_v23, %s4967_s24  ;;  %1593 = vrot.lane.b32.xlu1 %v5541_v23, %s4968_s25 }
 0xbf7   :  { %1626 = vmatpush1.msra.mxu0 %v5563_v21 }
 0xbf8   :  { %1627 = vmatprep.subr.mxu0 %v6832_v43 }
 0xbf9   :  { %1628 = vmatpush1.msra.mxu0 %v5570_v25 }
 0xbfa   :  { %1608 = vrot.lane.b32.xlu0 %v5541_v23, %s4969_s30  ;;  %1599 = vrot.lane.b32.xlu1 %v5541_v23, %s4970_s9 }
 0xbfb   :  { %1629 = vmatprep.subr.mxu0 %v6832_v43 }
 0xbfc   :  { %1630 = vmatpush1.msra.mxu0 %v5581_v0 }
 0xbfd   :  { %1631 = vmatprep.subr.mxu0 %v6832_v43 }
 0xbfe   :  { %1605 = vrot.lane.b32.xlu1 %v5541_v23, %s4971_s14  ;;  %1632 = vmatpush1.msra.mxu0 %v5590_v36 }
 0xbff   :  { %1633 = vmatprep.subr.mxu0 %v6832_v43 }
 0xc00   :  { %1634 = vmatpush1.msra.mxu0 %v5597_v52 }
 0xc01   :  { %1635 = vmatprep.subr.mxu0 %v6832_v43 }
 0xc02   :  { %1636 = vmatpush1.msra.mxu0 %v5604_v3 }
 0xc03   :  { %1637 = vmatprep.subr.mxu0 %v6832_v43 }
 0xc04   :  { %1638 = vmatpush1.msra.mxu0 %v5611_v2 }
 0xc05   :  { %1639 = vmatprep.subr.mxu0 %v6832_v43 }
 0xc06   :  { %1640 = vmatpush1.msra.mxu0 %v5618_v19 }
 0xc07   :  { %1641 = vmatprep.subr.mxu0 %v6832_v43 }
 0xc08   :  { %1642 = vmatpush1.msra.mxu0 %v5625_v24 }
 0xc09   :  { %1643 = vmatprep.subr.mxu0 %v6832_v43 }
 0xc0a   :  { %1644 = vmatpush1.msra.mxu0 %v5632_v30 }
 0xc0b   :  { %1645 = vmatprep.subr.mxu0 %v6832_v43 }
 0xc0c   :  { %1646 = vmatpush1.msra.mxu0 %v5639_v54 }
 0xc0d   :  { %1647 = vmatprep.subr.mxu0 %v6832_v43 }
 0xc0e   :  { %1648 = vmatpush1.msra.mxu0 %v5646_v56 }
 0xc0f   :  { %1649 = vmatprep.subr.mxu0 %v6832_v43 }
 0xc10   :  { %1650 = vmatpush1.msra.mxu0 %v5653_v41 }
 0xc11   :  { %1651 = vmatprep.subr.mxu0 %v6832_v43 }
 0xc12   :  { %1652 = vmatpush1.msra.mxu0 %v5660_v40 }
 0xc13   :  { %1653 = vmatprep.subr.mxu0 %v6832_v43 }
 0xc14   :  { %1654 = vmatpush1.msra.mxu0 %v5667_v26 }
 0xc15   :  { %1671 = vmatprep.subr.mxu0 %v6832_v43 }
 0xc16   :  { %1672 = vmatpush2.msra.mxu0 %v5674_v39 }
 0xc17   :  { %1673 = vmatprep.subr.mxu0 %v6832_v43 }
 0xc18   :  { %1674 = vmatpush2.msra.mxu0 %v5681_v53 }
 0xc19   :  { %1675 = vmatprep.subr.mxu0 %v6832_v43 }
 0xc1a   :  { %1676 = vmatpush2.msra.mxu0 %v5688_v44 }
 0xc1b   :  { %1677 = vmatprep.subr.mxu0 %v6832_v43 }
 0xc1c   :  { %1678 = vmatpush2.msra.mxu0 %v5695_v45 }
 0xc1d   :  { %1679 = vmatprep.subr.mxu0 %v6832_v43 }
 0xc1e   :  { %1680 = vmatpush2.msra.mxu0 %v5702_v42 }
 0xc1f   :  { %1681 = vmatprep.subr.mxu0 %v6832_v43 }
 0xc20   :  { %1682 = vmatpush2.msra.mxu0 %v5709_v13 }
 0xc21   :  { %1683 = vmatprep.subr.mxu0 %v6832_v43 }
 0xc22   :  { %1684 = vmatpush2.msra.mxu0 %v5716_v46 }
 0xc23   :  { %1685 = vmatprep.subr.mxu0 %v6832_v43 }
 0xc24   :  { %1686 = vmatpush2.msra.mxu0 %v5723_v47 }
 0xc25   :  { %4634 = vmatprep.subr.mxu0 %v6832_v43 }
 0xc64   :  { %v1591_v48 = vpop.permute.xlu1 %1590  ;;  %v1597_v51 = vpop.permute.xlu0 %1596 }
 0xc65   :  { %v1611_v58 = vsel %vm433_vm4, %v5541_v23, %v1591_v48  ;;  %v5743_v23 = vld [vmem:[%s6749_s2 + $0x18] sm:$0xff] }
 0xc66   :  { %6848 = vst [vmem:[#allocation5_spill] sm:$0xff] %v5743_v23 }
 0xc68   :  { %v1594_v50 = vpop.permute.xlu1 %1593  ;;  %v1603_v4 = vpop.permute.xlu0 %1602 }
 0xc69   :  { %v1612_v61 = vsel %vm530_vm5, %v1611_v58, %v1594_v50  ;;  %v5749_v50 = vld [vmem:[%s6752_s4] ss:$0 sm:$0xff] }
 0xc6a   :  { %v1613_v62 = vsel %vm532_vm6, %v1612_v61, %v1597_v51  ;;  %6849 = vst [vmem:[#allocation7_spill] sm:$0xff] %v5749_v50 }
 0xc6c   :  { %v1600_v59 = vpop.permute.xlu1 %1599  ;;  %v1609_v33 = vpop.permute.xlu0 %1608 }
 0xc6d   :  { %v1614_v5 = vsel %vm534_vm7, %v1613_v62, %v1600_v59 }
 0xc6e   :  { %v1615_v17 = vsel %vm536_vm8, %v1614_v5, %v1603_v4 }
 0xc70   :  { %v1606_v16 = vpop.permute.xlu1 %1605 }
 0xc71   :  { %v1616_v18 = vsel %vm538_vm9, %v1615_v17, %v1606_v16 }
 0xc72   :  { %v1617_v1 = vsel %vm540_vm10, %v1616_v18, %v1609_v33 }
 0xcb3   :  { %v1585_v20 = vpop.f32.mrf.mxu0 }
 0xcb4   :  { %v1618_v38 = vmul.f32 %v1617_v1, %v1585_v20 }
 0xcb5   :  { %v1587_v31 = vpop.f32.mrf.mxu0 }
 0xcb6   :  { %v1619_v37 = vmul.f32 %v1613_v62, %v1587_v31 }
 0xcb8   :  { %4521 = vmatprep.mubr.msk.f32.mxu0 %vm534_vm7, %v1619_v37 }
 0xcb9   :  { %1688 = vmatmul.mubr.f32.vlgmr.msra.gmra.mxu0 %v1618_v38  ;;  %v5764_v38 = vld [vmem:[%s6749_s2 + $0x10] sm:$0xff] }
 0xcba   :  { %4635 = vmatpush3.msk.msra.mxu0 %vm6847_vm0, %v5469_v9  ;;  %4636 = vmatprep.mubr.msk.f32.mxu0 %vm6833_vm1, %v6832_v43  ;;  %6852 = vst [vmem:[#allocation9_spill] sm:$0xff] %v5764_v38 }
 0xcbb   :  { %2617 = vmatprep.subr.mxu0 %v5743_v23 }
 0xd79   :  { %v1689_v48 = vpop.f32.mrf.mxu0 }
 0xd7a   :  { %v1690_v51 = vadd.f32 %v5749_v50, %v1689_v48  ;;  %v5777_v48 = vld [vmem:[%s6749_s2] sm:$0xff] }
 0xd7b   :  { %v1691_v58 = vpop.f32.mrf.mxu0  ;;  %6854 = vst [vmem:[#allocation11_spill] sm:$0xff] %v5777_v48 }
 0xd7c   :  { %4796 = vtanh.f32 %v1690_v51  ;;  %v4522_v59 = vmul.f32 -1.442695, %v1690_v51  ;;  %v4523_v51 = vld [vmem:[%s6748_s0 + $0x18] sm:$0xff] }
 0xd7e   :  { %4798 = vpow2.f32 %v4522_v59 }
 0xd89   :  { %v4797_v9 = vpop.eup %4796 }
 0xd8a   :  { %1702 = vrot.lane.b32.xlu1 %v4797_v9, %s4972_s22 }
 0xd8b   :  { %v4799_v61 = vpop.eup %4798 }
 0xd8c   :  { %v1696_v62 = vadd.f32 1.0, %v4799_v61 }
 0xd8e   :  { %4800 = vrcp.f32 %v1696_v62 }
 0xd9b   :  { %v4801_v4 = vpop.eup %4800 }
 0xd9c   :  { %v1700_v17 = vmul.f32 %v4801_v4, %v5480_v27  ;;  %v5771_v27 = vld [vmem:[%s6749_s2 + $0x8] sm:$0xff] }
 0xd9d   :  { %6853 = vst [vmem:[#allocation10_spill] sm:$0xff] %v5771_v27 }
 0xdfc   :  { %v1703_v5 = vpop.permute.xlu1 %1702 }
 0xdfd   :  { %v1705_v16 = vmul.f32 %v4801_v4, %v1703_v5 }
 0xdff   :  { %1707 = vrot.lane.b32.xlu0 %v1705_v16, %s4972_s22 }
 0xe71   :  { %v1708_v18 = vpop.permute.xlu0 %1707 }
 0xe72   :  { %v5755_v20 = vadd.f32 %v1708_v18, %v1700_v17 }
 0xe74   :  { %6850 = vst [vmem:[#allocation8_spill] sm:$0xff] %v5755_v20  ;;  %4802 = vtanh.f32 %v5755_v20 }
 0xe81   :  { %v4803_v33 = vpop.eup %4802 }
 0xe82   :  { %1713 = vrot.lane.b32.xlu1 %v4803_v33, %s4973_s23 }
 0xef4   :  { %v1714_v31 = vpop.permute.xlu1 %1713 }
 0xef5   :  { %v1716_v1 = vmul.f32 %v4801_v4, %v1714_v31 }
 0xef7   :  { %1720 = vrot.lane.b32.xlu0 %v1716_v1, %s4974_s26 }
 0xf69   :  { %v1721_v37 = vpop.permute.xlu0 %1720 }
 0xf6a   :  { %4632 = vmatmul.mubr.msk.f32.vlgmr.msra.gmra.mxu1 %vm6851_vm15, %v1721_v37 }
 0xf6b   :  { %2083 = vmatpush1.msra.mxu1 %v5764_v38  ;;  %2118 = vmatprep.mubr.f32.mxu1 %v6832_v43 }
 0xf6c   :  { %2084 = vmatprep.subr.mxu1 %v5771_v27 }
 0xf6d   :  { %2085 = vmatpush1.msra.mxu1 %v5777_v48 }
 0xf6e   :  { %2158 = vmatprep.subr.mxu1 %v6832_v43 }
0x102a   :  { %v1790_v58 = vpop.f32.mrf.mxu1 }
0x102b   :  { %v1791_v9 = vadd.f32 %v4523_v51, %v1790_v58 }
0x102c   :  { %v4633_v59 = vpop.f32.mrf.mxu1 }
0x102d   :  { %v5784_v61 = vmul.f32 0.5, %v1791_v9 }
0x102f   :  { %v1798_v62 = vand.u32 2139095040, %v5784_v61  ;;  %v6787_v17 = vand.u32 2147483647, %v5784_v61  ;;  %vm1797_vm15 = vcmp.lt.s32.totalorder %v5784_v61, 0 }
0x1031   :  { %v1799_v4 = vshrl.u32 %v1798_v62, 23  ;;  %v1802_v31 = vand.u32 8388607, %v6787_v17 }
0x1033   :  { %v4526_v5 = vadd.s32 4294967169, %v1799_v4  ;;  %v1803_v48 = vor.u32 8388608, %v1802_v31 }
0x1035   :  { %v1805_v16 = vadd.s32 1, %v4526_v5 }
0x1037   :  { %vm1806_vm2 = vcmp.gt.s32.totalorder %v1805_v16, 0 }
0x1038   :  { %v1807_v18 = vsel %vm1806_vm2, %v1805_v16, 0 }
0x1039   :  { %v1809_v33 = vand.u32 31, %v1807_v18  ;;  %v1808_v37 = vshrl.u32 %v1807_v18, 5 }
0x103b   :  { %v1810_v1 = vsub.s32 32, %v1809_v33  ;;  %v1812_v51 = vshll.u32 %v6826_v55, %v1809_v33  ;;  %v1815_v58 = vshll.u32 %v6839_v49, %v1809_v33  ;;  %v1818_v62 = vshll.u32 %v6840_v57, %v1809_v33 }
0x103c   :  { %v1821_v5 = vshll.u32 %v6841_v60, %v1809_v33  ;;  %v1824_v17 = vshll.u32 %v6842_v63, %v1809_v33  ;;  %vm1827_vm3 = vcmp.lt.s32.totalorder %v1808_v37, 1  ;;  %vm1830_vm12 = vcmp.lt.s32.totalorder %v1808_v37, 4 }
0x103d   :  { %v1813_v9 = vshrl.u32 %v6839_v49, %v1810_v1  ;;  %v1816_v59 = vshrl.u32 %v6840_v57, %v1810_v1  ;;  %v1819_v4 = vshrl.u32 %v6841_v60, %v1810_v1  ;;  %v1822_v16 = vshrl.u32 %v6842_v63, %v1810_v1 }
0x103e   :  { %v1825_v18 = vshrl.u32 %v6843_v10, %v1810_v1  ;;  %v1811_v46 = vshrl.u32 %v6826_v55, %v1810_v1  ;;  %vm1829_vm13 = vcmp.lt.s32.totalorder %v1808_v37, 3  ;;  %vm1828_vm11 = vcmp.lt.s32.totalorder %v1808_v37, 2 }
0x103f   :  { %v1814_v27 = vor.u32 %v1813_v9, %v1812_v51  ;;  %v1817_v38 = vor.u32 %v1816_v59, %v1815_v58  ;;  %v1820_v20 = vor.u32 %v1819_v4, %v1818_v62  ;;  %v1823_v50 = vor.u32 %v1822_v16, %v1821_v5 }
0x1040   :  { %v1826_v49 = vor.u32 %v1825_v18, %v1824_v17  ;;  %v1843_v10 = vshll.u32 %v1803_v48, 8 }
0x1041   :  { %v1832_v23 = vsel %vm1830_vm12, %v1820_v20, 2102212464  ;;  %v1835_v57 = vsel %vm1827_vm3, %v1814_v27, %v1817_v38  ;;  %v1839_v47 = vsel %vm1827_vm3, %v1817_v38, %v1820_v20  ;;  %v1836_v60 = vsel %vm1830_vm12, %v1823_v50, 920167782 }
0x1042   :  { %v1840_v13 = vsel %vm1830_vm12, %v1826_v49, 1326507024  ;;  %v1837_v33 = vsel %vm1829_vm13, %v1820_v20, %v1836_v60  ;;  %v1831_v31 = vsel %vm1827_vm3, %v1811_v46, %v1814_v27  ;;  %v1833_v51 = vsel %vm1829_vm13, %v1817_v38, %v1832_v23 }
0x1043   :  { %v1841_v63 = vsel %vm1829_vm13, %v1823_v50, %v1840_v13  ;;  %v1838_v58 = vsel %vm1828_vm11, %v1835_v57, %v1837_v33  ;;  %v1834_v5 = vsel %vm1828_vm11, %v1831_v31, %v1833_v51 }
0x1044   :  { %v1842_v9 = vsel %vm1828_vm11, %v1839_v47, %v1841_v63  ;;  %v5804_v62 = vmul.u32.u64.low %v1843_v10, %v1838_v58  ;;  %v5805_v4 = vmul.u32.u64.high %v1843_v10, %v1838_v58, %v5804_v62  ;;  %v1850_v49 = vmul.u32 %v1843_v10, %v1834_v5 }
0x1045   :  { %v5801_v59 = vmul.u32.u64.low %v1843_v10, %v1842_v9  ;;  %v5802_v17 = vmul.u32.u64.high %v1843_v10, %v1842_v9, %v5801_v59 }
0x1046   :  { %v1853_v1 = vadd.s32 1, %v5805_v4 }
0x1047   :  { %vm1852_vm14 = vc.u32 %v5802_v17, %v5804_v62  ;;  %v1851_v48 = vadd.s32 %v5804_v62, %v5802_v17 }
0x1048   :  { %v1854_v60 = vsel %vm1852_vm14, %v1853_v1, %v5805_v4 }
0x1049   :  { %v1855_v13 = vadd.s32 %v1854_v60, %v1850_v49  ;;  %v6855_v49 = vand.u32 2147483647, %v5784_v61 }
0x104b   :  { %v1856_v50 = vadd.s32 536870912, %v1855_v13  ;;  %vm1796_vm2 = vcmp.le.f32.partialorder %v6855_v49, 0.7853982 }
0x104d   :  { %v1857_v46 = vshrl.u32 %v1856_v50, 30 }
0x104f   :  { %v1858_v23 = vshll.u32 %v1857_v46, 30  ;;  %v1881_v1 = vsub.s32 4, %v1857_v46 }
0x1051   :  { %v1859_v57 = vsub.s32 %v1855_v13, %v1858_v23  ;;  %v1882_v62 = vsel %vm1797_vm15, %v1881_v1, %v1857_v46 }
0x1052   :  { %v1884_v13 = vsel %vm1796_vm2, 0, %v1882_v62 }
0x1053   :  { %v1861_v63 = vsub.s32 0, %v1859_v57  ;;  %v1991_v50 = vadd.s32 3, %v1884_v13 }
0x1055   :  { %v4527_v47 = vmin.u32 %v1861_v63, %v1859_v57  ;;  %v1992_v23 = vand.u32 3, %v1991_v50 }
0x1057   :  { %v1863_v20 = vclz %v4527_v47  ;;  %vm1997_vm3 = vcmp.eq.s32.totalorder %v1992_v23, 2  ;;  %vm1994_vm13 = vcmp.eq.s32.totalorder %v1992_v23, 0  ;;  %vm1993_vm14 = vcmp.lt.s32.totalorder %v1992_v23, 2 }
0x1059   :  { %v4528_v38 = vadd.s32 4294967294, %v1863_v20 }
0x105b   :  { %vm4529_vm0 = vcmp.lt.s32.totalorder %v4528_v38, 0 }
0x105c   :  { %v1866_v27 = vsel %vm4529_vm0, 0, %v4528_v38 }
0x105d   :  { %v1867_v37 = vsub.s32 32, %v1866_v27  ;;  %v1871_v16 = vsub.s32 4294967266, %v1866_v27  ;;  %v1868_v18 = vshll.u32 %v1859_v57, %v1866_v27  ;;  %v1888_v57 = vand.u32 3, %v1884_v13 }
0x105f   :  { %v1869_v33 = vshrl.u32 %v1851_v48, %v1867_v37  ;;  %v1872_v10 = vadd.s32 127, %v1871_v16  ;;  %vm1893_vm12 = vcmp.eq.s32.totalorder %v1888_v57, 2  ;;  %vm1890_vm11 = vcmp.eq.s32.totalorder %v1888_v57, 0 }
0x1060   :  { %vm1889_vm0 = vcmp.lt.s32.totalorder %v1888_v57, 2 }
0x1061   :  { %v1870_v31 = vor.u32 %v1869_v33, %v1868_v18  ;;  %v1873_v51 = vshll.u32 %v1872_v10, 23 }
0x1063   :  { %v1874_v58 = vor.u32 4788187, %v1873_v51  ;;  %v1877_v59 = vcvt.s32.f32 %v1870_v31 }
0x1065   :  { %v1875_v9 = vand.u32 2147483647, %v1874_v58 }
0x1067   :  { %v1878_v4 = vmul.f32 %v1877_v59, %v1875_v9 }
0x1069   :  { %v1879_v5 = vxor.u32 2147483648, %v1878_v4 }
0x106b   :  { %v1880_v60 = vsel %vm1797_vm15, %v1879_v5, %v1878_v4  ;;  %vm1887_vm15 = vweird.f32 %v5784_v61 }
0x106c   :  { %v1883_v17 = vsel %vm1796_vm2, %v5784_v61, %v1880_v60  ;;  %vm6859_vm2 = vcmask 1042432  }
0x106d   :  { %4804 = vcosq.f32 %v1883_v17 }
0x106e   :  { %4806 = vsinq.f32 %v1883_v17 }
0x107a   :  { %v4805_v63 = vpop.eup %4804 }
0x107b   :  { %v4807_v47 = vpop.eup %4806  ;;  %v1894_v20 = vxor.u32 2147483648, %v4805_v63 }
0x107c   :  { %v1891_v38 = vxor.u32 2147483648, %v4807_v47 }
0x107d   :  { %v1999_v27 = vsel %vm1997_vm3, %v1894_v20, %v4807_v47  ;;  %v1895_v48 = vsel %vm1893_vm12, %v1894_v20, %v4807_v47  ;;  %vm6863_vm3 = vcmask 23552  }
0x107e   :  { %v1996_v37 = vsel %vm1994_vm13, %v4805_v63, %v1891_v38  ;;  %v1892_v16 = vsel %vm1890_vm11, %v4805_v63, %v1891_v38 }
0x107f   :  { %v2000_v46 = vsel %vm1993_vm14, %v1996_v37, %v1999_v27  ;;  %v1896_v18 = vsel %vm1889_vm0, %v1892_v16, %v1895_v48  ;;  %v5898_v37 = vld [vmem:[%s6747_s1] sm:$0x7]  ;;  %v6860_v16 = vld [vmem:[#allocation5_spill] sm:$0xff] }
0x1080   :  { %v2001_v33 = vsel %vm1887_vm15, nan, %v2000_v46  ;;  %v1897_v10 = vsel %vm1887_vm15, nan, %v1896_v18  ;;  %v6861_v18 = vld [vmem:[#allocation7_spill] sm:$0xff] }
0x1081   :  { %2010 = vperm.xlu0 %4734, %v2001_v33   ;;  %2004 = vperm.xlu1 %4733, %v1897_v10  }
0x1085   :  { %4736 = vset.pattern.permute.xlu0 %v6828_v22  ;;  %4735 = vset.pattern.permute.xlu1 %v6829_v28 }
0x1086   :  { %2028 = vperm.xlu0 %4736, %v1897_v10   ;;  %2016 = vperm.xlu1 %4735, %v1897_v10  }
0x108a   :  { %4739 = vset.pattern.permute.xlu0 %v6830_v29  ;;  %2021 = vperm.xlu1 %4735, %v2001_v33  }
0x108b   :  { %2045 = vperm.xlu0 %4739, %v2001_v33  }
0x108e   :  { %4737 = vset.pattern.permute.xlu1 %v6828_v22 }
0x108f   :  { %2033 = vperm.xlu1 %4737, %v2001_v33   ;;  %4741 = vset.pattern.permute.xlu0 %v6831_v35 }
0x1093   :  { %4738 = vset.pattern.permute.xlu1 %v6830_v29 }
0x1094   :  { %2040 = vperm.xlu1 %4738, %v1897_v10  }
0x1098   :  { %4740 = vset.pattern.permute.xlu1 %v6831_v35 }
0x10fc   :  { %v2005_v61 = vpop.permute.xlu1 %2004  ;;  %v2011_v31 = vpop.permute.xlu0 %2010 }
0x10fd   :  { %v2013_v4 = vmul.f32 %v2011_v31, %v5111_v7  ;;  %v2007_v5 = vmul.f32 %v2005_v61, %v5115_v12 }
0x10ff   :  { %v2014_v50 = vadd.f32 %v2013_v4, %v2007_v5  ;;  %v6862_v5 = vld [vmem:[#allocation8_spill] sm:$0xff] }
0x1101   :  { %v2017_v51 = vpop.permute.xlu1 %2016  ;;  %v2029_v9 = vpop.permute.xlu0 %2028 }
0x1102   :  { %v2019_v1 = vmul.f32 %v2017_v51, %v5113_v11  ;;  %v2031_v17 = vmul.f32 %v2029_v9, %v5119_v15 }
0x1105   :  { %v2022_v58 = vpop.permute.xlu1 %2021 }
0x1106   :  { %v2024_v59 = vmul.f32 %v2022_v58, %v5109_v6  ;;  %v2046_v13 = vpop.permute.xlu0 %2045 }
0x1107   :  { %v2048_v47 = vmul.f32 %v2046_v13, %v5129_v34 }
0x1108   :  { %v2025_v62 = vadd.f32 %v2024_v59, %v2019_v1 }
0x110a   :  { %v2034_v49 = vpop.permute.xlu1 %2033  ;;  %v2026_v63 = vmul.f32 %v2025_v62, %v2014_v50 }
0x110b   :  { %v2036_v60 = vmul.f32 %v2034_v49, %v5117_v14 }
0x110d   :  { %v2037_v23 = vadd.f32 %v2036_v60, %v2031_v17 }
0x110f   :  { %v2041_v57 = vpop.permute.xlu1 %2040  ;;  %v2038_v38 = vmul.f32 %v2037_v23, %v2026_v63  ;;  %v6864_v23 = vld [vmem:[#allocation9_spill] sm:$0xff]  ;;  %v6866_v63 = vld [vmem:[#allocation11_spill] sm:$0xff] }
0x1110   :  { %v2043_v20 = vmul.f32 %v2041_v57, %v5127_v32  ;;  %v6865_v57 = vld [vmem:[#allocation10_spill] sm:$0xff] }
0x1112   :  { %v2049_v27 = vadd.f32 %v2048_v47, %v2043_v20  ;;  %v4537_v47 = vld [vmem:[%s6748_s0 + $0x20] sm:$0xff] }
0x1114   :  { %v2050_v48 = vmul.f32 %v2049_v27, %v2038_v38 }
0x1116   :  { %2131 = vrot.lane.b32.xlu0 %v2050_v48, %s4965_s5  ;;  %2125 = vrot.lane.b32.xlu1 %v2050_v48, %s4966_s19 }
0x1117   :  { %4534 = vmatmul.mubr.msk.f32.vlgmr.msra.gmra.mxu1 %vm433_vm4, %v2050_v48 }
0x1118   :  { %2159 = vmatpush1.msra.mxu1 %v5552_v8  ;;  %v6856_v8 = vld [vmem:[#allocation6_spill] sm:$0xff] }
0x1119   :  { %2160 = vmatprep.subr.mxu1 %v6832_v43 }
0x111a   :  { %2137 = vrot.lane.b32.xlu0 %v2050_v48, %s4967_s24  ;;  %2128 = vrot.lane.b32.xlu1 %v2050_v48, %s4968_s25 }
0x111b   :  { %2161 = vmatpush1.msra.mxu1 %v5563_v21  ;;  %v6857_v21 = vld [vmem:[#allocation3_spill] sm:$0xff] }
0x111c   :  { %2162 = vmatprep.subr.mxu1 %v6832_v43 }
0x111d   :  { %2163 = vmatpush1.msra.mxu1 %v5570_v25  ;;  %v6858_v25 = vld [vmem:[#allocation4_spill] sm:$0xff] }
0x111e   :  { %2143 = vrot.lane.b32.xlu0 %v2050_v48, %s4969_s30  ;;  %2134 = vrot.lane.b32.xlu1 %v2050_v48, %s4970_s9 }
0x111f   :  { %2164 = vmatprep.subr.mxu1 %v6832_v43 }
0x1120   :  { %2165 = vmatpush1.msra.mxu1 %v5581_v0 }
0x1121   :  { %2166 = vmatprep.subr.mxu1 %v6832_v43 }
0x1122   :  { %2140 = vrot.lane.b32.xlu1 %v2050_v48, %s4971_s14  ;;  %2167 = vmatpush1.msra.mxu1 %v5590_v36 }
0x1123   :  { %2168 = vmatprep.subr.mxu1 %v6832_v43 }
0x1124   :  { %2169 = vmatpush1.msra.mxu1 %v5597_v52 }
0x1125   :  { %2170 = vmatprep.subr.mxu1 %v6832_v43 }
0x1126   :  { %2171 = vmatpush1.msra.mxu1 %v5604_v3 }
0x1127   :  { %2172 = vmatprep.subr.mxu1 %v6832_v43 }
0x1128   :  { %2173 = vmatpush1.msra.mxu1 %v5611_v2 }
0x1129   :  { %2174 = vmatprep.subr.mxu1 %v6832_v43 }
0x112a   :  { %2175 = vmatpush1.msra.mxu1 %v5618_v19 }
0x112b   :  { %2176 = vmatprep.subr.mxu1 %v6832_v43 }
0x112c   :  { %2177 = vmatpush1.msra.mxu1 %v5625_v24 }
0x112d   :  { %2178 = vmatprep.subr.mxu1 %v6832_v43 }
0x112e   :  { %2179 = vmatpush1.msra.mxu1 %v5632_v30 }
0x112f   :  { %2180 = vmatprep.subr.mxu1 %v6832_v43 }
0x1130   :  { %2181 = vmatpush1.msra.mxu1 %v5639_v54 }
0x1131   :  { %2182 = vmatprep.subr.mxu1 %v6832_v43 }
0x1132   :  { %2183 = vmatpush1.msra.mxu1 %v5646_v56 }
0x1133   :  { %2184 = vmatprep.subr.mxu1 %v6832_v43 }
0x1134   :  { %2185 = vmatpush1.msra.mxu1 %v5653_v41 }
0x1135   :  { %2186 = vmatprep.subr.mxu1 %v6832_v43 }
0x1136   :  { %2187 = vmatpush1.msra.mxu1 %v5660_v40 }
0x1137   :  { %2188 = vmatprep.subr.mxu1 %v6832_v43 }
0x1138   :  { %2189 = vmatpush1.msra.mxu1 %v5667_v26 }
0x1139   :  { %2206 = vmatprep.subr.mxu1 %v6832_v43 }
0x113a   :  { %2207 = vmatpush2.msra.mxu1 %v5674_v39 }
0x113b   :  { %2208 = vmatprep.subr.mxu1 %v6832_v43 }
0x113c   :  { %2209 = vmatpush2.msra.mxu1 %v5681_v53 }
0x113d   :  { %2210 = vmatprep.subr.mxu1 %v6832_v43 }
0x113e   :  { %2211 = vmatpush2.msra.mxu1 %v5688_v44 }
0x113f   :  { %2212 = vmatprep.subr.mxu1 %v6832_v43 }
0x1140   :  { %2213 = vmatpush2.msra.mxu1 %v5695_v45 }
0x1141   :  { %2214 = vmatprep.subr.mxu1 %v6832_v43 }
0x1142   :  { %2215 = vmatpush2.msra.mxu1 %v5702_v42 }
0x1143   :  { %2216 = vmatprep.subr.mxu1 %v6832_v43 }
0x1144   :  { %2217 = vmatpush2.msra.mxu1 %v6856_v8 }
0x1145   :  { %2218 = vmatprep.subr.mxu1 %v6832_v43 }
0x1146   :  { %2219 = vmatpush2.msra.mxu1 %v6857_v21 }
0x1147   :  { %2220 = vmatprep.subr.mxu1 %v6832_v43 }
0x1148   :  { %2221 = vmatpush2.msra.mxu1 %v6858_v25 }
0x1149   :  { %4639 = vmatprep.subr.mxu1 %v6832_v43 }
0x1188   :  { %v2126_v0 = vpop.permute.xlu1 %2125  ;;  %v2132_v52 = vpop.permute.xlu0 %2131 }
0x1189   :  { %v2146_v3 = vsel %vm433_vm4, %v2050_v48, %v2126_v0 }
0x118c   :  { %v2129_v36 = vpop.permute.xlu1 %2128  ;;  %v2138_v30 = vpop.permute.xlu0 %2137 }
0x118d   :  { %v2147_v19 = vsel %vm530_vm5, %v2146_v3, %v2129_v36 }
0x118e   :  { %v2148_v24 = vsel %vm532_vm6, %v2147_v19, %v2132_v52 }
0x1190   :  { %v2135_v2 = vpop.permute.xlu1 %2134  ;;  %v2144_v39 = vpop.permute.xlu0 %2143 }
0x1191   :  { %v2149_v54 = vsel %vm534_vm7, %v2148_v24, %v2135_v2 }
0x1192   :  { %v2150_v41 = vsel %vm536_vm8, %v2149_v54, %v2138_v30  ;;  %v6867_v54 = vmov 2475754826  }
0x1194   :  { %v2141_v56 = vpop.permute.xlu1 %2140 }
0x1195   :  { %v2151_v40 = vsel %vm538_vm9, %v2150_v41, %v2141_v56 }
0x1196   :  { %v2152_v44 = vsel %vm540_vm10, %v2151_v40, %v2144_v39  ;;  %v6868_v40 = vmov 2131351028  }
0x11d7   :  { %v2120_v26 = vpop.f32.mrf.mxu1 }
0x11d8   :  { %v2153_v42 = vmul.f32 %v2152_v44, %v2120_v26 }
0x11d9   :  { %v2122_v53 = vpop.f32.mrf.mxu1 }
0x11da   :  { %v2154_v45 = vmul.f32 %v2148_v24, %v2122_v53  ;;  %v6869_v53 = vmov 2102212464  }
0x11dc   :  { %4535 = vmatprep.mubr.msk.f32.mxu1 %vm534_vm7, %v2154_v45 }
0x11dd   :  { %2223 = vmatmul.mubr.f32.vlgmr.msra.gmra.mxu1 %v2153_v42  ;;  %v6870_v42 = vmov 920167782  }
0x11de   :  { %4640 = vmatpush3.msk.msra.mxu1 %vm6859_vm2, %v5898_v37  ;;  %4641 = vmatprep.mubr.msk.f32.mxu1 %vm6833_vm1, %v6832_v43 }
0x11df   :  { %3152 = vmatprep.subr.mxu1 %v6860_v16 }
0x129d   :  { %v2224_v46 = vpop.f32.mrf.mxu1 }
0x129e   :  { %v2225_v33 = vadd.f32 %v6861_v18, %v2224_v46  ;;  %v6871_v18 = vmov 1326507024  }
0x129f   :  { %v2226_v10 = vpop.f32.mrf.mxu1 }
0x12a0   :  { %4808 = vtanh.f32 %v2225_v33  ;;  %v4536_v31 = vmul.f32 -1.442695, %v2225_v33 }
0x12a2   :  { %4810 = vpow2.f32 %v4536_v31 }
0x12ad   :  { %v4809_v61 = vpop.eup %4808 }
0x12ae   :  { %2237 = vrot.lane.b32.xlu1 %v4809_v61, %s4972_s22 }
0x12af   :  { %v4811_v51 = vpop.eup %4810 }
0x12b0   :  { %v2231_v58 = vadd.f32 1.0, %v4811_v51 }
0x12b2   :  { %4812 = vrcp.f32 %v2231_v58 }
0x12bf   :  { %v4813_v9 = vpop.eup %4812 }
0x12c0   :  { %v2235_v1 = vmul.f32 %v4813_v9, %v6862_v5 }
0x1320   :  { %v2238_v59 = vpop.permute.xlu1 %2237 }
0x1321   :  { %v2240_v4 = vmul.f32 %v4813_v9, %v2238_v59 }
0x1323   :  { %2242 = vrot.lane.b32.xlu0 %v2240_v4, %s4972_s22 }
0x1395   :  { %v2243_v49 = vpop.permute.xlu0 %2242 }
0x1396   :  { %v5909_v60 = vadd.f32 %v2243_v49, %v2235_v1 }
0x1398   :  { %4814 = vtanh.f32 %v5909_v60 }
0x13a5   :  { %v4815_v17 = vpop.eup %4814 }
0x13a6   :  { %2248 = vrot.lane.b32.xlu1 %v4815_v17, %s4973_s23 }
0x1418   :  { %v2249_v62 = vpop.permute.xlu1 %2248 }
0x1419   :  { %v2251_v13 = vmul.f32 %v4813_v9, %v2249_v62 }
0x141b   :  { %2255 = vrot.lane.b32.xlu0 %v2251_v13, %s4974_s26 }
0x148d   :  { %v2256_v50 = vpop.permute.xlu0 %2255 }
0x148e   :  { %4637 = vmatmul.mubr.msk.f32.vlgmr.msra.gmra.mxu0 %vm6863_vm3, %v2256_v50 }
0x148f   :  { %2618 = vmatpush1.msra.mxu0 %v6864_v23  ;;  %2653 = vmatprep.mubr.f32.mxu0 %v6832_v43 }
0x1490   :  { %2619 = vmatprep.subr.mxu0 %v6865_v57 }
0x1491   :  { %2620 = vmatpush1.msra.mxu0 %v6866_v63 }
0x1492   :  { %2693 = vmatprep.subr.mxu0 %v6832_v43 }
0x154e   :  { %v2325_v20 = vpop.f32.mrf.mxu0 }
0x154f   :  { %v2326_v38 = vadd.f32 %v4537_v47, %v2325_v20 }
0x1550   :  { %v4638_v27 = vpop.f32.mrf.mxu0 }
0x1551   :  { %v5923_v48 = vmul.f32 0.5, %v2326_v38 }
0x1553   :  { %v2333_v8 = vand.u32 2139095040, %v5923_v48  ;;  %v2330_v36 = vand.u32 2147483647, %v5923_v48  ;;  %vm2332_vm3 = vcmp.lt.s32.totalorder %v5923_v48, 0 }
0x1555   :  { %v2334_v21 = vshrl.u32 %v2333_v8, 23  ;;  %v2337_v2 = vand.u32 8388607, %v2330_v36 }
0x1557   :  { %v4540_v25 = vadd.s32 4294967169, %v2334_v21  ;;  %v2338_v10 = vor.u32 8388608, %v2337_v2 }
0x1559   :  { %v2340_v0 = vadd.s32 1, %v4540_v25  ;;  %v2378_v50 = vshll.u32 %v2338_v10, 8 }
0x155b   :  { %vm2341_vm12 = vcmp.gt.s32.totalorder %v2340_v0, 0 }
0x155c   :  { %v2342_v52 = vsel %vm2341_vm12, %v2340_v0, 0  ;;  %vm2331_vm12 = vcmp.le.f32.partialorder %v2330_v36, 0.7853982 }
0x155d   :  { %v2344_v3 = vand.u32 31, %v2342_v52  ;;  %v2343_v24 = vshrl.u32 %v2342_v52, 5 }
0x155f   :  { %v2345_v19 = vsub.s32 32, %v2344_v3  ;;  %v2347_v30 = vshll.u32 %v6826_v55, %v2344_v3  ;;  %v2350_v56 = vshll.u32 %v6867_v54, %v2344_v3  ;;  %v2353_v39 = vshll.u32 %v6868_v40, %v2344_v3 }
0x1560   :  { %v2356_v45 = vshll.u32 %v6869_v53, %v2344_v3  ;;  %v2359_v46 = vshll.u32 %v6870_v42, %v2344_v3  ;;  %vm2362_vm13 = vcmp.lt.s32.totalorder %v2343_v24, 1  ;;  %vm2365_vm11 = vcmp.lt.s32.totalorder %v2343_v24, 4 }
0x1561   :  { %v2348_v41 = vshrl.u32 %v6867_v54, %v2345_v19  ;;  %v2351_v26 = vshrl.u32 %v6868_v40, %v2345_v19  ;;  %v2354_v44 = vshrl.u32 %v6869_v53, %v2345_v19  ;;  %v2357_v16 = vshrl.u32 %v6870_v42, %v2345_v19 }
0x1562   :  { %v2360_v33 = vshrl.u32 %v6871_v18, %v2345_v19  ;;  %v2346_v1 = vshrl.u32 %v6826_v55, %v2345_v19  ;;  %vm2364_vm14 = vcmp.lt.s32.totalorder %v2343_v24, 3  ;;  %vm2363_vm0 = vcmp.lt.s32.totalorder %v2343_v24, 2 }
0x1563   :  { %v2349_v61 = vor.u32 %v2348_v41, %v2347_v30  ;;  %v2352_v31 = vor.u32 %v2351_v26, %v2350_v56  ;;  %v2355_v51 = vor.u32 %v2354_v44, %v2353_v39  ;;  %v2358_v58 = vor.u32 %v2357_v16, %v2356_v45 }
0x1564   :  { %v2361_v9 = vor.u32 %v2360_v33, %v2359_v46 }
0x1565   :  { %v2367_v59 = vsel %vm2365_vm11, %v2355_v51, 2102212464  ;;  %v2370_v4 = vsel %vm2362_vm13, %v2349_v61, %v2352_v31  ;;  %v2374_v5 = vsel %vm2362_vm13, %v2352_v31, %v2355_v51  ;;  %v2371_v49 = vsel %vm2365_vm11, %v2358_v58, 920167782 }
0x1566   :  { %v2375_v17 = vsel %vm2365_vm11, %v2361_v9, 1326507024  ;;  %v2372_v62 = vsel %vm2364_vm14, %v2355_v51, %v2371_v49  ;;  %v2366_v23 = vsel %vm2362_vm13, %v2346_v1, %v2349_v61  ;;  %v2368_v57 = vsel %vm2364_vm14, %v2352_v31, %v2367_v59 }
0x1567   :  { %v2376_v13 = vsel %vm2364_vm14, %v2358_v58, %v2375_v17  ;;  %v2373_v63 = vsel %vm2363_vm0, %v2370_v4, %v2372_v62  ;;  %v2369_v21 = vsel %vm2363_vm0, %v2366_v23, %v2368_v57 }
0x1568   :  { %v2377_v47 = vsel %vm2363_vm0, %v2374_v5, %v2376_v13  ;;  %v5943_v27 = vmul.u32.u64.low %v2378_v50, %v2373_v63  ;;  %v5944_v8 = vmul.u32.u64.high %v2378_v50, %v2373_v63, %v5943_v27  ;;  %v2385_v0 = vmul.u32 %v2378_v50, %v2369_v21 }
0x1569   :  { %v5940_v20 = vmul.u32.u64.low %v2378_v50, %v2377_v47  ;;  %v5941_v38 = vmul.u32.u64.high %v2378_v50, %v2377_v47, %v5940_v20 }
0x156a   :  { %v2388_v25 = vadd.s32 1, %v5944_v8 }
0x156b   :  { %vm2387_vm15 = vc.u32 %v5941_v38, %v5943_v27  ;;  %v2386_v45 = vadd.s32 %v5943_v27, %v5941_v38 }
0x156c   :  { %v2389_v52 = vsel %vm2387_vm15, %v2388_v25, %v5944_v8 }
0x156d   :  { %v2390_v3 = vadd.s32 %v2389_v52, %v2385_v0 }
0x156f   :  { %v2391_v2 = vadd.s32 536870912, %v2390_v3 }
0x1571   :  { %v2392_v19 = vshrl.u32 %v2391_v2, 30 }
0x1573   :  { %v2393_v24 = vshll.u32 %v2392_v19, 30  ;;  %v2416_v1 = vsub.s32 4, %v2392_v19 }
0x1575   :  { %v2394_v30 = vsub.s32 %v2390_v3, %v2393_v24  ;;  %v2417_v62 = vsel %vm2332_vm3, %v2416_v1, %v2392_v19  ;;  %v5981_v1 = vld [vmem:[%s6751_s3 + $0x78] sm:$0xff] }
0x1576   :  { %v2419_v13 = vsel %vm2331_vm12, 0, %v2417_v62  ;;  %v6010_v62 = vld [vmem:[%s6751_s3 + $0x60] sm:$0xff] }
0x1577   :  { %v2396_v56 = vsub.s32 0, %v2394_v30  ;;  %v2526_v50 = vadd.s32 3, %v2419_v13  ;;  %v2423_v57 = vand.u32 3, %v2419_v13  ;;  %v6019_v13 = vld [vmem:[%s6751_s3 + $0x58] sm:$0xff] }
0x1579   :  { %v4541_v41 = vmin.u32 %v2396_v56, %v2394_v30  ;;  %v2527_v23 = vand.u32 3, %v2526_v50  ;;  %vm2428_vm11 = vcmp.eq.s32.totalorder %v2423_v57, 2  ;;  %vm2425_vm0 = vcmp.eq.s32.totalorder %v2423_v57, 0  ;;  %v6026_v50 = vld [vmem:[%s6751_s3 + $0x50] sm:$0xff] }
0x157b   :  { %v2398_v26 = vclz %v4541_v41  ;;  %vm2532_vm13 = vcmp.eq.s32.totalorder %v2527_v23, 2  ;;  %vm2529_vm14 = vcmp.eq.s32.totalorder %v2527_v23, 0  ;;  %vm2528_vm15 = vcmp.lt.s32.totalorder %v2527_v23, 2  ;;  %v6033_v23 = vld [vmem:[%s6751_s3 + $0x48] sm:$0xff] }
0x157d   :  { %v4542_v39 = vadd.s32 4294967294, %v2398_v26 }
0x157f   :  { %vm4543_vm2 = vcmp.lt.s32.totalorder %v4542_v39, 0 }
0x1580   :  { %v2401_v44 = vsel %vm4543_vm2, 0, %v4542_v39  ;;  %vm2424_vm2 = vcmp.lt.s32.totalorder %v2423_v57, 2  ;;  %v6040_v57 = vld [vmem:[%s6751_s3 + $0x40] sm:$0xff] }
0x1581   :  { %v2402_v16 = vsub.s32 32, %v2401_v44  ;;  %v2406_v46 = vsub.s32 4294967266, %v2401_v44  ;;  %v2403_v33 = vshll.u32 %v2394_v30, %v2401_v44 }
0x1583   :  { %v2404_v10 = vshrl.u32 %v2386_v45, %v2402_v16  ;;  %v2407_v61 = vadd.s32 127, %v2406_v46 }
0x1585   :  { %v2405_v31 = vor.u32 %v2404_v10, %v2403_v33  ;;  %v2408_v51 = vshll.u32 %v2407_v61, 23 }
0x1587   :  { %v2409_v58 = vor.u32 4788187, %v2408_v51  ;;  %v2412_v59 = vcvt.s32.f32 %v2405_v31 }
0x1589   :  { %v2410_v9 = vand.u32 2147483647, %v2409_v58 }
0x158b   :  { %v2413_v4 = vmul.f32 %v2412_v59, %v2410_v9 }
0x158d   :  { %v2414_v5 = vxor.u32 2147483648, %v2413_v4 }
0x158f   :  { %v2415_v49 = vsel %vm2332_vm3, %v2414_v5, %v2413_v4  ;;  %vm2422_vm3 = vweird.f32 %v5923_v48 }
0x1590   :  { %v2418_v17 = vsel %vm2331_vm12, %v5923_v48, %v2415_v49  ;;  %v5992_v49 = vld [vmem:[%s6751_s3 + $0x70] sm:$0xff]  ;;  %vm6875_vm12 = vcmask 1042432  }
0x1591   :  { %4816 = vcosq.f32 %v2418_v17 }
0x1592   :  { %4818 = vsinq.f32 %v2418_v17  ;;  %v5999_v17 = vld [vmem:[%s6751_s3 + $0x68] sm:$0xff] }
0x159e   :  { %v4817_v63 = vpop.eup %4816 }
0x159f   :  { %v4819_v47 = vpop.eup %4818  ;;  %v2429_v20 = vxor.u32 2147483648, %v4817_v63 }
0x15a0   :  { %v2426_v38 = vxor.u32 2147483648, %v4819_v47 }
0x15a1   :  { %v2534_v27 = vsel %vm2532_vm13, %v2429_v20, %v4819_v47  ;;  %v2430_v36 = vsel %vm2428_vm11, %v2429_v20, %v4819_v47  ;;  %v6054_v47 = vld [vmem:[%s6751_s3 + $0x30] sm:$0xff]  ;;  %v6061_v20 = vld [vmem:[%s6751_s3 + $0x28] sm:$0xff]  ;;  %vm6879_vm13 = vcmask 23552  }
0x15a2   :  { %v2531_v8 = vsel %vm2529_vm14, %v4817_v63, %v2426_v38  ;;  %v2427_v21 = vsel %vm2425_vm0, %v4817_v63, %v2426_v38  ;;  %v6047_v63 = vld [vmem:[%s6751_s3 + $0x38] sm:$0xff]  ;;  %v6068_v38 = vld [vmem:[%s6751_s3 + $0x20] sm:$0xff] }
0x15a3   :  { %v2535_v25 = vsel %vm2528_vm15, %v2531_v8, %v2534_v27  ;;  %v2431_v0 = vsel %vm2424_vm2, %v2427_v21, %v2430_v36  ;;  %v6075_v27 = vld [vmem:[%s6751_s3 + $0x18] sm:$0xff]  ;;  %v6082_v36 = vld [vmem:[%s6751_s3 + $0x10] sm:$0xff]  ;;  %v6089_v8 = vld [vmem:[%s6751_s3 + $0x8] sm:$0xff] }
0x15a4   :  { %v2536_v52 = vsel %vm2422_vm3, nan, %v2535_v25  ;;  %v2432_v3 = vsel %vm2422_vm3, nan, %v2431_v0  ;;  %v6096_v21 = vld [vmem:[%s6751_s3] sm:$0xff]  ;;  %v6103_v25 = vld [vmem:[%s6751_s3 + $0xb8] sm:$0xff]  ;;  %v6110_v0 = vld [vmem:[%s6751_s3 + $0xb0] sm:$0xff] }
0x15a5   :  { %2545 = vperm.xlu0 %4741, %v2536_v52   ;;  %2539 = vperm.xlu1 %4740, %v2432_v3  }
0x15a9   :  { %4743 = vset.pattern.permute.xlu0 %v6828_v22  ;;  %4742 = vset.pattern.permute.xlu1 %v6829_v28 }
0x15aa   :  { %2563 = vperm.xlu0 %4743, %v2432_v3   ;;  %2551 = vperm.xlu1 %4742, %v2432_v3  }
0x15ae   :  { %4746 = vset.pattern.permute.xlu0 %v6830_v29  ;;  %2556 = vperm.xlu1 %4742, %v2536_v52  }
0x15af   :  { %2580 = vperm.xlu0 %4746, %v2536_v52  }
0x15b2   :  { %4744 = vset.pattern.permute.xlu1 %v6828_v22 }
0x15b3   :  { %2568 = vperm.xlu1 %4744, %v2536_v52   ;;  %4748 = vset.pattern.permute.xlu0 %v6831_v35  ;;  %v6117_v52 = vld [vmem:[%s6751_s3 + $0xa8] sm:$0xff] }
0x15b7   :  { %4745 = vset.pattern.permute.xlu1 %v6830_v29 }
0x15b8   :  { %2575 = vperm.xlu1 %4745, %v2432_v3   ;;  %v6124_v3 = vld [vmem:[%s6751_s3 + $0xa0] sm:$0xff] }
0x15bc   :  { %4747 = vset.pattern.permute.xlu1 %v6831_v35 }
0x1620   :  { %v2540_v48 = vpop.permute.xlu1 %2539  ;;  %v2546_v2 = vpop.permute.xlu0 %2545 }
0x1621   :  { %v2548_v41 = vmul.f32 %v2546_v2, %v5111_v7  ;;  %v2542_v26 = vmul.f32 %v2540_v48, %v5115_v12  ;;  %v6131_v48 = vld [vmem:[%s6751_s3 + $0x98] sm:$0xff]  ;;  %v6138_v2 = vld [vmem:[%s6751_s3 + $0x90] sm:$0xff] }
0x1622   :  { %6872 = vst [vmem:[#allocation6_spill] sm:$0xff] %v6138_v2 }
0x1623   :  { %v2549_v10 = vadd.f32 %v2548_v41, %v2542_v26 }
0x1625   :  { %v2552_v19 = vpop.permute.xlu1 %2551  ;;  %v2564_v30 = vpop.permute.xlu0 %2563 }
0x1626   :  { %v2554_v39 = vmul.f32 %v2552_v19, %v5113_v11  ;;  %v2566_v16 = vmul.f32 %v2564_v30, %v5119_v15  ;;  %v6145_v19 = vld [vmem:[%s6751_s3 + $0x88] sm:$0xff] }
0x1627   :  { %6873 = vst [vmem:[#allocation3_spill] sm:$0xff] %v6145_v19 }
0x1629   :  { %v2557_v24 = vpop.permute.xlu1 %2556 }
0x162a   :  { %v2559_v56 = vmul.f32 %v2557_v24, %v5109_v6  ;;  %v2581_v33 = vpop.permute.xlu0 %2580  ;;  %v6152_v24 = vld [vmem:[%s6751_s3 + $0x80] sm:$0xff] }
0x162b   :  { %v2583_v58 = vmul.f32 %v2581_v33, %v5129_v34  ;;  %6874 = vst [vmem:[#allocation4_spill] sm:$0xff] %v6152_v24 }
0x162c   :  { %v2560_v46 = vadd.f32 %v2559_v56, %v2554_v39 }
0x162e   :  { %v2569_v44 = vpop.permute.xlu1 %2568  ;;  %v2561_v51 = vmul.f32 %v2560_v46, %v2549_v10 }
0x162f   :  { %v2571_v45 = vmul.f32 %v2569_v44, %v5117_v14 }
0x1631   :  { %v2572_v61 = vadd.f32 %v2571_v45, %v2566_v16 }
0x1633   :  { %v2576_v31 = vpop.permute.xlu1 %2575  ;;  %v2573_v59 = vmul.f32 %v2572_v61, %v2561_v51 }
0x1634   :  { %v2578_v9 = vmul.f32 %v2576_v31, %v5127_v32 }
0x1636   :  { %v2584_v4 = vadd.f32 %v2583_v58, %v2578_v9 }
0x1638   :  { %v5970_v5 = vmul.f32 %v2584_v4, %v2573_v59 }
0x163a   :  { %2666 = vrot.lane.b32.xlu0 %v5970_v5, %s4965_s5  ;;  %2660 = vrot.lane.b32.xlu1 %v5970_v5, %s4966_s19 }
0x163b   :  { %4548 = vmatmul.mubr.msk.f32.vlgmr.msra.gmra.mxu0 %vm433_vm4, %v5970_v5 }
0x163c   :  { %2694 = vmatpush1.msra.mxu0 %v5981_v1 }
0x163d   :  { %2695 = vmatprep.subr.mxu0 %v6832_v43 }
0x163e   :  { %2672 = vrot.lane.b32.xlu0 %v5970_v5, %s4967_s24  ;;  %2663 = vrot.lane.b32.xlu1 %v5970_v5, %s4968_s25 }
0x163f   :  { %2696 = vmatpush1.msra.mxu0 %v5992_v49 }
0x1640   :  { %2697 = vmatprep.subr.mxu0 %v6832_v43 }
0x1641   :  { %2698 = vmatpush1.msra.mxu0 %v5999_v17 }
0x1642   :  { %2678 = vrot.lane.b32.xlu0 %v5970_v5, %s4969_s30  ;;  %2669 = vrot.lane.b32.xlu1 %v5970_v5, %s4970_s9 }
0x1643   :  { %2699 = vmatprep.subr.mxu0 %v6832_v43 }
0x1644   :  { %2700 = vmatpush1.msra.mxu0 %v6010_v62 }
0x1645   :  { %2701 = vmatprep.subr.mxu0 %v6832_v43 }
0x1646   :  { %2675 = vrot.lane.b32.xlu1 %v5970_v5, %s4971_s14  ;;  %2702 = vmatpush1.msra.mxu0 %v6019_v13 }
0x1647   :  { %2703 = vmatprep.subr.mxu0 %v6832_v43 }
0x1648   :  { %2704 = vmatpush1.msra.mxu0 %v6026_v50 }
0x1649   :  { %2705 = vmatprep.subr.mxu0 %v6832_v43 }
0x164a   :  { %2706 = vmatpush1.msra.mxu0 %v6033_v23 }
0x164b   :  { %2707 = vmatprep.subr.mxu0 %v6832_v43 }
0x164c   :  { %2708 = vmatpush1.msra.mxu0 %v6040_v57 }
0x164d   :  { %2709 = vmatprep.subr.mxu0 %v6832_v43 }
0x164e   :  { %2710 = vmatpush1.msra.mxu0 %v6047_v63 }
0x164f   :  { %2711 = vmatprep.subr.mxu0 %v6832_v43 }
0x1650   :  { %2712 = vmatpush1.msra.mxu0 %v6054_v47 }
0x1651   :  { %2713 = vmatprep.subr.mxu0 %v6832_v43 }
0x1652   :  { %2714 = vmatpush1.msra.mxu0 %v6061_v20 }
0x1653   :  { %2715 = vmatprep.subr.mxu0 %v6832_v43 }
0x1654   :  { %2716 = vmatpush1.msra.mxu0 %v6068_v38 }
0x1655   :  { %2717 = vmatprep.subr.mxu0 %v6832_v43 }
0x1656   :  { %2718 = vmatpush1.msra.mxu0 %v6075_v27 }
0x1657   :  { %2719 = vmatprep.subr.mxu0 %v6832_v43 }
0x1658   :  { %2720 = vmatpush1.msra.mxu0 %v6082_v36 }
0x1659   :  { %2721 = vmatprep.subr.mxu0 %v6832_v43 }
0x165a   :  { %2722 = vmatpush1.msra.mxu0 %v6089_v8 }
0x165b   :  { %2723 = vmatprep.subr.mxu0 %v6832_v43 }
0x165c   :  { %2724 = vmatpush1.msra.mxu0 %v6096_v21 }
0x165d   :  { %2741 = vmatprep.subr.mxu0 %v6832_v43 }
0x165e   :  { %2742 = vmatpush2.msra.mxu0 %v6103_v25 }
0x165f   :  { %2743 = vmatprep.subr.mxu0 %v6832_v43 }
0x1660   :  { %2744 = vmatpush2.msra.mxu0 %v6110_v0 }
0x1661   :  { %2745 = vmatprep.subr.mxu0 %v6832_v43 }
0x1662   :  { %2746 = vmatpush2.msra.mxu0 %v6117_v52 }
0x1663   :  { %2747 = vmatprep.subr.mxu0 %v6832_v43 }
0x1664   :  { %2748 = vmatpush2.msra.mxu0 %v6124_v3 }
0x1665   :  { %2749 = vmatprep.subr.mxu0 %v6832_v43 }
0x1666   :  { %2750 = vmatpush2.msra.mxu0 %v6131_v48 }
0x1667   :  { %2751 = vmatprep.subr.mxu0 %v6832_v43 }
0x1668   :  { %2752 = vmatpush2.msra.mxu0 %v6138_v2 }
0x1669   :  { %2753 = vmatprep.subr.mxu0 %v6832_v43 }
0x166a   :  { %2754 = vmatpush2.msra.mxu0 %v6145_v19 }
0x166b   :  { %2755 = vmatprep.subr.mxu0 %v6832_v43 }
0x166c   :  { %2756 = vmatpush2.msra.mxu0 %v6152_v24 }
0x166d   :  { %4644 = vmatprep.subr.mxu0 %v6832_v43 }
0x16ac   :  { %v2661_v30 = vpop.permute.xlu1 %2660  ;;  %v2667_v41 = vpop.permute.xlu0 %2666 }
0x16ad   :  { %v2681_v26 = vsel %vm433_vm4, %v5970_v5, %v2661_v30  ;;  %v6172_v5 = vld [vmem:[%s6749_s2 + $0x18] sm:$0xff] }
0x16ae   :  { %6876 = vst [vmem:[#allocation5_spill] sm:$0xff] %v6172_v5 }
0x16b0   :  { %v2664_v56 = vpop.permute.xlu1 %2663  ;;  %v2673_v16 = vpop.permute.xlu0 %2672 }
0x16b1   :  { %v2682_v44 = vsel %vm530_vm5, %v2681_v26, %v2664_v56  ;;  %v6178_v56 = vld [vmem:[%s6752_s4] ss:$0 sm:$0xff] }
0x16b2   :  { %v2683_v45 = vsel %vm532_vm6, %v2682_v44, %v2667_v41  ;;  %6877 = vst [vmem:[#allocation7_spill] sm:$0xff] %v6178_v56 }
0x16b4   :  { %v2670_v39 = vpop.permute.xlu1 %2669  ;;  %v2679_v51 = vpop.permute.xlu0 %2678 }
0x16b5   :  { %v2684_v46 = vsel %vm534_vm7, %v2683_v45, %v2670_v39 }
0x16b6   :  { %v2685_v10 = vsel %vm536_vm8, %v2684_v46, %v2673_v16 }
0x16b8   :  { %v2676_v33 = vpop.permute.xlu1 %2675 }
0x16b9   :  { %v2686_v61 = vsel %vm538_vm9, %v2685_v10, %v2676_v33 }
0x16ba   :  { %v2687_v9 = vsel %vm540_vm10, %v2686_v61, %v2679_v51 }
0x16fb   :  { %v2655_v31 = vpop.f32.mrf.mxu0 }
0x16fc   :  { %v2688_v4 = vmul.f32 %v2687_v9, %v2655_v31 }
0x16fd   :  { %v2657_v58 = vpop.f32.mrf.mxu0 }
0x16fe   :  { %v2689_v59 = vmul.f32 %v2683_v45, %v2657_v58 }
0x1700   :  { %4549 = vmatprep.mubr.msk.f32.mxu0 %vm534_vm7, %v2689_v59 }
0x1701   :  { %2758 = vmatmul.mubr.f32.vlgmr.msra.gmra.mxu0 %v2688_v4  ;;  %v6193_v4 = vld [vmem:[%s6749_s2 + $0x10] sm:$0xff] }
0x1702   :  { %4645 = vmatpush3.msk.msra.mxu0 %vm6875_vm12, %v5898_v37  ;;  %4646 = vmatprep.mubr.msk.f32.mxu0 %vm6833_vm1, %v6832_v43  ;;  %6880 = vst [vmem:[#allocation9_spill] sm:$0xff] %v6193_v4 }
0x1703   :  { %3687 = vmatprep.subr.mxu0 %v6172_v5 }
0x17c1   :  { %v2759_v30 = vpop.f32.mrf.mxu0 }
0x17c2   :  { %v2760_v41 = vadd.f32 %v6178_v56, %v2759_v30  ;;  %v6206_v30 = vld [vmem:[%s6749_s2] sm:$0xff] }
0x17c3   :  { %v2761_v26 = vpop.f32.mrf.mxu0  ;;  %6882 = vst [vmem:[#allocation11_spill] sm:$0xff] %v6206_v30 }
0x17c4   :  { %4820 = vtanh.f32 %v2760_v41  ;;  %v4550_v39 = vmul.f32 -1.442695, %v2760_v41  ;;  %v4551_v41 = vld [vmem:[%s6748_s0 + $0x28] sm:$0xff] }
0x17c6   :  { %4822 = vpow2.f32 %v4550_v39 }
0x17d1   :  { %v4821_v37 = vpop.eup %4820 }
0x17d2   :  { %2772 = vrot.lane.b32.xlu1 %v4821_v37, %s4972_s22 }
0x17d3   :  { %v4823_v44 = vpop.eup %4822 }
0x17d4   :  { %v2766_v45 = vadd.f32 1.0, %v4823_v44 }
0x17d6   :  { %4824 = vrcp.f32 %v2766_v45 }
0x17e3   :  { %v4825_v16 = vpop.eup %4824 }
0x17e4   :  { %v2770_v10 = vmul.f32 %v4825_v16, %v5909_v60  ;;  %v6200_v60 = vld [vmem:[%s6749_s2 + $0x8] sm:$0xff] }
0x17e5   :  { %6881 = vst [vmem:[#allocation10_spill] sm:$0xff] %v6200_v60 }
0x1844   :  { %v2773_v46 = vpop.permute.xlu1 %2772 }
0x1845   :  { %v2775_v33 = vmul.f32 %v4825_v16, %v2773_v46 }
0x1847   :  { %2777 = vrot.lane.b32.xlu0 %v2775_v33, %s4972_s22 }
0x18b9   :  { %v2778_v61 = vpop.permute.xlu0 %2777 }
0x18ba   :  { %v6184_v31 = vadd.f32 %v2778_v61, %v2770_v10 }
0x18bc   :  { %6878 = vst [vmem:[#allocation8_spill] sm:$0xff] %v6184_v31  ;;  %4826 = vtanh.f32 %v6184_v31 }
0x18c9   :  { %v4827_v51 = vpop.eup %4826 }
0x18ca   :  { %2783 = vrot.lane.b32.xlu1 %v4827_v51, %s4973_s23 }
0x193c   :  { %v2784_v58 = vpop.permute.xlu1 %2783 }
0x193d   :  { %v2786_v9 = vmul.f32 %v4825_v16, %v2784_v58 }
0x193f   :  { %2790 = vrot.lane.b32.xlu0 %v2786_v9, %s4974_s26 }
0x19b1   :  { %v2791_v59 = vpop.permute.xlu0 %2790 }
0x19b2   :  { %4642 = vmatmul.mubr.msk.f32.vlgmr.msra.gmra.mxu1 %vm6879_vm13, %v2791_v59 }
0x19b3   :  { %3153 = vmatpush1.msra.mxu1 %v6193_v4  ;;  %3188 = vmatprep.mubr.f32.mxu1 %v6832_v43 }
0x19b4   :  { %3154 = vmatprep.subr.mxu1 %v6200_v60 }
0x19b5   :  { %3155 = vmatpush1.msra.mxu1 %v6206_v30 }
0x19b6   :  { %3228 = vmatprep.subr.mxu1 %v6832_v43 }
0x1a72   :  { %v2860_v26 = vpop.f32.mrf.mxu1 }
0x1a73   :  { %v2861_v37 = vadd.f32 %v4551_v41, %v2860_v26 }
0x1a74   :  { %v4643_v39 = vpop.f32.mrf.mxu1 }
0x1a75   :  { %v6213_v44 = vmul.f32 0.5, %v2861_v37 }
0x1a77   :  { %v2868_v45 = vand.u32 2139095040, %v6213_v44  ;;  %v6802_v10 = vand.u32 2147483647, %v6213_v44  ;;  %vm2867_vm13 = vcmp.lt.s32.totalorder %v6213_v44, 0 }
0x1a79   :  { %v2869_v16 = vshrl.u32 %v2868_v45, 23  ;;  %v2872_v58 = vand.u32 8388607, %v6802_v10 }
0x1a7b   :  { %v4554_v46 = vadd.s32 4294967169, %v2869_v16  ;;  %v2873_v30 = vor.u32 8388608, %v2872_v58 }
0x1a7d   :  { %v2875_v33 = vadd.s32 1, %v4554_v46 }
0x1a7f   :  { %vm2876_vm11 = vcmp.gt.s32.totalorder %v2875_v33, 0 }
0x1a80   :  { %v2877_v61 = vsel %vm2876_vm11, %v2875_v33, 0 }
0x1a81   :  { %v2879_v51 = vand.u32 31, %v2877_v61  ;;  %v2878_v59 = vshrl.u32 %v2877_v61, 5 }
0x1a83   :  { %v2880_v9 = vsub.s32 32, %v2879_v51  ;;  %v2882_v41 = vshll.u32 %v6826_v55, %v2879_v51  ;;  %v2885_v26 = vshll.u32 %v6867_v54, %v2879_v51  ;;  %v2888_v45 = vshll.u32 %v6868_v40, %v2879_v51 }
0x1a84   :  { %v2891_v46 = vshll.u32 %v6869_v53, %v2879_v51  ;;  %v2894_v10 = vshll.u32 %v6870_v42, %v2879_v51  ;;  %vm2897_vm14 = vcmp.lt.s32.totalorder %v2878_v59, 1  ;;  %vm2900_vm0 = vcmp.lt.s32.totalorder %v2878_v59, 4 }
0x1a85   :  { %v2883_v37 = vshrl.u32 %v6867_v54, %v2880_v9  ;;  %v2886_v39 = vshrl.u32 %v6868_v40, %v2880_v9  ;;  %v2889_v16 = vshrl.u32 %v6869_v53, %v2880_v9  ;;  %v2892_v33 = vshrl.u32 %v6870_v42, %v2880_v9 }
0x1a86   :  { %v2895_v61 = vshrl.u32 %v6871_v18, %v2880_v9  ;;  %v2881_v19 = vshrl.u32 %v6826_v55, %v2880_v9  ;;  %vm2899_vm15 = vcmp.lt.s32.totalorder %v2878_v59, 3  ;;  %vm2898_vm2 = vcmp.lt.s32.totalorder %v2878_v59, 2 }
0x1a87   :  { %v2884_v60 = vor.u32 %v2883_v37, %v2882_v41  ;;  %v2887_v4 = vor.u32 %v2886_v39, %v2885_v26  ;;  %v2890_v31 = vor.u32 %v2889_v16, %v2888_v45  ;;  %v2893_v56 = vor.u32 %v2892_v33, %v2891_v46 }
0x1a88   :  { %v2896_v54 = vor.u32 %v2895_v61, %v2894_v10  ;;  %v2913_v18 = vshll.u32 %v2873_v30, 8 }
0x1a89   :  { %v2902_v5 = vsel %vm2900_vm0, %v2890_v31, 2102212464  ;;  %v2905_v40 = vsel %vm2897_vm14, %v2884_v60, %v2887_v4  ;;  %v2909_v24 = vsel %vm2897_vm14, %v2887_v4, %v2890_v31  ;;  %v2906_v53 = vsel %vm2900_vm0, %v2893_v56, 920167782 }
0x1a8a   :  { %v2910_v2 = vsel %vm2900_vm0, %v2896_v54, 1326507024  ;;  %v2907_v51 = vsel %vm2899_vm15, %v2890_v31, %v2906_v53  ;;  %v2901_v58 = vsel %vm2897_vm14, %v2881_v19, %v2884_v60  ;;  %v2903_v41 = vsel %vm2899_vm15, %v2887_v4, %v2902_v5 }
0x1a8b   :  { %v2911_v42 = vsel %vm2899_vm15, %v2893_v56, %v2910_v2  ;;  %v2908_v26 = vsel %vm2898_vm2, %v2905_v40, %v2907_v51  ;;  %v2904_v46 = vsel %vm2898_vm2, %v2901_v58, %v2903_v41 }
0x1a8c   :  { %v2912_v37 = vsel %vm2898_vm2, %v2909_v24, %v2911_v42  ;;  %v6233_v45 = vmul.u32.u64.low %v2913_v18, %v2908_v26  ;;  %v6234_v16 = vmul.u32.u64.high %v2913_v18, %v2908_v26, %v6233_v45  ;;  %v2920_v54 = vmul.u32 %v2913_v18, %v2904_v46 }
0x1a8d   :  { %v6230_v39 = vmul.u32.u64.low %v2913_v18, %v2912_v37  ;;  %v6231_v10 = vmul.u32.u64.high %v2913_v18, %v2912_v37, %v6230_v39 }
0x1a8e   :  { %v2923_v9 = vadd.s32 1, %v6234_v16 }
0x1a8f   :  { %vm2922_vm3 = vc.u32 %v6231_v10, %v6233_v45  ;;  %v2921_v30 = vadd.s32 %v6233_v45, %v6231_v10 }
0x1a90   :  { %v2924_v53 = vsel %vm2922_vm3, %v2923_v9, %v6234_v16 }
0x1a91   :  { %v2925_v2 = vadd.s32 %v2924_v53, %v2920_v54  ;;  %v6883_v54 = vand.u32 2147483647, %v6213_v44 }
0x1a93   :  { %v2926_v56 = vadd.s32 536870912, %v2925_v2  ;;  %vm2866_vm11 = vcmp.le.f32.partialorder %v6883_v54, 0.7853982 }
0x1a95   :  { %v2927_v19 = vshrl.u32 %v2926_v56, 30 }
0x1a97   :  { %v2928_v5 = vshll.u32 %v2927_v19, 30  ;;  %v2951_v9 = vsub.s32 4, %v2927_v19 }
0x1a99   :  { %v2929_v40 = vsub.s32 %v2925_v2, %v2928_v5  ;;  %v2952_v45 = vsel %vm2867_vm13, %v2951_v9, %v2927_v19 }
0x1a9a   :  { %v2954_v2 = vsel %vm2866_vm11, 0, %v2952_v45 }
0x1a9b   :  { %v2931_v42 = vsub.s32 0, %v2929_v40  ;;  %v3061_v56 = vadd.s32 3, %v2954_v2 }
0x1a9d   :  { %v4555_v24 = vmin.u32 %v2931_v42, %v2929_v40  ;;  %v3062_v5 = vand.u32 3, %v3061_v56 }
0x1a9f   :  { %v2933_v31 = vclz %v4555_v24  ;;  %vm3067_vm14 = vcmp.eq.s32.totalorder %v3062_v5, 2  ;;  %vm3064_vm15 = vcmp.eq.s32.totalorder %v3062_v5, 0  ;;  %vm3063_vm3 = vcmp.lt.s32.totalorder %v3062_v5, 2 }
0x1aa1   :  { %v4556_v4 = vadd.s32 4294967294, %v2933_v31 }
0x1aa3   :  { %vm4557_vm12 = vcmp.lt.s32.totalorder %v4556_v4, 0 }
0x1aa4   :  { %v2936_v60 = vsel %vm4557_vm12, 0, %v4556_v4 }
0x1aa5   :  { %v2937_v59 = vsub.s32 32, %v2936_v60  ;;  %v2941_v33 = vsub.s32 4294967266, %v2936_v60  ;;  %v2938_v61 = vshll.u32 %v2929_v40, %v2936_v60  ;;  %v2958_v40 = vand.u32 3, %v2954_v2 }
0x1aa7   :  { %v2939_v51 = vshrl.u32 %v2921_v30, %v2937_v59  ;;  %v2942_v18 = vadd.s32 127, %v2941_v33  ;;  %vm2963_vm0 = vcmp.eq.s32.totalorder %v2958_v40, 2  ;;  %vm2960_vm2 = vcmp.eq.s32.totalorder %v2958_v40, 0 }
0x1aa8   :  { %vm2959_vm12 = vcmp.lt.s32.totalorder %v2958_v40, 2 }
0x1aa9   :  { %v2940_v58 = vor.u32 %v2939_v51, %v2938_v61  ;;  %v2943_v41 = vshll.u32 %v2942_v18, 23 }
0x1aab   :  { %v2944_v26 = vor.u32 4788187, %v2943_v41  ;;  %v2947_v39 = vcvt.s32.f32 %v2940_v58 }
0x1aad   :  { %v2945_v37 = vand.u32 2147483647, %v2944_v26 }
0x1aaf   :  { %v2948_v16 = vmul.f32 %v2947_v39, %v2945_v37 }
0x1ab1   :  { %v2949_v46 = vxor.u32 2147483648, %v2948_v16 }
0x1ab3   :  { %v2950_v53 = vsel %vm2867_vm13, %v2949_v46, %v2948_v16  ;;  %vm2957_vm13 = vweird.f32 %v6213_v44 }
0x1ab4   :  { %v2953_v10 = vsel %vm2866_vm11, %v6213_v44, %v2950_v53  ;;  %vm6887_vm11 = vcmask 1042432  }
0x1ab5   :  { %4828 = vcosq.f32 %v2953_v10 }
0x1ab6   :  { %4830 = vsinq.f32 %v2953_v10 }
0x1ac2   :  { %v4829_v42 = vpop.eup %4828 }
0x1ac3   :  { %v4831_v24 = vpop.eup %4830  ;;  %v2964_v31 = vxor.u32 2147483648, %v4829_v42 }
0x1ac4   :  { %v2961_v4 = vxor.u32 2147483648, %v4831_v24 }
0x1ac5   :  { %v3069_v60 = vsel %vm3067_vm14, %v2964_v31, %v4831_v24  ;;  %v2965_v30 = vsel %vm2963_vm0, %v2964_v31, %v4831_v24  ;;  %vm6891_vm14 = vcmask 23552  }
0x1ac6   :  { %v3066_v59 = vsel %vm3064_vm15, %v4829_v42, %v2961_v4  ;;  %v2962_v33 = vsel %vm2960_vm2, %v4829_v42, %v2961_v4 }
0x1ac7   :  { %v3070_v19 = vsel %vm3063_vm3, %v3066_v59, %v3069_v60  ;;  %v2966_v61 = vsel %vm2959_vm12, %v2962_v33, %v2965_v30  ;;  %v4924_v59 = vld [vmem:[%s6747_s1] sm:$0x7]  ;;  %v6888_v33 = vld [vmem:[#allocation5_spill] sm:$0xff] }
0x1ac8   :  { %v3071_v51 = vsel %vm2957_vm13, nan, %v3070_v19  ;;  %v2967_v18 = vsel %vm2957_vm13, nan, %v2966_v61  ;;  %v6889_v61 = vld [vmem:[#allocation7_spill] sm:$0xff] }
0x1ac9   :  { %3080 = vperm.xlu0 %4748, %v3071_v51   ;;  %3074 = vperm.xlu1 %4747, %v2967_v18  }
0x1acd   :  { %4750 = vset.pattern.permute.xlu0 %v6828_v22  ;;  %4749 = vset.pattern.permute.xlu1 %v6829_v28 }
0x1ace   :  { %3098 = vperm.xlu0 %4750, %v2967_v18   ;;  %3086 = vperm.xlu1 %4749, %v2967_v18  }
0x1ad2   :  { %4753 = vset.pattern.permute.xlu0 %v6830_v29  ;;  %3091 = vperm.xlu1 %4749, %v3071_v51  }
0x1ad3   :  { %3115 = vperm.xlu0 %4753, %v3071_v51  }
0x1ad6   :  { %4751 = vset.pattern.permute.xlu1 %v6828_v22 }
0x1ad7   :  { %3103 = vperm.xlu1 %4751, %v3071_v51   ;;  %4755 = vset.pattern.permute.xlu0 %v6831_v35 }
0x1adb   :  { %4752 = vset.pattern.permute.xlu1 %v6830_v29 }
0x1adc   :  { %3110 = vperm.xlu1 %4752, %v2967_v18  }
0x1ae0   :  { %4754 = vset.pattern.permute.xlu1 %v6831_v35 }
0x1b44   :  { %v3075_v44 = vpop.permute.xlu1 %3074  ;;  %v3081_v58 = vpop.permute.xlu0 %3080 }
0x1b45   :  { %v3083_v16 = vmul.f32 %v3081_v58, %v5111_v7  ;;  %v3077_v46 = vmul.f32 %v3075_v44, %v5115_v12 }
0x1b47   :  { %v3084_v56 = vadd.f32 %v3083_v16, %v3077_v46  ;;  %v6890_v46 = vld [vmem:[#allocation8_spill] sm:$0xff] }
0x1b49   :  { %v3087_v41 = vpop.permute.xlu1 %3086  ;;  %v3099_v37 = vpop.permute.xlu0 %3098 }
0x1b4a   :  { %v3089_v9 = vmul.f32 %v3087_v41, %v5113_v11  ;;  %v3101_v10 = vmul.f32 %v3099_v37, %v5119_v15 }
0x1b4d   :  { %v3092_v26 = vpop.permute.xlu1 %3091 }
0x1b4e   :  { %v3094_v39 = vmul.f32 %v3092_v26, %v5109_v6  ;;  %v3116_v2 = vpop.permute.xlu0 %3115 }
0x1b4f   :  { %v3118_v24 = vmul.f32 %v3116_v2, %v5129_v34 }
0x1b50   :  { %v3095_v45 = vadd.f32 %v3094_v39, %v3089_v9 }
0x1b52   :  { %v3104_v54 = vpop.permute.xlu1 %3103  ;;  %v3096_v42 = vmul.f32 %v3095_v45, %v3084_v56 }
0x1b53   :  { %v3106_v53 = vmul.f32 %v3104_v54, %v5117_v14 }
0x1b55   :  { %v3107_v5 = vadd.f32 %v3106_v53, %v3101_v10 }
0x1b57   :  { %v3111_v40 = vpop.permute.xlu1 %3110  ;;  %v3108_v4 = vmul.f32 %v3107_v5, %v3096_v42  ;;  %v6892_v5 = vld [vmem:[#allocation9_spill] sm:$0xff]  ;;  %v6894_v42 = vld [vmem:[#allocation11_spill] sm:$0xff] }
0x1b58   :  { %v3113_v31 = vmul.f32 %v3111_v40, %v5127_v32  ;;  %v6893_v40 = vld [vmem:[#allocation10_spill] sm:$0xff] }
0x1b5a   :  { %v3119_v60 = vadd.f32 %v3118_v24, %v3113_v31  ;;  %v4565_v24 = vld [vmem:[%s6748_s0 + $0x30] sm:$0xff] }
0x1b5c   :  { %v3120_v30 = vmul.f32 %v3119_v60, %v3108_v4 }
0x1b5e   :  { %3201 = vrot.lane.b32.xlu0 %v3120_v30, %s4965_s5  ;;  %3195 = vrot.lane.b32.xlu1 %v3120_v30, %s4966_s19 }
0x1b5f   :  { %4562 = vmatmul.mubr.msk.f32.vlgmr.msra.gmra.mxu1 %vm433_vm4, %v3120_v30 }
0x1b60   :  { %3229 = vmatpush1.msra.mxu1 %v5981_v1  ;;  %v6884_v1 = vld [vmem:[#allocation6_spill] sm:$0xff] }
0x1b61   :  { %3230 = vmatprep.subr.mxu1 %v6832_v43 }
0x1b62   :  { %3207 = vrot.lane.b32.xlu0 %v3120_v30, %s4967_s24  ;;  %3198 = vrot.lane.b32.xlu1 %v3120_v30, %s4968_s25 }
0x1b63   :  { %3231 = vmatpush1.msra.mxu1 %v5992_v49  ;;  %v6885_v49 = vld [vmem:[#allocation3_spill] sm:$0xff] }
0x1b64   :  { %3232 = vmatprep.subr.mxu1 %v6832_v43 }
0x1b65   :  { %3233 = vmatpush1.msra.mxu1 %v5999_v17  ;;  %v6886_v17 = vld [vmem:[#allocation4_spill] sm:$0xff] }
0x1b66   :  { %3213 = vrot.lane.b32.xlu0 %v3120_v30, %s4969_s30  ;;  %3204 = vrot.lane.b32.xlu1 %v3120_v30, %s4970_s9 }
0x1b67   :  { %3234 = vmatprep.subr.mxu1 %v6832_v43 }
0x1b68   :  { %3235 = vmatpush1.msra.mxu1 %v6010_v62 }
0x1b69   :  { %3236 = vmatprep.subr.mxu1 %v6832_v43 }
0x1b6a   :  { %3210 = vrot.lane.b32.xlu1 %v3120_v30, %s4971_s14  ;;  %3237 = vmatpush1.msra.mxu1 %v6019_v13 }
0x1b6b   :  { %3238 = vmatprep.subr.mxu1 %v6832_v43 }
0x1b6c   :  { %3239 = vmatpush1.msra.mxu1 %v6026_v50 }
0x1b6d   :  { %3240 = vmatprep.subr.mxu1 %v6832_v43 }
0x1b6e   :  { %3241 = vmatpush1.msra.mxu1 %v6033_v23 }
0x1b6f   :  { %3242 = vmatprep.subr.mxu1 %v6832_v43 }
0x1b70   :  { %3243 = vmatpush1.msra.mxu1 %v6040_v57 }
0x1b71   :  { %3244 = vmatprep.subr.mxu1 %v6832_v43 }
0x1b72   :  { %3245 = vmatpush1.msra.mxu1 %v6047_v63 }
0x1b73   :  { %3246 = vmatprep.subr.mxu1 %v6832_v43 }
0x1b74   :  { %3247 = vmatpush1.msra.mxu1 %v6054_v47 }
0x1b75   :  { %3248 = vmatprep.subr.mxu1 %v6832_v43 }
0x1b76   :  { %3249 = vmatpush1.msra.mxu1 %v6061_v20 }
0x1b77   :  { %3250 = vmatprep.subr.mxu1 %v6832_v43 }
0x1b78   :  { %3251 = vmatpush1.msra.mxu1 %v6068_v38 }
0x1b79   :  { %3252 = vmatprep.subr.mxu1 %v6832_v43 }
0x1b7a   :  { %3253 = vmatpush1.msra.mxu1 %v6075_v27 }
0x1b7b   :  { %3254 = vmatprep.subr.mxu1 %v6832_v43 }
0x1b7c   :  { %3255 = vmatpush1.msra.mxu1 %v6082_v36 }
0x1b7d   :  { %3256 = vmatprep.subr.mxu1 %v6832_v43 }
0x1b7e   :  { %3257 = vmatpush1.msra.mxu1 %v6089_v8 }
0x1b7f   :  { %3258 = vmatprep.subr.mxu1 %v6832_v43 }
0x1b80   :  { %3259 = vmatpush1.msra.mxu1 %v6096_v21 }
0x1b81   :  { %3276 = vmatprep.subr.mxu1 %v6832_v43 }
0x1b82   :  { %3277 = vmatpush2.msra.mxu1 %v6103_v25 }
0x1b83   :  { %3278 = vmatprep.subr.mxu1 %v6832_v43 }
0x1b84   :  { %3279 = vmatpush2.msra.mxu1 %v6110_v0 }
0x1b85   :  { %3280 = vmatprep.subr.mxu1 %v6832_v43 }
0x1b86   :  { %3281 = vmatpush2.msra.mxu1 %v6117_v52 }
0x1b87   :  { %3282 = vmatprep.subr.mxu1 %v6832_v43 }
0x1b88   :  { %3283 = vmatpush2.msra.mxu1 %v6124_v3 }
0x1b89   :  { %3284 = vmatprep.subr.mxu1 %v6832_v43 }
0x1b8a   :  { %3285 = vmatpush2.msra.mxu1 %v6131_v48 }
0x1b8b   :  { %3286 = vmatprep.subr.mxu1 %v6832_v43 }
0x1b8c   :  { %3287 = vmatpush2.msra.mxu1 %v6884_v1 }
0x1b8d   :  { %3288 = vmatprep.subr.mxu1 %v6832_v43 }
0x1b8e   :  { %3289 = vmatpush2.msra.mxu1 %v6885_v49 }
0x1b8f   :  { %3290 = vmatprep.subr.mxu1 %v6832_v43 }
0x1b90   :  { %3291 = vmatpush2.msra.mxu1 %v6886_v17 }
0x1b91   :  { %4649 = vmatprep.subr.mxu1 %v6832_v43 }
0x1bd0   :  { %v3196_v62 = vpop.permute.xlu1 %3195  ;;  %v3202_v50 = vpop.permute.xlu0 %3201 }
0x1bd1   :  { %v3216_v23 = vsel %vm433_vm4, %v3120_v30, %v3196_v62 }
0x1bd4   :  { %v3199_v13 = vpop.permute.xlu1 %3198  ;;  %v3208_v20 = vpop.permute.xlu0 %3207 }
0x1bd5   :  { %v3217_v63 = vsel %vm530_vm5, %v3216_v23, %v3199_v13 }
0x1bd6   :  { %v3218_v47 = vsel %vm532_vm6, %v3217_v63, %v3202_v50 }
0x1bd8   :  { %v3205_v57 = vpop.permute.xlu1 %3204  ;;  %v3214_v25 = vpop.permute.xlu0 %3213 }
0x1bd9   :  { %v3219_v38 = vsel %vm534_vm7, %v3218_v47, %v3205_v57 }
0x1bda   :  { %v3220_v36 = vsel %vm536_vm8, %v3219_v38, %v3208_v20  ;;  %v6895_v38 = vmov 2475754826  }
0x1bdc   :  { %v3211_v27 = vpop.permute.xlu1 %3210 }
0x1bdd   :  { %v3221_v8 = vsel %vm538_vm9, %v3220_v36, %v3211_v27 }
0x1bde   :  { %v3222_v52 = vsel %vm540_vm10, %v3221_v8, %v3214_v25  ;;  %v6896_v8 = vmov 2131351028  }
0x1c1f   :  { %v3190_v21 = vpop.f32.mrf.mxu1 }
0x1c20   :  { %v3223_v48 = vmul.f32 %v3222_v52, %v3190_v21 }
0x1c21   :  { %v3192_v0 = vpop.f32.mrf.mxu1 }
0x1c22   :  { %v3224_v3 = vmul.f32 %v3218_v47, %v3192_v0  ;;  %v6897_v0 = vmov 2102212464  }
0x1c24   :  { %4563 = vmatprep.mubr.msk.f32.mxu1 %vm534_vm7, %v3224_v3 }
0x1c25   :  { %3293 = vmatmul.mubr.f32.vlgmr.msra.gmra.mxu1 %v3223_v48  ;;  %v6898_v48 = vmov 920167782  }
0x1c26   :  { %4650 = vmatpush3.msk.msra.mxu1 %vm6887_vm11, %v4924_v59  ;;  %4651 = vmatprep.mubr.msk.f32.mxu1 %vm6833_vm1, %v6832_v43 }
0x1c27   :  { %4222 = vmatprep.subr.mxu1 %v6888_v33 }
0x1ce5   :  { %v3294_v19 = vpop.f32.mrf.mxu1 }
0x1ce6   :  { %v3295_v51 = vadd.f32 %v6889_v61, %v3294_v19  ;;  %v6899_v19 = vmov 1326507024  }
0x1ce7   :  { %v3296_v18 = vpop.f32.mrf.mxu1 }
0x1ce8   :  { %4832 = vtanh.f32 %v3295_v51  ;;  %v4564_v58 = vmul.f32 -1.442695, %v3295_v51 }
0x1cea   :  { %4834 = vpow2.f32 %v4564_v58 }
0x1cf5   :  { %v4833_v44 = vpop.eup %4832 }
0x1cf6   :  { %3307 = vrot.lane.b32.xlu1 %v4833_v44, %s4972_s22 }
0x1cf7   :  { %v4835_v41 = vpop.eup %4834 }
0x1cf8   :  { %v3301_v26 = vadd.f32 1.0, %v4835_v41 }
0x1cfa   :  { %4836 = vrcp.f32 %v3301_v26 }
0x1d07   :  { %v4837_v37 = vpop.eup %4836 }
0x1d08   :  { %v3305_v9 = vmul.f32 %v4837_v37, %v6890_v46 }
0x1d68   :  { %v3308_v39 = vpop.permute.xlu1 %3307 }
0x1d69   :  { %v3310_v16 = vmul.f32 %v4837_v37, %v3308_v39 }
0x1d6b   :  { %3312 = vrot.lane.b32.xlu0 %v3310_v16, %s4972_s22 }
0x1ddd   :  { %v3313_v54 = vpop.permute.xlu0 %3312 }
0x1dde   :  { %v6335_v53 = vadd.f32 %v3313_v54, %v3305_v9 }
0x1de0   :  { %4838 = vtanh.f32 %v6335_v53 }
0x1ded   :  { %v4839_v10 = vpop.eup %4838 }
0x1dee   :  { %3318 = vrot.lane.b32.xlu1 %v4839_v10, %s4973_s23 }
0x1e60   :  { %v3319_v45 = vpop.permute.xlu1 %3318 }
0x1e61   :  { %v3321_v2 = vmul.f32 %v4837_v37, %v3319_v45 }
0x1e63   :  { %3325 = vrot.lane.b32.xlu0 %v3321_v2, %s4974_s26 }
0x1ed5   :  { %v3326_v56 = vpop.permute.xlu0 %3325 }
0x1ed6   :  { %4647 = vmatmul.mubr.msk.f32.vlgmr.msra.gmra.mxu0 %vm6891_vm14, %v3326_v56 }
0x1ed7   :  { %3688 = vmatpush1.msra.mxu0 %v6892_v5  ;;  %3723 = vmatprep.mubr.f32.mxu0 %v6832_v43 }
0x1ed8   :  { %3689 = vmatprep.subr.mxu0 %v6893_v40 }
0x1ed9   :  { %3690 = vmatpush1.msra.mxu0 %v6894_v42 }
0x1eda   :  { %3763 = vmatprep.subr.mxu0 %v6832_v43 }
0x1f96   :  { %v3395_v31 = vpop.f32.mrf.mxu0 }
0x1f97   :  { %v3396_v4 = vadd.f32 %v4565_v24, %v3395_v31 }
0x1f98   :  { %v4648_v60 = vpop.f32.mrf.mxu0 }
0x1f99   :  { %v6349_v30 = vmul.f32 0.5, %v3396_v4 }
0x1f9b   :  { %v3403_v1 = vand.u32 2139095040, %v6349_v30  ;;  %v3400_v13 = vand.u32 2147483647, %v6349_v30  ;;  %vm3402_vm14 = vcmp.lt.s32.totalorder %v6349_v30, 0 }
0x1f9d   :  { %v3404_v49 = vshrl.u32 %v3403_v1, 23  ;;  %v3407_v57 = vand.u32 8388607, %v3400_v13 }
0x1f9f   :  { %v4568_v17 = vadd.s32 4294967169, %v3404_v49  ;;  %v3408_v51 = vor.u32 8388608, %v3407_v57 }
0x1fa1   :  { %v3410_v62 = vadd.s32 1, %v4568_v17  ;;  %v3448_v2 = vshll.u32 %v3408_v51, 8 }
0x1fa3   :  { %vm3411_vm0 = vcmp.gt.s32.totalorder %v3410_v62, 0 }
0x1fa4   :  { %v3412_v50 = vsel %vm3411_vm0, %v3410_v62, 0  ;;  %vm3401_vm0 = vcmp.le.f32.partialorder %v3400_v13, 0.7853982 }
0x1fa5   :  { %v3414_v23 = vand.u32 31, %v3412_v50  ;;  %v3413_v47 = vshrl.u32 %v3412_v50, 5 }
0x1fa7   :  { %v3415_v63 = vsub.s32 32, %v3414_v23  ;;  %v3417_v20 = vshll.u32 %v6826_v55, %v3414_v23  ;;  %v3420_v27 = vshll.u32 %v6895_v38, %v3414_v23  ;;  %v3423_v25 = vshll.u32 %v6896_v8, %v3414_v23 }
0x1fa8   :  { %v3426_v3 = vshll.u32 %v6897_v0, %v3414_v23  ;;  %v3429_v33 = vshll.u32 %v6898_v48, %v3414_v23  ;;  %vm3432_vm15 = vcmp.lt.s32.totalorder %v3413_v47, 1  ;;  %vm3435_vm2 = vcmp.lt.s32.totalorder %v3413_v47, 4 }
0x1fa9   :  { %v3418_v36 = vshrl.u32 %v6895_v38, %v3415_v63  ;;  %v3421_v21 = vshrl.u32 %v6896_v8, %v3415_v63  ;;  %v3424_v52 = vshrl.u32 %v6897_v0, %v3415_v63  ;;  %v3427_v59 = vshrl.u32 %v6898_v48, %v3415_v63 }
0x1faa   :  { %v3430_v61 = vshrl.u32 %v6899_v19, %v3415_v63  ;;  %v3416_v46 = vshrl.u32 %v6826_v55, %v3415_v63  ;;  %vm3434_vm3 = vcmp.lt.s32.totalorder %v3413_v47, 3  ;;  %vm3433_vm12 = vcmp.lt.s32.totalorder %v3413_v47, 2 }
0x1fab   :  { %v3419_v18 = vor.u32 %v3418_v36, %v3417_v20  ;;  %v3422_v44 = vor.u32 %v3421_v21, %v3420_v27  ;;  %v3425_v58 = vor.u32 %v3424_v52, %v3423_v25  ;;  %v3428_v41 = vor.u32 %v3427_v59, %v3426_v3 }
0x1fac   :  { %v3431_v26 = vor.u32 %v3430_v61, %v3429_v33 }
0x1fad   :  { %v3437_v37 = vsel %vm3435_vm2, %v3425_v58, 2102212464  ;;  %v3440_v39 = vsel %vm3432_vm15, %v3419_v18, %v3422_v44  ;;  %v3444_v16 = vsel %vm3432_vm15, %v3422_v44, %v3425_v58  ;;  %v3441_v9 = vsel %vm3435_vm2, %v3428_v41, 920167782 }
0x1fae   :  { %v3445_v54 = vsel %vm3435_vm2, %v3431_v26, 1326507024  ;;  %v3442_v10 = vsel %vm3434_vm3, %v3425_v58, %v3441_v9  ;;  %v3436_v56 = vsel %vm3432_vm15, %v3416_v46, %v3419_v18  ;;  %v3438_v5 = vsel %vm3434_vm3, %v3422_v44, %v3437_v37 }
0x1faf   :  { %v3446_v45 = vsel %vm3434_vm3, %v3428_v41, %v3445_v54  ;;  %v3443_v40 = vsel %vm3433_vm12, %v3440_v39, %v3442_v10  ;;  %v3439_v1 = vsel %vm3433_vm12, %v3436_v56, %v3438_v5 }
0x1fb0   :  { %v3447_v42 = vsel %vm3433_vm12, %v3444_v16, %v3446_v45  ;;  %v6369_v4 = vmul.u32.u64.low %v3448_v2, %v3443_v40  ;;  %v6370_v60 = vmul.u32.u64.high %v3448_v2, %v3443_v40, %v6369_v4  ;;  %v3455_v17 = vmul.u32 %v3448_v2, %v3439_v1 }
0x1fb1   :  { %v6366_v24 = vmul.u32.u64.low %v3448_v2, %v3447_v42  ;;  %v6367_v31 = vmul.u32.u64.high %v3448_v2, %v3447_v42, %v6366_v24 }
0x1fb2   :  { %v3458_v49 = vadd.s32 1, %v6370_v60 }
0x1fb3   :  { %vm3457_vm13 = vc.u32 %v6367_v31, %v6369_v4  ;;  %v3456_v52 = vadd.s32 %v6369_v4, %v6367_v31 }
0x1fb4   :  { %v3459_v62 = vsel %vm3457_vm13, %v3458_v49, %v6370_v60 }
0x1fb5   :  { %v3460_v50 = vadd.s32 %v3459_v62, %v3455_v17 }
0x1fb7   :  { %v3461_v23 = vadd.s32 536870912, %v3460_v50 }
0x1fb9   :  { %v3462_v57 = vshrl.u32 %v3461_v23, 30 }
0x1fbb   :  { %v3463_v63 = vshll.u32 %v3462_v57, 30  ;;  %v3486_v16 = vsub.s32 4, %v3462_v57 }
0x1fbd   :  { %v3464_v47 = vsub.s32 %v3460_v50, %v3463_v63  ;;  %v3487_v54 = vsel %vm3402_vm14, %v3486_v16, %v3462_v57  ;;  %v6425_v16 = vld [vmem:[%s6751_s3 + $0x68] sm:$0xff] }
0x1fbe   :  { %v3489_v10 = vsel %vm3401_vm0, 0, %v3487_v54  ;;  %v6452_v54 = vld [vmem:[%s6751_s3 + $0x50] sm:$0xff] }
0x1fbf   :  { %v3466_v20 = vsub.s32 0, %v3464_v47  ;;  %v3596_v45 = vadd.s32 3, %v3489_v10  ;;  %v3493_v56 = vand.u32 3, %v3489_v10  ;;  %v6459_v10 = vld [vmem:[%s6751_s3 + $0x48] sm:$0xff] }
0x1fc1   :  { %v4569_v27 = vmin.u32 %v3466_v20, %v3464_v47  ;;  %v3597_v2 = vand.u32 3, %v3596_v45  ;;  %vm3498_vm2 = vcmp.eq.s32.totalorder %v3493_v56, 2  ;;  %vm3495_vm12 = vcmp.eq.s32.totalorder %v3493_v56, 0  ;;  %v6466_v45 = vld [vmem:[%s6751_s3 + $0x40] sm:$0xff] }
0x1fc3   :  { %v3468_v36 = vclz %v4569_v27  ;;  %vm3602_vm15 = vcmp.eq.s32.totalorder %v3597_v2, 2  ;;  %vm3599_vm3 = vcmp.eq.s32.totalorder %v3597_v2, 0  ;;  %vm3598_vm13 = vcmp.lt.s32.totalorder %v3597_v2, 2  ;;  %v6473_v2 = vld [vmem:[%s6751_s3 + $0x38] sm:$0xff] }
0x1fc5   :  { %v4570_v21 = vadd.s32 4294967294, %v3468_v36 }
0x1fc7   :  { %vm4571_vm11 = vcmp.lt.s32.totalorder %v4570_v21, 0 }
0x1fc8   :  { %v3471_v25 = vsel %vm4571_vm11, 0, %v4570_v21  ;;  %vm3494_vm11 = vcmp.lt.s32.totalorder %v3493_v56, 2  ;;  %v6480_v56 = vld [vmem:[%s6751_s3 + $0x30] sm:$0xff] }
0x1fc9   :  { %v3472_v3 = vsub.s32 32, %v3471_v25  ;;  %v3476_v59 = vsub.s32 4294967266, %v3471_v25  ;;  %v3473_v33 = vshll.u32 %v3464_v47, %v3471_v25 }
0x1fcb   :  { %v3474_v61 = vshrl.u32 %v3456_v52, %v3472_v3  ;;  %v3477_v51 = vadd.s32 127, %v3476_v59 }
0x1fcd   :  { %v3475_v18 = vor.u32 %v3474_v61, %v3473_v33  ;;  %v3478_v44 = vshll.u32 %v3477_v51, 23 }
0x1fcf   :  { %v3479_v58 = vor.u32 4788187, %v3478_v44  ;;  %v3482_v26 = vcvt.s32.f32 %v3475_v18 }
0x1fd1   :  { %v3480_v41 = vand.u32 2147483647, %v3479_v58 }
0x1fd3   :  { %v3483_v37 = vmul.f32 %v3482_v26, %v3480_v41 }
0x1fd5   :  { %v3484_v39 = vxor.u32 2147483648, %v3483_v37 }
0x1fd7   :  { %v3485_v46 = vsel %vm3402_vm14, %v3484_v39, %v3483_v37  ;;  %vm3492_vm14 = vweird.f32 %v6349_v30  ;;  %v6407_v37 = vld [vmem:[%s6751_s3 + $0x78] sm:$0xff]  ;;  %v6418_v39 = vld [vmem:[%s6751_s3 + $0x70] sm:$0xff] }
0x1fd8   :  { %v3488_v9 = vsel %vm3401_vm0, %v6349_v30, %v3485_v46  ;;  %v6436_v46 = vld [vmem:[%s6751_s3 + $0x60] sm:$0xff] }
0x1fd9   :  { %4840 = vcosq.f32 %v3488_v9 }
0x1fda   :  { %4842 = vsinq.f32 %v3488_v9  ;;  %v6445_v9 = vld [vmem:[%s6751_s3 + $0x58] sm:$0xff] }
0x1fe6   :  { %v4841_v5 = vpop.eup %4840 }
0x1fe7   :  { %v4843_v40 = vpop.eup %4842  ;;  %v3499_v42 = vxor.u32 2147483648, %v4841_v5 }
0x1fe8   :  { %v3496_v24 = vxor.u32 2147483648, %v4843_v40 }
0x1fe9   :  { %v3604_v31 = vsel %vm3602_vm15, %v3499_v42, %v4843_v40  ;;  %v3500_v13 = vsel %vm3498_vm2, %v3499_v42, %v4843_v40  ;;  %v6494_v40 = vld [vmem:[%s6751_s3 + $0x20] sm:$0xff]  ;;  %v6501_v42 = vld [vmem:[%s6751_s3 + $0x18] sm:$0xff] }
0x1fea   :  { %v3601_v4 = vsel %vm3599_vm3, %v4841_v5, %v3496_v24  ;;  %v3497_v60 = vsel %vm3495_vm12, %v4841_v5, %v3496_v24  ;;  %v6487_v5 = vld [vmem:[%s6751_s3 + $0x28] sm:$0xff]  ;;  %v6508_v24 = vld [vmem:[%s6751_s3 + $0x10] sm:$0xff] }
0x1feb   :  { %v3605_v1 = vsel %vm3598_vm13, %v3601_v4, %v3604_v31  ;;  %v3501_v49 = vsel %vm3494_vm11, %v3497_v60, %v3500_v13  ;;  %v6515_v31 = vld [vmem:[%s6751_s3 + $0x8] sm:$0xff]  ;;  %v6522_v13 = vld [vmem:[%s6751_s3] sm:$0xff]  ;;  %v6529_v4 = vld [vmem:[%s6751_s3 + $0xb8] sm:$0xff] }
0x1fec   :  { %v3606_v17 = vsel %vm3492_vm14, nan, %v3605_v1  ;;  %v3502_v62 = vsel %vm3492_vm14, nan, %v3501_v49  ;;  %v6536_v60 = vld [vmem:[%s6751_s3 + $0xb0] sm:$0xff]  ;;  %v6543_v1 = vld [vmem:[%s6751_s3 + $0xa8] sm:$0xff]  ;;  %v6550_v49 = vld [vmem:[%s6751_s3 + $0xa0] sm:$0xff] }
0x1fed   :  { %3615 = vperm.xlu0 %4755, %v3606_v17   ;;  %3609 = vperm.xlu1 %4754, %v3502_v62  }
0x1ff1   :  { %4757 = vset.pattern.permute.xlu0 %v6828_v22  ;;  %4756 = vset.pattern.permute.xlu1 %v6829_v28 }
0x1ff2   :  { %3633 = vperm.xlu0 %4757, %v3502_v62   ;;  %3621 = vperm.xlu1 %4756, %v3502_v62  }
0x1ff6   :  { %4760 = vset.pattern.permute.xlu0 %v6830_v29  ;;  %3626 = vperm.xlu1 %4756, %v3606_v17  }
0x1ff7   :  { %3650 = vperm.xlu0 %4760, %v3606_v17  }
0x1ffa   :  { %4758 = vset.pattern.permute.xlu1 %v6828_v22 }
0x1ffb   :  { %3638 = vperm.xlu1 %4758, %v3606_v17   ;;  %4762 = vset.pattern.permute.xlu0 %v6831_v35  ;;  %v6557_v17 = vld [vmem:[%s6751_s3 + $0x98] sm:$0xff] }
0x1fff   :  { %4759 = vset.pattern.permute.xlu1 %v6830_v29 }
0x2000   :  { %3645 = vperm.xlu1 %4759, %v3502_v62   ;;  %v6564_v62 = vld [vmem:[%s6751_s3 + $0x90] sm:$0xff] }
0x2004   :  { %4761 = vset.pattern.permute.xlu1 %v6831_v35 }
0x2068   :  { %v3610_v30 = vpop.permute.xlu1 %3609  ;;  %v3616_v50 = vpop.permute.xlu0 %3615 }
0x2069   :  { %v3618_v20 = vmul.f32 %v3616_v50, %v5111_v7  ;;  %v3612_v27 = vmul.f32 %v3610_v30, %v5115_v12  ;;  %v6571_v30 = vld [vmem:[%s6751_s3 + $0x88] sm:$0xff]  ;;  %v6578_v50 = vld [vmem:[%s6751_s3 + $0x80] sm:$0xff] }
0x206a   :  { %6900 = vst [vmem:[#allocation6_spill] sm:$0xff] %v6571_v30  ;;  %6901 = vst [vmem:[#allocation3_spill] sm:$0xff] %v6578_v50 }
0x206b   :  { %v3619_v59 = vadd.f32 %v3618_v20, %v3612_v27 }
0x206d   :  { %v3622_v23 = vpop.permute.xlu1 %3621  ;;  %v3634_v63 = vpop.permute.xlu0 %3633 }
0x206e   :  { %v3624_v36 = vmul.f32 %v3622_v23, %v5113_v11  ;;  %v3636_v52 = vmul.f32 %v3634_v63, %v5119_v15 }
0x2071   :  { %v3627_v57 = vpop.permute.xlu1 %3626 }
0x2072   :  { %v3629_v47 = vmul.f32 %v3627_v57, %v5109_v6  ;;  %v3651_v35 = vpop.permute.xlu0 %3650 }
0x2073   :  { %v3653_v18 = vmul.f32 %v3651_v35, %v5129_v34 }
0x2074   :  { %v3630_v3 = vadd.f32 %v3629_v47, %v3624_v36 }
0x2076   :  { %v3639_v21 = vpop.permute.xlu1 %3638  ;;  %v3631_v51 = vmul.f32 %v3630_v3, %v3619_v59 }
0x2077   :  { %v3641_v25 = vmul.f32 %v3639_v21, %v5117_v14 }
0x2079   :  { %v3642_v33 = vadd.f32 %v3641_v25, %v3636_v52 }
0x207b   :  { %v3646_v61 = vpop.permute.xlu1 %3645  ;;  %v3643_v58 = vmul.f32 %v3642_v33, %v3631_v51 }
0x207c   :  { %v3648_v44 = vmul.f32 %v3646_v61, %v5127_v32 }
0x207e   :  { %v3654_v41 = vadd.f32 %v3653_v18, %v3648_v44 }
0x2080   :  { %v6396_v26 = vmul.f32 %v3654_v41, %v3643_v58  ;;  %v6596_v41 = vld [vmem:[%s6752_s4] ss:$0 sm:$0xff] }
0x2081   :  { %6902 = vst [vmem:[#allocation4_spill] sm:$0xff] %v6596_v41 }
0x2082   :  { %3736 = vrot.lane.b32.xlu0 %v6396_v26, %s4965_s5  ;;  %3730 = vrot.lane.b32.xlu1 %v6396_v26, %s4966_s19 }
0x2083   :  { %4576 = vmatmul.mubr.msk.f32.vlgmr.msra.gmra.mxu0 %vm433_vm4, %v6396_v26 }
0x2084   :  { %3764 = vmatpush1.msra.mxu0 %v6407_v37 }
0x2085   :  { %3765 = vmatprep.subr.mxu0 %v6832_v43 }
0x2086   :  { %3742 = vrot.lane.b32.xlu0 %v6396_v26, %s4967_s24  ;;  %3733 = vrot.lane.b32.xlu1 %v6396_v26, %s4968_s25 }
0x2087   :  { %3766 = vmatpush1.msra.mxu0 %v6418_v39 }
0x2088   :  { %3767 = vmatprep.subr.mxu0 %v6832_v43 }
0x2089   :  { %3768 = vmatpush1.msra.mxu0 %v6425_v16 }
0x208a   :  { %3748 = vrot.lane.b32.xlu0 %v6396_v26, %s4969_s30  ;;  %3739 = vrot.lane.b32.xlu1 %v6396_v26, %s4970_s9 }
0x208b   :  { %3769 = vmatprep.subr.mxu0 %v6832_v43 }
0x208c   :  { %3770 = vmatpush1.msra.mxu0 %v6436_v46 }
0x208d   :  { %3771 = vmatprep.subr.mxu0 %v6832_v43 }
0x208e   :  { %3745 = vrot.lane.b32.xlu1 %v6396_v26, %s4971_s14  ;;  %3772 = vmatpush1.msra.mxu0 %v6445_v9 }
0x208f   :  { %3773 = vmatprep.subr.mxu0 %v6832_v43 }
0x2090   :  { %3774 = vmatpush1.msra.mxu0 %v6452_v54 }
0x2091   :  { %3775 = vmatprep.subr.mxu0 %v6832_v43 }
0x2092   :  { %3776 = vmatpush1.msra.mxu0 %v6459_v10 }
0x2093   :  { %3777 = vmatprep.subr.mxu0 %v6832_v43 }
0x2094   :  { %3778 = vmatpush1.msra.mxu0 %v6466_v45 }
0x2095   :  { %3779 = vmatprep.subr.mxu0 %v6832_v43 }
0x2096   :  { %3780 = vmatpush1.msra.mxu0 %v6473_v2 }
0x2097   :  { %3781 = vmatprep.subr.mxu0 %v6832_v43 }
0x2098   :  { %3782 = vmatpush1.msra.mxu0 %v6480_v56 }
0x2099   :  { %3783 = vmatprep.subr.mxu0 %v6832_v43 }
0x209a   :  { %3784 = vmatpush1.msra.mxu0 %v6487_v5 }
0x209b   :  { %3785 = vmatprep.subr.mxu0 %v6832_v43 }
0x209c   :  { %3786 = vmatpush1.msra.mxu0 %v6494_v40 }
0x209d   :  { %3787 = vmatprep.subr.mxu0 %v6832_v43 }
0x209e   :  { %3788 = vmatpush1.msra.mxu0 %v6501_v42 }
0x209f   :  { %3789 = vmatprep.subr.mxu0 %v6832_v43 }
0x20a0   :  { %3790 = vmatpush1.msra.mxu0 %v6508_v24 }
0x20a1   :  { %3791 = vmatprep.subr.mxu0 %v6832_v43 }
0x20a2   :  { %3792 = vmatpush1.msra.mxu0 %v6515_v31 }
0x20a3   :  { %3793 = vmatprep.subr.mxu0 %v6832_v43 }
0x20a4   :  { %3794 = vmatpush1.msra.mxu0 %v6522_v13 }
0x20a5   :  { %3811 = vmatprep.subr.mxu0 %v6832_v43 }
0x20a6   :  { %3812 = vmatpush2.msra.mxu0 %v6529_v4 }
0x20a7   :  { %3813 = vmatprep.subr.mxu0 %v6832_v43 }
0x20a8   :  { %3814 = vmatpush2.msra.mxu0 %v6536_v60 }
0x20a9   :  { %3815 = vmatprep.subr.mxu0 %v6832_v43 }
0x20aa   :  { %3816 = vmatpush2.msra.mxu0 %v6543_v1 }
0x20ab   :  { %3817 = vmatprep.subr.mxu0 %v6832_v43 }
0x20ac   :  { %3818 = vmatpush2.msra.mxu0 %v6550_v49 }
0x20ad   :  { %3819 = vmatprep.subr.mxu0 %v6832_v43 }
0x20ae   :  { %3820 = vmatpush2.msra.mxu0 %v6557_v17 }
0x20af   :  { %3821 = vmatprep.subr.mxu0 %v6832_v43 }
0x20b0   :  { %3822 = vmatpush2.msra.mxu0 %v6564_v62 }
0x20b1   :  { %3823 = vmatprep.subr.mxu0 %v6832_v43 }
0x20b2   :  { %3824 = vmatpush2.msra.mxu0 %v6571_v30 }
0x20b3   :  { %3825 = vmatprep.subr.mxu0 %v6832_v43 }
0x20b4   :  { %3826 = vmatpush2.msra.mxu0 %v6578_v50 }
0x20b5   :  { %4654 = vmatprep.subr.mxu0 %v6832_v43 }
0x20f4   :  { %v3731_v23 = vpop.permute.xlu1 %3730  ;;  %v3737_v63 = vpop.permute.xlu0 %3736 }
0x20f5   :  { %v3751_v47 = vsel %vm433_vm4, %v6396_v26, %v3731_v23 }
0x20f8   :  { %v3734_v57 = vpop.permute.xlu1 %3733  ;;  %v3743_v21 = vpop.permute.xlu0 %3742 }
0x20f9   :  { %v3752_v27 = vsel %vm530_vm5, %v3751_v47, %v3734_v57 }
0x20fa   :  { %v3753_v36 = vsel %vm532_vm6, %v3752_v27, %v3737_v63 }
0x20fc   :  { %v3740_v20 = vpop.permute.xlu1 %3739  ;;  %v3749_v33 = vpop.permute.xlu0 %3748 }
0x20fd   :  { %v3754_v25 = vsel %vm534_vm7, %v3753_v36, %v3740_v20 }
0x20fe   :  { %v3755_v3 = vsel %vm536_vm8, %v3754_v25, %v3743_v21 }
0x2100   :  { %v3746_v52 = vpop.permute.xlu1 %3745 }
0x2101   :  { %v3756_v35 = vsel %vm538_vm9, %v3755_v3, %v3746_v52 }
0x2102   :  { %v3757_v51 = vsel %vm540_vm10, %v3756_v35, %v3749_v33 }
0x2143   :  { %v3725_v59 = vpop.f32.mrf.mxu0 }
0x2144   :  { %v3758_v44 = vmul.f32 %v3757_v51, %v3725_v59  ;;  %v4950_v51 = vld [vmem:[%s6749_s2 + $0x10] sm:$0xff] }
0x2145   :  { %v3727_v61 = vpop.f32.mrf.mxu0 }
0x2146   :  { %v3759_v18 = vmul.f32 %v3753_v36, %v3727_v61 }
0x2148   :  { %4577 = vmatprep.mubr.msk.f32.mxu0 %vm534_vm7, %v3759_v18  ;;  %v4952_v18 = vld [vmem:[%s6749_s2] sm:$0xff] }
0x2149   :  { %3828 = vmatmul.mubr.f32.vlgmr.msra.gmra.mxu0 %v3758_v44  ;;  %v4579_v44 = vld [vmem:[%s6748_s0 + $0x38] sm:$0xff] }
0x214a   :  { %4656 = vmatprep.mubr.msk.f32.mxu0 %vm6833_vm1, %v6832_v43  ;;  %vm6904_vm1 = vcmask 23552  }
0x2209   :  { %v3829_v58 = vpop.f32.mrf.mxu0 }
0x220a   :  { %v3830_v26 = vadd.f32 %v6596_v41, %v3829_v58 }
0x220b   :  { %v3831_v23 = vpop.f32.mrf.mxu0 }
0x220c   :  { %4844 = vtanh.f32 %v3830_v26  ;;  %v4578_v63 = vmul.f32 -1.442695, %v3830_v26 }
0x220e   :  { %4846 = vpow2.f32 %v4578_v63 }
0x2219   :  { %v4845_v57 = vpop.eup %4844 }
0x221a   :  { %3842 = vrot.lane.b32.xlu1 %v4845_v57, %s4972_s22 }
0x221b   :  { %v4847_v47 = vpop.eup %4846 }
0x221c   :  { %v3836_v20 = vadd.f32 1.0, %v4847_v47 }
0x221e   :  { %4848 = vrcp.f32 %v3836_v20 }
0x222b   :  { %v4849_v27 = vpop.eup %4848 }
0x222c   :  { %v3840_v25 = vmul.f32 %v4849_v27, %v6335_v53  ;;  %v4951_v53 = vld [vmem:[%s6749_s2 + $0x8] sm:$0xff] }
0x228c   :  { %v3843_v36 = vpop.permute.xlu1 %3842 }
0x228d   :  { %v3845_v21 = vmul.f32 %v4849_v27, %v3843_v36 }
0x228f   :  { %3847 = vrot.lane.b32.xlu0 %v3845_v21, %s4972_s22 }
0x2301   :  { %v3848_v52 = vpop.permute.xlu0 %3847 }
0x2302   :  { %v6602_v3 = vadd.f32 %v3848_v52, %v3840_v25 }
0x2304   :  { %6903 = vst [vmem:[#allocation5_spill] sm:$0xff] %v6602_v3  ;;  %4850 = vtanh.f32 %v6602_v3 }
0x2311   :  { %v4851_v35 = vpop.eup %4850 }
0x2312   :  { %3853 = vrot.lane.b32.xlu1 %v4851_v35, %s4973_s23 }
0x2384   :  { %v3854_v59 = vpop.permute.xlu1 %3853 }
0x2385   :  { %v3856_v33 = vmul.f32 %v4849_v27, %v3854_v59 }
0x2387   :  { %3860 = vrot.lane.b32.xlu0 %v3856_v33, %s4974_s26 }
0x23f9   :  { %v3861_v61 = vpop.permute.xlu0 %3860 }
0x23fa   :  { %4652 = vmatmul.mubr.msk.f32.vlgmr.msra.gmra.mxu1 %vm6904_vm1, %v3861_v61 }
0x23fb   :  { %4223 = vmatpush1.msra.mxu1 %v4950_v51  ;;  %4258 = vmatprep.mubr.f32.mxu1 %v6832_v43 }
0x23fc   :  { %4224 = vmatprep.subr.mxu1 %v4951_v53 }
0x23fd   :  { %4225 = vmatpush1.msra.mxu1 %v4952_v18 }
0x23fe   :  { %4298 = vmatprep.subr.mxu1 %v6832_v43 }
0x24ba   :  { %v3930_v58 = vpop.f32.mrf.mxu1 }
0x24bb   :  { %v3931_v26 = vadd.f32 %v4579_v44, %v3930_v58 }
0x24bc   :  { %v4653_v23 = vpop.f32.mrf.mxu1 }
0x24bd   :  { %v6622_v57 = vmul.f32 0.5, %v3931_v26 }
0x24bf   :  { %v3938_v63 = vand.u32 2139095040, %v6622_v57  ;;  %v6817_v36 = vand.u32 2147483647, %v6622_v57  ;;  %vm3937_vm14 = vcmp.lt.s32.totalorder %v6622_v57, 0 }
0x24c1   :  { %v3939_v47 = vshrl.u32 %v3938_v63, 23  ;;  %v3942_v52 = vand.u32 8388607, %v6817_v36 }
0x24c3   :  { %v4582_v20 = vadd.s32 4294967169, %v3939_v47  ;;  %v3943_v47 = vor.u32 8388608, %v3942_v52 }
0x24c5   :  { %v3945_v27 = vadd.s32 1, %v4582_v20 }
0x24c7   :  { %vm3946_vm0 = vcmp.gt.s32.totalorder %v3945_v27, 0 }
0x24c8   :  { %v3947_v21 = vsel %vm3946_vm0, %v3945_v27, 0 }
0x24c9   :  { %v3949_v25 = vand.u32 31, %v3947_v21  ;;  %v3948_v59 = vshrl.u32 %v3947_v21, 5 }
0x24cb   :  { %v3950_v35 = vsub.s32 32, %v3949_v25  ;;  %v3952_v33 = vshll.u32 %v6826_v55, %v3949_v25  ;;  %v3955_v61 = vshll.u32 %v6895_v38, %v3949_v25  ;;  %v3958_v18 = vshll.u32 %v6896_v8, %v3949_v25 }
0x24cc   :  { %v3961_v58 = vshll.u32 %v6897_v0, %v3949_v25  ;;  %v3964_v23 = vshll.u32 %v6898_v48, %v3949_v25  ;;  %vm3967_vm15 = vcmp.lt.s32.totalorder %v3948_v59, 1  ;;  %vm3970_vm2 = vcmp.lt.s32.totalorder %v3948_v59, 4 }
0x24cd   :  { %v3953_v51 = vshrl.u32 %v6895_v38, %v3950_v35  ;;  %v3956_v53 = vshrl.u32 %v6896_v8, %v3950_v35  ;;  %v3959_v44 = vshrl.u32 %v6897_v0, %v3950_v35  ;;  %v3962_v26 = vshrl.u32 %v6898_v48, %v3950_v35 }
0x24ce   :  { %v3965_v63 = vshrl.u32 %v6899_v19, %v3950_v35  ;;  %v3951_v50 = vshrl.u32 %v6826_v55, %v3950_v35  ;;  %vm3969_vm3 = vcmp.lt.s32.totalorder %v3948_v59, 3  ;;  %vm3968_vm12 = vcmp.lt.s32.totalorder %v3948_v59, 2 }
0x24cf   :  { %v3954_v20 = vor.u32 %v3953_v51, %v3952_v33  ;;  %v3957_v27 = vor.u32 %v3956_v53, %v3955_v61  ;;  %v3960_v21 = vor.u32 %v3959_v44, %v3958_v18  ;;  %v3963_v36 = vor.u32 %v3962_v26, %v3961_v58 }
0x24d0   :  { %v3966_v38 = vor.u32 %v3965_v63, %v3964_v23  ;;  %v3983_v19 = vshll.u32 %v3943_v47, 8 }
0x24d1   :  { %v3972_v3 = vsel %vm3970_vm2, %v3960_v21, 2102212464  ;;  %v3975_v8 = vsel %vm3967_vm15, %v3954_v20, %v3957_v27  ;;  %v3979_v41 = vsel %vm3967_vm15, %v3957_v27, %v3960_v21  ;;  %v3976_v0 = vsel %vm3970_vm2, %v3963_v36, 920167782 }
0x24d2   :  { %v3980_v30 = vsel %vm3970_vm2, %v3966_v38, 1326507024  ;;  %v3977_v48 = vsel %vm3969_vm3, %v3960_v21, %v3976_v0  ;;  %v3971_v52 = vsel %vm3967_vm15, %v3951_v50, %v3954_v20  ;;  %v3973_v33 = vsel %vm3969_vm3, %v3957_v27, %v3972_v3 }
0x24d3   :  { %v3981_v25 = vsel %vm3969_vm3, %v3963_v36, %v3980_v30  ;;  %v3978_v61 = vsel %vm3968_vm12, %v3975_v8, %v3977_v48  ;;  %v3974_v26 = vsel %vm3968_vm12, %v3971_v52, %v3973_v33 }
0x24d4   :  { %v3982_v51 = vsel %vm3968_vm12, %v3979_v41, %v3981_v25  ;;  %v6642_v44 = vmul.u32.u64.low %v3983_v19, %v3978_v61  ;;  %v6643_v58 = vmul.u32.u64.high %v3983_v19, %v3978_v61, %v6642_v44  ;;  %v3990_v35 = vmul.u32 %v3983_v19, %v3974_v26 }
0x24d5   :  { %v6639_v53 = vmul.u32.u64.low %v3983_v19, %v3982_v51  ;;  %v6640_v18 = vmul.u32.u64.high %v3983_v19, %v3982_v51, %v6639_v53 }
0x24d6   :  { %v3993_v55 = vadd.s32 1, %v6643_v58 }
0x24d7   :  { %vm3992_vm13 = vc.u32 %v6640_v18, %v6642_v44  ;;  %v3991_v21 = vadd.s32 %v6642_v44, %v6640_v18 }
0x24d8   :  { %v3994_v59 = vsel %vm3992_vm13, %v3993_v55, %v6643_v58  ;;  %v6905_v55 = vand.u32 2147483647, %v6622_v57 }
0x24d9   :  { %v3995_v30 = vadd.s32 %v3994_v59, %v3990_v35 }
0x24da   :  { %vm3936_vm1 = vcmp.le.f32.partialorder %v6905_v55, 0.7853982 }
0x24db   :  { %v3996_v36 = vadd.s32 536870912, %v3995_v30 }
0x24dd   :  { %v3997_v50 = vshrl.u32 %v3996_v36, 30 }
0x24df   :  { %v3998_v3 = vshll.u32 %v3997_v50, 30  ;;  %v4021_v26 = vsub.s32 4, %v3997_v50 }
0x24e1   :  { %v3999_v23 = vsub.s32 %v3995_v30, %v3998_v3  ;;  %v4022_v44 = vsel %vm3937_vm14, %v4021_v26, %v3997_v50 }
0x24e2   :  { %v4024_v59 = vsel %vm3936_vm1, 0, %v4022_v44 }
0x24e3   :  { %v4001_v41 = vsub.s32 0, %v3999_v23  ;;  %v4131_v30 = vadd.s32 3, %v4024_v59  ;;  %v4028_v3 = vand.u32 3, %v4024_v59 }
0x24e5   :  { %v4583_v63 = vmin.u32 %v4001_v41, %v3999_v23  ;;  %v4132_v36 = vand.u32 3, %v4131_v30  ;;  %vm4033_vm15 = vcmp.eq.s32.totalorder %v4028_v3, 2  ;;  %vm4030_vm3 = vcmp.eq.s32.totalorder %v4028_v3, 0 }
0x24e6   :  { %vm4029_vm13 = vcmp.lt.s32.totalorder %v4028_v3, 2 }
0x24e7   :  { %v4003_v47 = vclz %v4583_v63  ;;  %vm4137_vm0 = vcmp.eq.s32.totalorder %v4132_v36, 2  ;;  %vm4134_vm2 = vcmp.eq.s32.totalorder %v4132_v36, 0  ;;  %vm4133_vm12 = vcmp.lt.s32.totalorder %v4132_v36, 2 }
0x24e9   :  { %v4584_v20 = vadd.s32 4294967294, %v4003_v47 }
0x24eb   :  { %vm4585_vm11 = vcmp.lt.s32.totalorder %v4584_v20, 0 }
0x24ec   :  { %v4006_v27 = vsel %vm4585_vm11, 0, %v4584_v20  ;;  %vm4027_vm11 = vweird.f32 %v6622_v57 }
0x24ed   :  { %v4007_v38 = vsub.s32 32, %v4006_v27  ;;  %v4011_v8 = vsub.s32 4294967266, %v4006_v27  ;;  %v4008_v0 = vshll.u32 %v3999_v23, %v4006_v27 }
0x24ef   :  { %v4009_v48 = vshrl.u32 %v3991_v21, %v4007_v38  ;;  %v4012_v25 = vadd.s32 127, %v4011_v8 }
0x24f1   :  { %v4010_v19 = vor.u32 %v4009_v48, %v4008_v0  ;;  %v4013_v52 = vshll.u32 %v4012_v25, 23 }
0x24f3   :  { %v4014_v33 = vor.u32 4788187, %v4013_v52  ;;  %v4017_v51 = vcvt.s32.f32 %v4010_v19 }
0x24f5   :  { %v4015_v61 = vand.u32 2147483647, %v4014_v33 }
0x24f7   :  { %v4018_v53 = vmul.f32 %v4017_v51, %v4015_v61 }
0x24f9   :  { %v4019_v58 = vxor.u32 2147483648, %v4018_v53 }
0x24fb   :  { %v4020_v35 = vsel %vm3937_vm14, %v4019_v58, %v4018_v53 }
0x24fc   :  { %v4023_v18 = vsel %vm3936_vm1, %v6622_v57, %v4020_v35 }
0x24fd   :  { %4852 = vcosq.f32 %v4023_v18 }
0x24fe   :  { %4854 = vsinq.f32 %v4023_v18 }
0x250a   :  { %v4853_v23 = vpop.eup %4852 }
0x250b   :  { %v4855_v41 = vpop.eup %4854  ;;  %v4034_v63 = vxor.u32 2147483648, %v4853_v23 }
0x250c   :  { %v4031_v47 = vxor.u32 2147483648, %v4855_v41 }
0x250d   :  { %v4139_v20 = vsel %vm4137_vm0, %v4034_v63, %v4855_v41  ;;  %v4035_v27 = vsel %vm4033_vm15, %v4034_v63, %v4855_v41  ;;  %v6909_v63 = vld [vmem:[#allocation5_spill] sm:$0xff] }
0x250e   :  { %v4136_v21 = vsel %vm4134_vm2, %v4853_v23, %v4031_v47  ;;  %v4032_v38 = vsel %vm4030_vm3, %v4853_v23, %v4031_v47 }
0x250f   :  { %v4140_v50 = vsel %vm4133_vm12, %v4136_v21, %v4139_v20  ;;  %v4036_v8 = vsel %vm4029_vm13, %v4032_v38, %v4035_v27  ;;  %v62_v21 = vld [vmem:[%s6753_s6] sm:$0x7] }
0x2510   :  { %v4141_v0 = vsel %vm4027_vm11, nan, %v4140_v50  ;;  %v4037_v48 = vsel %vm4027_vm11, nan, %v4036_v8  ;;  %v13_v50 = vstv %s6754_s7 }
0x2511   :  { %4150 = vperm.xlu0 %4762, %v4141_v0   ;;  %4144 = vperm.xlu1 %4761, %v4037_v48   ;;  %14 = vst [vmem:[#allocation2] sm:$0x1] %v13_v50 }
0x2515   :  { %4764 = vset.pattern.permute.xlu0 %v6828_v22  ;;  %4763 = vset.pattern.permute.xlu1 %v6829_v28 }
0x2516   :  { %4168 = vperm.xlu0 %4764, %v4037_v48   ;;  %4156 = vperm.xlu1 %4763, %v4037_v48  }
0x251a   :  { %4767 = vset.pattern.permute.xlu0 %v6830_v29  ;;  %4161 = vperm.xlu1 %4763, %v4141_v0  }
0x251b   :  { %4185 = vperm.xlu0 %4767, %v4141_v0  }
0x251e   :  { %4765 = vset.pattern.permute.xlu1 %v6828_v22 }
0x251f   :  { %4173 = vperm.xlu1 %4765, %v4141_v0  }
0x2523   :  { %4766 = vset.pattern.permute.xlu1 %v6830_v29 }
0x2524   :  { %4180 = vperm.xlu1 %4766, %v4037_v48  }
0x258c   :  { %v4145_v57 = vpop.permute.xlu1 %4144  ;;  %v4151_v25 = vpop.permute.xlu0 %4150 }
0x258d   :  { %v4153_v28 = vmul.f32 %v4151_v25, %v5111_v7  ;;  %v4147_v51 = vmul.f32 %v4145_v57, %v5115_v12  ;;  %v4593_v57 = vld [vmem:[#allocation2] ss:$0 sm:$0xff] }
0x258f   :  { %v4154_v35 = vadd.f32 %v4153_v28, %v4147_v51 }
0x2591   :  { %v4157_v19 = vpop.permute.xlu1 %4156  ;;  %v4169_v33 = vpop.permute.xlu0 %4168 }
0x2592   :  { %v4159_v53 = vmul.f32 %v4157_v19, %v5113_v11  ;;  %v4171_v26 = vmul.f32 %v4169_v33, %v5119_v15  ;;  %v6906_v11 = vld [vmem:[#allocation6_spill] sm:$0xff] }
0x2595   :  { %v4162_v52 = vpop.permute.xlu1 %4161 }
0x2596   :  { %v4164_v61 = vmul.f32 %v4162_v52, %v5109_v6  ;;  %v4186_v55 = vpop.permute.xlu0 %4185 }
0x2597   :  { %v4188_v30 = vmul.f32 %v4186_v55, %v5129_v34 }
0x2598   :  { %v4165_v29 = vadd.f32 %v4164_v61, %v4159_v53 }
0x259a   :  { %v4174_v58 = vpop.permute.xlu1 %4173  ;;  %v4166_v59 = vmul.f32 %v4165_v29, %v4154_v35 }
0x259b   :  { %v4176_v22 = vmul.f32 %v4174_v58, %v5117_v14  ;;  %v6907_v14 = vld [vmem:[#allocation3_spill] sm:$0xff] }
0x259d   :  { %v4177_v18 = vadd.f32 %v4176_v22, %v4171_v26 }
0x259f   :  { %v4181_v44 = vpop.permute.xlu1 %4180  ;;  %v4178_v7 = vmul.f32 %v4177_v18, %v4166_v59 }
0x25a0   :  { %v4183_v6 = vmul.f32 %v4181_v44, %v5127_v32 }
0x25a2   :  { %v4189_v36 = vadd.f32 %v4188_v30, %v4183_v6 }
0x25a4   :  { %v4190_v12 = vmul.f32 %v4189_v36, %v4178_v7 }
0x25a6   :  { %4271 = vrot.lane.b32.xlu0 %v4190_v12, %s4965_s5  ;;  %4265 = vrot.lane.b32.xlu1 %v4190_v12, %s4966_s19 }
0x25a7   :  { %4590 = vmatmul.mubr.msk.f32.vlgmr.msra.gmra.mxu1 %vm433_vm4, %v4190_v12 }
0x25a8   :  { %4299 = vmatpush1.msra.mxu1 %v6407_v37 }
0x25a9   :  { %4300 = vmatprep.subr.mxu1 %v6832_v43 }
0x25aa   :  { %4277 = vrot.lane.b32.xlu0 %v4190_v12, %s4967_s24  ;;  %4268 = vrot.lane.b32.xlu1 %v4190_v12, %s4968_s25 }
0x25ab   :  { %4301 = vmatpush1.msra.mxu1 %v6418_v39 }
0x25ac   :  { %4302 = vmatprep.subr.mxu1 %v6832_v43 }
0x25ad   :  { %4303 = vmatpush1.msra.mxu1 %v6425_v16 }
0x25ae   :  { %4283 = vrot.lane.b32.xlu0 %v4190_v12, %s4969_s30  ;;  %4274 = vrot.lane.b32.xlu1 %v4190_v12, %s4970_s9 }
0x25af   :  { %4304 = vmatprep.subr.mxu1 %v6832_v43 }
0x25b0   :  { %4305 = vmatpush1.msra.mxu1 %v6436_v46 }
0x25b1   :  { %4306 = vmatprep.subr.mxu1 %v6832_v43 }
0x25b2   :  { %4280 = vrot.lane.b32.xlu1 %v4190_v12, %s4971_s14  ;;  %4307 = vmatpush1.msra.mxu1 %v6445_v9 }
0x25b3   :  { %4308 = vmatprep.subr.mxu1 %v6832_v43 }
0x25b4   :  { %4309 = vmatpush1.msra.mxu1 %v6452_v54 }
0x25b5   :  { %4310 = vmatprep.subr.mxu1 %v6832_v43 }
0x25b6   :  { %4311 = vmatpush1.msra.mxu1 %v6459_v10 }
0x25b7   :  { %4312 = vmatprep.subr.mxu1 %v6832_v43 }
0x25b8   :  { %4313 = vmatpush1.msra.mxu1 %v6466_v45 }
0x25b9   :  { %4314 = vmatprep.subr.mxu1 %v6832_v43 }
0x25ba   :  { %4315 = vmatpush1.msra.mxu1 %v6473_v2 }
0x25bb   :  { %4316 = vmatprep.subr.mxu1 %v6832_v43 }
0x25bc   :  { %4317 = vmatpush1.msra.mxu1 %v6480_v56 }
0x25bd   :  { %4318 = vmatprep.subr.mxu1 %v6832_v43 }
0x25be   :  { %4319 = vmatpush1.msra.mxu1 %v6487_v5 }
0x25bf   :  { %4320 = vmatprep.subr.mxu1 %v6832_v43 }
0x25c0   :  { %4321 = vmatpush1.msra.mxu1 %v6494_v40 }
0x25c1   :  { %4322 = vmatprep.subr.mxu1 %v6832_v43 }
0x25c2   :  { %4323 = vmatpush1.msra.mxu1 %v6501_v42 }
0x25c3   :  { %4324 = vmatprep.subr.mxu1 %v6832_v43 }
0x25c4   :  { %4325 = vmatpush1.msra.mxu1 %v6508_v24 }
0x25c5   :  { %4326 = vmatprep.subr.mxu1 %v6832_v43 }
0x25c6   :  { %4327 = vmatpush1.msra.mxu1 %v6515_v31 }
0x25c7   :  { %4328 = vmatprep.subr.mxu1 %v6832_v43 }
0x25c8   :  { %4329 = vmatpush1.msra.mxu1 %v6522_v13  ;;  %v6908_v13 = vld [vmem:[#allocation4_spill] sm:$0xff] }
0x25c9   :  { %4346 = vmatprep.subr.mxu1 %v6832_v43 }
0x25ca   :  { %4347 = vmatpush2.msra.mxu1 %v6529_v4 }
0x25cb   :  { %4348 = vmatprep.subr.mxu1 %v6832_v43 }
0x25cc   :  { %4349 = vmatpush2.msra.mxu1 %v6536_v60 }
0x25cd   :  { %4350 = vmatprep.subr.mxu1 %v6832_v43 }
0x25ce   :  { %4351 = vmatpush2.msra.mxu1 %v6543_v1 }
0x25cf   :  { %4352 = vmatprep.subr.mxu1 %v6832_v43 }
0x25d0   :  { %4353 = vmatpush2.msra.mxu1 %v6550_v49 }
0x25d1   :  { %4354 = vmatprep.subr.mxu1 %v6832_v43 }
0x25d2   :  { %4355 = vmatpush2.msra.mxu1 %v6557_v17 }
0x25d3   :  { %4356 = vmatprep.subr.mxu1 %v6832_v43 }
0x25d4   :  { %4357 = vmatpush2.msra.mxu1 %v6564_v62 }
0x25d5   :  { %4358 = vmatprep.subr.mxu1 %v6832_v43 }
0x25d6   :  { %4359 = vmatpush2.msra.mxu1 %v6906_v11 }
0x25d7   :  { %4360 = vmatprep.subr.mxu1 %v6832_v43 }
0x25d8   :  { %4361 = vmatpush2.msra.mxu1 %v6907_v14 }
0x2618   :  { %v4266_v15 = vpop.permute.xlu1 %4265  ;;  %v4272_v34 = vpop.permute.xlu0 %4271 }
0x2619   :  { %v4286_v37 = vsel %vm433_vm4, %v4190_v12, %v4266_v15  ;;  %vm6910_vm4 = vcmask 1042432  }
0x261a   :  { %4655 = vmatpush3.msk.msra.mxu0 %vm6910_vm4, %v62_v21 }
0x261c   :  { %v4269_v32 = vpop.permute.xlu1 %4268  ;;  %v4278_v9 = vpop.permute.xlu0 %4277 }
0x261d   :  { %v4287_v16 = vsel %vm530_vm5, %v4286_v37, %v4269_v32  ;;  %vm6911_vm5 = vcmask 23552  }
0x261e   :  { %v4288_v46 = vsel %vm532_vm6, %v4287_v16, %v4272_v34  ;;  %vm4476_vm6 = vcmask 7168  }
0x2620   :  { %v4275_v39 = vpop.permute.xlu1 %4274  ;;  %v4284_v56 = vpop.permute.xlu0 %4283 }
0x2621   :  { %v4289_v54 = vsel %vm534_vm7, %v4288_v46, %v4275_v39 }
0x2622   :  { %v4290_v45 = vsel %vm536_vm8, %v4289_v54, %v4278_v9 }
0x2624   :  { %v4281_v10 = vpop.permute.xlu1 %4280 }
0x2625   :  { %v4291_v43 = vsel %vm538_vm9, %v4290_v45, %v4281_v10 }
0x2626   :  { %v4292_v40 = vsel %vm540_vm10, %v4291_v43, %v4284_v56 }
0x2667   :  { %v4260_v2 = vpop.f32.mrf.mxu1 }
0x2668   :  { %v4293_v24 = vmul.f32 %v4292_v40, %v4260_v2 }
0x2669   :  { %v4262_v5 = vpop.f32.mrf.mxu1 }
0x266a   :  { %v4294_v42 = vmul.f32 %v4288_v46, %v4262_v5 }
0x266c   :  { %4591 = vmatprep.mubr.msk.f32.mxu1 %vm534_vm7, %v4294_v42 }
0x266d   :  { %4363 = vmatmul.mubr.f32.vlgmr.msra.gmra.mxu1 %v4293_v24 }
0x272d   :  { %v4364_v31 = vpop.f32.mrf.mxu1 }
0x272e   :  { %v4365_v4 = vadd.f32 %v6908_v13, %v4364_v31 }
0x272f   :  { %v4366_v60 = vpop.f32.mrf.mxu1 }
0x2730   :  { %4856 = vtanh.f32 %v4365_v4  ;;  %v4592_v49 = vmul.f32 -1.442695, %v4365_v4 }
0x2732   :  { %4858 = vpow2.f32 %v4592_v49 }
0x273d   :  { %v4857_v1 = vpop.eup %4856 }
0x273e   :  { %4377 = vrot.lane.b32.xlu1 %v4857_v1, %s4972_s22 }
0x273f   :  { %v4859_v17 = vpop.eup %4858 }
0x2740   :  { %v4371_v62 = vadd.f32 1.0, %v4859_v17 }
0x2742   :  { %4860 = vrcp.f32 %v4371_v62 }
0x274f   :  { %v4861_v3 = vpop.eup %4860 }
0x2750   :  { %v4375_v47 = vmul.f32 %v4861_v3, %v6909_v63 }
0x27b0   :  { %v4378_v23 = vpop.permute.xlu1 %4377 }
0x27b1   :  { %v4380_v41 = vmul.f32 %v4861_v3, %v4378_v23 }
0x27b3   :  { %4382 = vrot.lane.b32.xlu0 %v4380_v41, %s4972_s22 }
0x2825   :  { %v4383_v20 = vpop.permute.xlu0 %4382 }
0x2826   :  { %v4385_v27 = vadd.f32 %v4383_v20, %v4375_v47 }
0x2828   :  { %4862 = vtanh.f32 %v4385_v27 }
0x2835   :  { %v4863_v38 = vpop.eup %4862 }
0x2836   :  { %4388 = vrot.lane.b32.xlu1 %v4863_v38, %s4973_s23 }
0x28a8   :  { %v4389_v8 = vpop.permute.xlu1 %4388 }
0x28a9   :  { %v4391_v0 = vmul.f32 %v4861_v3, %v4389_v8 }
0x28ab   :  { %4399 = vrot.lane.b32.xlu0 %v4391_v0, %s4974_s26 }
0x291d   :  { %v4400_v48 = vpop.permute.xlu0 %4399 }
0x291e   :  { %4657 = vmatmul.mubr.msk.f32.vlgmr.msra.gmra.mxu0 %vm6911_vm5, %v4400_v48 }
0x29de   :  { %v4472_v25 = vpop.f32.mrf.mxu0 }
0x29df   :  { %v4473_v19 = vadd.f32 %v4593_v57, %v4472_v25 }
0x29e0   :  { %v4658_v52 = vpop.f32.mrf.mxu0 }
0x29e1   :  { %4477 = vst.msk [vmem:[%s6755_s8] sm:$0xff] %vm4476_vm6, %v4473_v19 }

</bundles_post_ra>
